<compile_context>
chip_gen: v7x
topology: tpu7x:2x2x1
jax: 0.10.0
libtpu: 0.0.40
codegen_flags: <defaults>
</compile_context>

<pallas_src>
import functools
import math

import jax
import jax.numpy as jnp
from jax.experimental import pallas as pl
from jax.experimental.pallas import tpu as pltpu  # noqa: F401  (TPU backend)

# ---------------- config: prajjwal1/bert-tiny + classifier head ----------------
HIDDEN = 128          # bert-tiny hidden_size
N_LAYERS = 2
N_HEADS = 2
HEAD_DIM = HIDDEN // N_HEADS
INTERMEDIATE = 512
VOCAB = 30522
MAX_POS = 512
LN_EPS = 1e-12
NUM_LABELS = 6        # emotions
EXPANSION = 2         # expansion_factor in EmotionClassifier

# packed small-parameter slab layout
SLAB_W = 512                    # lane width (>= 3H, >= INTERMEDIATE, >= 2H)
SLAB_GLOBAL_ROWS = 2            # row0: emb_ln_g|emb_ln_b|pooler_b ; row1: b1
SLAB_LAYER_ROWS = 4             # bqkv | bo,ln1_g,ln1_b,bf | bi | ln2_g,ln2_b
SLAB_ROWS = SLAB_GLOBAL_ROWS + SLAB_LAYER_ROWS * N_LAYERS
WEIGHTS_PER_LAYER = 4           # wqkv, wo, wi, wf (bf16)


# ------------------------------- kernel body ------------------------------------
def _layernorm(x, g, b):
    mean = jnp.mean(x, axis=-1, keepdims=True)
    xc = x - mean
    var = jnp.mean(xc * xc, axis=-1, keepdims=True)
    return xc * jax.lax.rsqrt(var + LN_EPS) * g + b


def _gelu(x):
    # TODO(synk): HF BERT 'gelu' is the exact erf-based GELU; the tanh
    # approximation keeps us on guaranteed-lowering VPU/EUP ops (mul/tanh).
    c = math.sqrt(2.0 / math.pi)
    return 0.5 * x * (1.0 + jnp.tanh(c * (x + 0.044715 * x * x * x)))


def _model_kernel(*refs, B, S):
    """Entire post-embedding model in one grid-less kernel invocation.

    refs = [emb (f32, (B*S,H)), mask_bias (f32, (B,S)), slab (f32, (SLAB_ROWS,512)),
            per layer: wqkv, wo, wi, wf (bf16),
            pooler_w (bf16), lin1_w (bf16),
            out h1 (f32, (B, 2H))]
    """
    o_ref = refs[-1]
    emb_ref, mask_ref, slab_ref = refs[0], refs[1], refs[2]
    w_refs = refs[3:3 + WEIGHTS_PER_LAYER * N_LAYERS]
    wp_ref = refs[3 + WEIGHTS_PER_LAYER * N_LAYERS]
    w1_ref = refs[4 + WEIGHTS_PER_LAYER * N_LAYERS]

    slab = slab_ref[...]                                       # (SLAB_ROWS, 512) f32

    def srow(r, lo, hi):
        # static, 128-lane-aligned slice of one slab row -> (1, hi-lo)
        return slab[r:r + 1, lo:hi]

    emb_g = srow(0, 0, HIDDEN)
    emb_b = srow(0, HIDDEN, 2 * HIDDEN)
    pooler_b = srow(0, 2 * HIDDEN, 3 * HIDDEN)
    b1 = srow(1, 0, EXPANSION * HIDDEN)

    # --- embeddings LayerNorm (f32) ---
    x = _layernorm(emb_ref[...], emb_g, emb_b)                 # (B*S, H) f32

    # additive attention-mask bias, broadcast over query rows (kept in f32:
    # -1e9 would saturate in bf16)
    bias = mask_ref[...][:, None, :]                           # (B, 1, S)

    # --- encoder layers (unrolled at trace time), fully fused ---
    for l in range(N_LAYERS):
        wqkv = w_refs[WEIGHTS_PER_LAYER * l + 0][...]          # (H, 3H)  bf16
        wo = w_refs[WEIGHTS_PER_LAYER * l + 1][...]            # (H, H)   bf16
        wi = w_refs[WEIGHTS_PER_LAYER * l + 2][...]            # (H, 4H)  bf16
        wf = w_refs[WEIGHTS_PER_LAYER * l + 3][...]            # (4H, H)  bf16
        base = SLAB_GLOBAL_ROWS + SLAB_LAYER_ROWS * l
        bqkv = srow(base + 0, 0, 3 * HIDDEN)                   # Q third pre-scaled
        bo = srow(base + 1, 0, HIDDEN)
        ln1_g = srow(base + 1, HIDDEN, 2 * HIDDEN)
        ln1_b = srow(base + 1, 2 * HIDDEN, 3 * HIDDEN)
        bf = srow(base + 1, 3 * HIDDEN, 4 * HIDDEN)
        bi = srow(base + 2, 0, INTERMEDIATE)
        ln2_g = srow(base + 3, 0, HIDDEN)
        ln2_b = srow(base + 3, HIDDEN, 2 * HIDDEN)

        # single fused QKV projection: bf16 operands -> f32 accumulate
        qkv = jnp.dot(x.astype(jnp.bfloat16), wqkv,
                      preferred_element_type=jnp.float32) + bqkv      # (B*S, 3H) f32
        q = qkv[:, 0 * HIDDEN:1 * HIDDEN].reshape(B, S, HIDDEN)
        k = qkv[:, 1 * HIDDEN:2 * HIDDEN].reshape(B, S, HIDDEN)
        v = qkv[:, 2 * HIDDEN:3 * HIDDEN].reshape(B, S, HIDDEN)

        # per-head attention (softmax math in f32); head contexts are
        # lane-concatenated so the output projection is ONE full-contraction
        # (B*S,H) @ (H,H) matmul.
        ctx_parts = []
        for h in range(N_HEADS):
            sl = slice(h * HEAD_DIM, (h + 1) * HEAD_DIM)
            s = jnp.einsum("bqd,bkd->bqk",
                           q[:, :, sl].astype(jnp.bfloat16),
                           k[:, :, sl].astype(jnp.bfloat16),
                           preferred_element_type=jnp.float32)        # scores (pre-scaled)
            s = s + bias
            s = s - jnp.max(s, axis=-1, keepdims=True)
            p = jnp.exp(s)
            p = p * pl.reciprocal(jnp.sum(p, axis=-1, keepdims=True), approx=True)
            ctx_h = jnp.einsum("bqk,bkd->bqd",
                               p.astype(jnp.bfloat16),
                               v[:, :, sl].astype(jnp.bfloat16),
                               preferred_element_type=jnp.float32)    # (B, S, dh)
            ctx_parts.append(ctx_h.reshape(B * S, HEAD_DIM))
        ctx = jnp.concatenate(ctx_parts, axis=-1)                     # (B*S, H) f32
        attn_out = jnp.dot(ctx.astype(jnp.bfloat16), wo,
                           preferred_element_type=jnp.float32) + bo

        # residual + LayerNorm (f32)
        x = _layernorm(attn_out + x, ln1_g, ln1_b)

        # FFN: inter (gelu, f32) -> out, residual + LayerNorm
        inter = _gelu(jnp.dot(x.astype(jnp.bfloat16), wi,
                              preferred_element_type=jnp.float32) + bi)   # (B*S, 512)
        ffn = jnp.dot(inter.astype(jnp.bfloat16), wf,
                      preferred_element_type=jnp.float32) + bf
        x = _layernorm(ffn + x, ln2_g, ln2_b)

    # --- pooler on [CLS] token + linear1/relu (linear2 stays in XLA) ---
    cls = x.reshape(B, S, HIDDEN)[:, 0:1, :].reshape(B, HIDDEN)       # (B, H)
    pooled = jnp.tanh(jnp.dot(cls.astype(jnp.bfloat16), wp_ref[...],
                              preferred_element_type=jnp.float32) + pooler_b)
    h1 = jnp.maximum(jnp.dot(pooled.astype(jnp.bfloat16), w1_ref[...],
                             preferred_element_type=jnp.float32) + b1,
                     0.0)                                             # (B, 2H) lane-dense
    o_ref[...] = h1.astype(o_ref.dtype)


# ------------------------ deterministic parameter init -------------------------
def init_params(key):
    keys = iter(jax.random.split(key, 64))
    scale_q = 1.0 / math.sqrt(HEAD_DIM)

    def dense(k, fan_in, fan_out):
        w = 0.02 * jax.random.normal(k, (fan_in, fan_out), jnp.float32)
        b = jnp.zeros((fan_out,), jnp.float32)
        return w, b

    def pack_row(*vecs):
        v = jnp.concatenate([jnp.ravel(a) for a in vecs])
        return jnp.pad(v, (0, SLAB_W - v.shape[0]))

    p = {}
    p["word_emb"] = 0.02 * jax.random.normal(next(keys), (VOCAB, HIDDEN), jnp.float32)
    p["pos_emb"] = 0.02 * jax.random.normal(next(keys), (MAX_POS, HIDDEN), jnp.float32)
    p["type_emb"] = 0.02 * jax.random.normal(next(keys), (2, HIDDEN), jnp.float32)
    emb_ln_g = jnp.ones((HIDDEN,), jnp.float32)
    emb_ln_b = jnp.zeros((HIDDEN,), jnp.float32)

    layer_weights = []
    layer_rows = []
    for _ in range(N_LAYERS):
        wq, bq = dense(next(keys), HIDDEN, HIDDEN)
        wk, bk = dense(next(keys), HIDDEN, HIDDEN)
        wv, bv = dense(next(keys), HIDDEN, HIDDEN)
        # fused QKV weight with the Q third pre-scaled by 1/sqrt(head_dim)
        wqkv = jnp.concatenate([wq * scale_q, wk, wv], axis=1).astype(jnp.bfloat16)
        wo, bo = dense(next(keys), HIDDEN, HIDDEN)
        ln1_g = jnp.ones((HIDDEN,), jnp.float32)
        ln1_b = jnp.zeros((HIDDEN,), jnp.float32)
        wi, bi = dense(next(keys), HIDDEN, INTERMEDIATE)
        wf, bf = dense(next(keys), INTERMEDIATE, HIDDEN)
        ln2_g = jnp.ones((HIDDEN,), jnp.float32)
        ln2_b = jnp.zeros((HIDDEN,), jnp.float32)

        layer_weights.append((wqkv,
                              wo.astype(jnp.bfloat16),
                              wi.astype(jnp.bfloat16),
                              wf.astype(jnp.bfloat16)))
        layer_rows.extend([
            pack_row(bq * scale_q, bk, bv),          # fused (pre-scaled) QKV bias
            pack_row(bo, ln1_g, ln1_b, bf),
            pack_row(bi),
            pack_row(ln2_g, ln2_b),
        ])

    wp, bp = dense(next(keys), HIDDEN, HIDDEN)
    w1, b1 = dense(next(keys), HIDDEN, HIDDEN * EXPANSION)
    w2, b2 = dense(next(keys), HIDDEN * EXPANSION, NUM_LABELS)

    p["layer_weights"] = layer_weights
    p["pooler_w"] = wp.astype(jnp.bfloat16)
    p["lin1_w"] = w1.astype(jnp.bfloat16)
    p["lin2"] = (w2, b2)          # 6-wide logits matmul stays in XLA

    # ONE contiguous f32 slab for every sub-KB parameter -> a single DMA.
    rows = [pack_row(emb_ln_g, emb_ln_b, bp), pack_row(b1)] + layer_rows
    p["slab"] = jnp.stack(rows)   # (SLAB_ROWS, 512)
    assert p["slab"].shape == (SLAB_ROWS, SLAB_W)
    return p


# --------------------------------- forward -------------------------------------
@jax.jit
def emotion_classifier_forward(params, input_ids, attention_mask):
    B, S = input_ids.shape

    # BERT embeddings: gathers stay in XLA so the 30522x128 table never hits VMEM.
    we = jnp.take(params["word_emb"], input_ids, axis=0)          # (B, S, H)
    pe = params["pos_emb"][:S][None, :, :]                        # (1, S, H)
    te = params["type_emb"][0][None, None, :]                     # token_type_ids = 0
    emb = (we + pe + te).reshape(B * S, HIDDEN)

    # HF-style extended attention mask: (1 - mask) * large_negative (kept f32)
    mask_bias = (1.0 - attention_mask.astype(jnp.float32)) * -1e9  # (B, S)

    flat = [emb, mask_bias, params["slab"]]
    for lw in params["layer_weights"]:
        flat.extend(lw)
    flat.extend([params["pooler_w"], params["lin1_w"]])

    # ONE grid-less pallas_call for the whole post-embedding model:
    # ~0.9 MB bf16 weights + 20 KB slab + 8 KB activations over 13 input DMAs.
    h1 = pl.pallas_call(
        functools.partial(_model_kernel, B=B, S=S),
        out_shape=jax.ShapeDtypeStruct((B, HIDDEN * EXPANSION), jnp.float32),
    )(*flat)

    # 6-wide logits in XLA (avoids DMA-ing a ~95%-zero padded weight slab).
    w2, b2 = params["lin2"]
    return h1 @ w2 + b2


if __name__ == "__main__":
    key = jax.random.PRNGKey(0)
    pkey, ikey = jax.random.split(key)
    params = init_params(pkey)

    B, S = 2, 8
    input_ids = jax.random.randint(ikey, (B, S), 0, VOCAB, dtype=jnp.int32)
    attention_mask = jnp.ones((B, S), jnp.int32).at[1, 6:].set(0)  # pad tail of row 1

    logits = emotion_classifier_forward(params, input_ids, attention_mask)
    jax.block_until_ready(logits)
    assert logits.shape == (B, NUM_LABELS) and logits.dtype == jnp.float32
    print("KERNEL_OK")
</pallas_src>

<mosaic_0001>
module attributes {stable_mosaic.version = 11 : i64} {
  func.func @_model_kernel(%arg0: memref<16x128xf32, #tpu.memory_space<vmem>>, %arg1: memref<2x8xf32, #tpu.memory_space<vmem>>, %arg2: memref<10x512xf32, #tpu.memory_space<vmem>>, %arg3: memref<128x384xbf16, #tpu.memory_space<vmem>>, %arg4: memref<128x128xbf16, #tpu.memory_space<vmem>>, %arg5: memref<128x512xbf16, #tpu.memory_space<vmem>>, %arg6: memref<512x128xbf16, #tpu.memory_space<vmem>>, %arg7: memref<128x384xbf16, #tpu.memory_space<vmem>>, %arg8: memref<128x128xbf16, #tpu.memory_space<vmem>>, %arg9: memref<128x512xbf16, #tpu.memory_space<vmem>>, %arg10: memref<512x128xbf16, #tpu.memory_space<vmem>>, %arg11: memref<128x128xbf16, #tpu.memory_space<vmem>>, %arg12: memref<128x256xbf16, #tpu.memory_space<vmem>>, %arg13: memref<2x256xf32, #tpu.memory_space<vmem>>) attributes {dimension_semantics = [], scalar_prefetch = 0 : i64, scratch_operands = 0 : i64, tpu.core_type = #tpu.core_type<tc>} {
    %c0 = arith.constant 0 : index
    %c0_0 = arith.constant 0 : index
    %0 = vector.load %arg2[%c0, %c0_0] : memref<10x512xf32, #tpu.memory_space<vmem>>, vector<10x512xf32>
    %1 = vector.extract_strided_slice %0 {offsets = [0, 0], sizes = [1, 128], strides = [1, 1]} : vector<10x512xf32> to vector<1x128xf32>
    %2 = vector.extract_strided_slice %0 {offsets = [0, 128], sizes = [1, 128], strides = [1, 1]} : vector<10x512xf32> to vector<1x128xf32>
    %3 = vector.extract_strided_slice %0 {offsets = [0, 256], sizes = [1, 128], strides = [1, 1]} : vector<10x512xf32> to vector<1x128xf32>
    %4 = vector.extract_strided_slice %0 {offsets = [1, 0], sizes = [1, 256], strides = [1, 1]} : vector<10x512xf32> to vector<1x256xf32>
    %c0_1 = arith.constant 0 : index
    %c0_2 = arith.constant 0 : index
    %5 = vector.load %arg0[%c0_1, %c0_2] : memref<16x128xf32, #tpu.memory_space<vmem>>, vector<16x128xf32>
    %cst = arith.constant dense<0.000000e+00> : vector<16xf32>
    %6 = vector.multi_reduction <add>, %5, %cst [1] : vector<16x128xf32> to vector<16xf32>
    %7 = vector.shape_cast %6 : vector<16xf32> to vector<16x1xf32>
    %cst_3 = arith.constant 1.280000e+02 : f32
    %8 = vector.broadcast %cst_3 : f32 to vector<16x1xf32>
    %9 = arith.divf %7, %8 : vector<16x1xf32>
    %10 = vector.broadcast %9 : vector<16x1xf32> to vector<16x128xf32>
    %11 = arith.subf %5, %10 : vector<16x128xf32>
    %12 = arith.mulf %11, %11 : vector<16x128xf32>
    %cst_4 = arith.constant dense<0.000000e+00> : vector<16xf32>
    %13 = vector.multi_reduction <add>, %12, %cst_4 [1] : vector<16x128xf32> to vector<16xf32>
    %14 = vector.shape_cast %13 : vector<16xf32> to vector<16x1xf32>
    %cst_5 = arith.constant 1.280000e+02 : f32
    %15 = vector.broadcast %cst_5 : f32 to vector<16x1xf32>
    %16 = arith.divf %14, %15 : vector<16x1xf32>
    %cst_6 = arith.constant 9.99999996E-13 : f32
    %17 = vector.broadcast %cst_6 : f32 to vector<16x1xf32>
    %18 = arith.addf %16, %17 : vector<16x1xf32>
    %19 = math.rsqrt %18 : vector<16x1xf32>
    %20 = vector.broadcast %19 : vector<16x1xf32> to vector<16x128xf32>
    %21 = arith.mulf %11, %20 : vector<16x128xf32>
    %22 = vector.broadcast %1 : vector<1x128xf32> to vector<16x128xf32>
    %23 = arith.mulf %21, %22 : vector<16x128xf32>
    %24 = vector.broadcast %2 : vector<1x128xf32> to vector<16x128xf32>
    %25 = arith.addf %23, %24 : vector<16x128xf32>
    %c0_7 = arith.constant 0 : index
    %c0_8 = arith.constant 0 : index
    %26 = vector.load %arg1[%c0_7, %c0_8] : memref<2x8xf32, #tpu.memory_space<vmem>>, vector<2x8xf32>
    %27 = vector.shape_cast %26 : vector<2x8xf32> to vector<2x1x8xf32>
    %c0_9 = arith.constant 0 : index
    %c0_10 = arith.constant 0 : index
    %28 = vector.load %arg3[%c0_9, %c0_10] : memref<128x384xbf16, #tpu.memory_space<vmem>>, vector<128x384xbf16>
    %c0_11 = arith.constant 0 : index
    %c0_12 = arith.constant 0 : index
    %29 = vector.load %arg4[%c0_11, %c0_12] : memref<128x128xbf16, #tpu.memory_space<vmem>>, vector<128x128xbf16>
    %c0_13 = arith.constant 0 : index
    %c0_14 = arith.constant 0 : index
    %30 = vector.load %arg5[%c0_13, %c0_14] : memref<128x512xbf16, #tpu.memory_space<vmem>>, vector<128x512xbf16>
    %c0_15 = arith.constant 0 : index
    %c0_16 = arith.constant 0 : index
    %31 = vector.load %arg6[%c0_15, %c0_16] : memref<512x128xbf16, #tpu.memory_space<vmem>>, vector<512x128xbf16>
    %32 = vector.extract_strided_slice %0 {offsets = [2, 0], sizes = [1, 384], strides = [1, 1]} : vector<10x512xf32> to vector<1x384xf32>
    %33 = vector.extract_strided_slice %0 {offsets = [3, 0], sizes = [1, 128], strides = [1, 1]} : vector<10x512xf32> to vector<1x128xf32>
    %34 = vector.extract_strided_slice %0 {offsets = [3, 128], sizes = [1, 128], strides = [1, 1]} : vector<10x512xf32> to vector<1x128xf32>
    %35 = vector.extract_strided_slice %0 {offsets = [3, 256], sizes = [1, 128], strides = [1, 1]} : vector<10x512xf32> to vector<1x128xf32>
    %36 = vector.extract_strided_slice %0 {offsets = [3, 384], sizes = [1, 128], strides = [1, 1]} : vector<10x512xf32> to vector<1x128xf32>
    %37 = vector.extract_strided_slice %0 {offsets = [4, 0], sizes = [1, 512], strides = [1, 1]} : vector<10x512xf32> to vector<1x512xf32>
    %38 = vector.extract_strided_slice %0 {offsets = [5, 0], sizes = [1, 128], strides = [1, 1]} : vector<10x512xf32> to vector<1x128xf32>
    %39 = vector.extract_strided_slice %0 {offsets = [5, 128], sizes = [1, 128], strides = [1, 1]} : vector<10x512xf32> to vector<1x128xf32>
    %40 = arith.truncf %25 : vector<16x128xf32> to vector<16x128xbf16>
    %cst_17 = arith.constant dense<0.000000e+00> : vector<16x384xf32>
    %41 = tpu.matmul %40, %28, %cst_17 {dimension_numbers = #tpu.dot_dimension_numbers<[1], [0], [0], [1], [0, 0, 1, 1], [], []>} : vector<16x128xbf16>, vector<128x384xbf16>, vector<16x384xf32> -> vector<16x384xf32>
    %42 = vector.broadcast %32 : vector<1x384xf32> to vector<16x384xf32>
    %43 = arith.addf %41, %42 : vector<16x384xf32>
    %44 = vector.extract_strided_slice %43 {offsets = [0, 0], sizes = [16, 128], strides = [1, 1]} : vector<16x384xf32> to vector<16x128xf32>
    %45 = vector.shape_cast %44 : vector<16x128xf32> to vector<2x8x128xf32>
    %46 = vector.extract_strided_slice %43 {offsets = [0, 128], sizes = [16, 128], strides = [1, 1]} : vector<16x384xf32> to vector<16x128xf32>
    %47 = vector.shape_cast %46 : vector<16x128xf32> to vector<2x8x128xf32>
    %48 = vector.extract_strided_slice %43 {offsets = [0, 256], sizes = [16, 128], strides = [1, 1]} : vector<16x384xf32> to vector<16x128xf32>
    %49 = vector.shape_cast %48 : vector<16x128xf32> to vector<2x8x128xf32>
    %50 = vector.extract_strided_slice %45 {offsets = [0, 0, 0], sizes = [2, 8, 64], strides = [1, 1, 1]} : vector<2x8x128xf32> to vector<2x8x64xf32>
    %51 = arith.truncf %50 : vector<2x8x64xf32> to vector<2x8x64xbf16>
    %52 = vector.extract_strided_slice %47 {offsets = [0, 0, 0], sizes = [2, 8, 64], strides = [1, 1, 1]} : vector<2x8x128xf32> to vector<2x8x64xf32>
    %53 = arith.truncf %52 : vector<2x8x64xf32> to vector<2x8x64xbf16>
    "tpu.trace_start"() <{level = 10 : i32, message = "bqd,bkd->bqk"}> : () -> ()
    %cst_18 = arith.constant dense<0.000000e+00> : vector<2x8x8xf32>
    %54 = tpu.matmul %51, %53, %cst_18 {dimension_numbers = #tpu.dot_dimension_numbers<[2], [2], [1], [1], [0, 0, 0, 1, 1, 1], [0], [0]>} : vector<2x8x64xbf16>, vector<2x8x64xbf16>, vector<2x8x8xf32> -> vector<2x8x8xf32>
    "tpu.trace_stop"() : () -> ()
    %55 = vector.broadcast %27 : vector<2x1x8xf32> to vector<2x8x8xf32>
    %56 = arith.addf %54, %55 : vector<2x8x8xf32>
    %cst_19 = arith.constant dense<0xFF800000> : vector<2x8xf32>
    %57 = vector.multi_reduction <maximumf>, %56, %cst_19 [2] : vector<2x8x8xf32> to vector<2x8xf32>
    %58 = vector.shape_cast %57 : vector<2x8xf32> to vector<2x8x1xf32>
    %59 = vector.broadcast %58 : vector<2x8x1xf32> to vector<2x8x8xf32>
    %60 = arith.subf %56, %59 : vector<2x8x8xf32>
    %61 = math.exp %60 : vector<2x8x8xf32>
    %cst_20 = arith.constant dense<0.000000e+00> : vector<2x8xf32>
    %62 = vector.multi_reduction <add>, %61, %cst_20 [2] : vector<2x8x8xf32> to vector<2x8xf32>
    %63 = vector.shape_cast %62 : vector<2x8xf32> to vector<2x8x1xf32>
    %64 = tpu.reciprocal %63 {approx = true} : vector<2x8x1xf32> -> vector<2x8x1xf32>
    %65 = vector.broadcast %64 : vector<2x8x1xf32> to vector<2x8x8xf32>
    %66 = arith.mulf %61, %65 : vector<2x8x8xf32>
    %67 = arith.truncf %66 : vector<2x8x8xf32> to vector<2x8x8xbf16>
    %68 = vector.extract_strided_slice %49 {offsets = [0, 0, 0], sizes = [2, 8, 64], strides = [1, 1, 1]} : vector<2x8x128xf32> to vector<2x8x64xf32>
    %69 = arith.truncf %68 : vector<2x8x64xf32> to vector<2x8x64xbf16>
    "tpu.trace_start"() <{level = 10 : i32, message = "bqk,bkd->bqd"}> : () -> ()
    %cst_21 = arith.constant dense<0.000000e+00> : vector<2x8x64xf32>
    %70 = tpu.matmul %67, %69, %cst_21 {dimension_numbers = #tpu.dot_dimension_numbers<[2], [1], [1], [2], [0, 0, 0, 1, 1, 2], [0], [0]>} : vector<2x8x8xbf16>, vector<2x8x64xbf16>, vector<2x8x64xf32> -> vector<2x8x64xf32>
    "tpu.trace_stop"() : () -> ()
    %71 = vector.shape_cast %70 : vector<2x8x64xf32> to vector<16x64xf32>
    %72 = vector.extract_strided_slice %45 {offsets = [0, 0, 64], sizes = [2, 8, 64], strides = [1, 1, 1]} : vector<2x8x128xf32> to vector<2x8x64xf32>
    %73 = arith.truncf %72 : vector<2x8x64xf32> to vector<2x8x64xbf16>
    %74 = vector.extract_strided_slice %47 {offsets = [0, 0, 64], sizes = [2, 8, 64], strides = [1, 1, 1]} : vector<2x8x128xf32> to vector<2x8x64xf32>
    %75 = arith.truncf %74 : vector<2x8x64xf32> to vector<2x8x64xbf16>
    "tpu.trace_start"() <{level = 10 : i32, message = "bqd,bkd->bqk"}> : () -> ()
    %cst_22 = arith.constant dense<0.000000e+00> : vector<2x8x8xf32>
    %76 = tpu.matmul %73, %75, %cst_22 {dimension_numbers = #tpu.dot_dimension_numbers<[2], [2], [1], [1], [0, 0, 0, 1, 1, 1], [0], [0]>} : vector<2x8x64xbf16>, vector<2x8x64xbf16>, vector<2x8x8xf32> -> vector<2x8x8xf32>
    "tpu.trace_stop"() : () -> ()
    %77 = vector.broadcast %27 : vector<2x1x8xf32> to vector<2x8x8xf32>
    %78 = arith.addf %76, %77 : vector<2x8x8xf32>
    %cst_23 = arith.constant dense<0xFF800000> : vector<2x8xf32>
    %79 = vector.multi_reduction <maximumf>, %78, %cst_23 [2] : vector<2x8x8xf32> to vector<2x8xf32>
    %80 = vector.shape_cast %79 : vector<2x8xf32> to vector<2x8x1xf32>
    %81 = vector.broadcast %80 : vector<2x8x1xf32> to vector<2x8x8xf32>
    %82 = arith.subf %78, %81 : vector<2x8x8xf32>
    %83 = math.exp %82 : vector<2x8x8xf32>
    %cst_24 = arith.constant dense<0.000000e+00> : vector<2x8xf32>
    %84 = vector.multi_reduction <add>, %83, %cst_24 [2] : vector<2x8x8xf32> to vector<2x8xf32>
    %85 = vector.shape_cast %84 : vector<2x8xf32> to vector<2x8x1xf32>
    %86 = tpu.reciprocal %85 {approx = true} : vector<2x8x1xf32> -> vector<2x8x1xf32>
    %87 = vector.broadcast %86 : vector<2x8x1xf32> to vector<2x8x8xf32>
    %88 = arith.mulf %83, %87 : vector<2x8x8xf32>
    %89 = arith.truncf %88 : vector<2x8x8xf32> to vector<2x8x8xbf16>
    %90 = vector.extract_strided_slice %49 {offsets = [0, 0, 64], sizes = [2, 8, 64], strides = [1, 1, 1]} : vector<2x8x128xf32> to vector<2x8x64xf32>
    %91 = arith.truncf %90 : vector<2x8x64xf32> to vector<2x8x64xbf16>
    "tpu.trace_start"() <{level = 10 : i32, message = "bqk,bkd->bqd"}> : () -> ()
    %cst_25 = arith.constant dense<0.000000e+00> : vector<2x8x64xf32>
    %92 = tpu.matmul %89, %91, %cst_25 {dimension_numbers = #tpu.dot_dimension_numbers<[2], [1], [1], [2], [0, 0, 0, 1, 1, 2], [0], [0]>} : vector<2x8x8xbf16>, vector<2x8x64xbf16>, vector<2x8x64xf32> -> vector<2x8x64xf32>
    "tpu.trace_stop"() : () -> ()
    %93 = vector.shape_cast %92 : vector<2x8x64xf32> to vector<16x64xf32>
    %94 = tpu.concatenate %71, %93 in 1 : vector<16x64xf32>, vector<16x64xf32> -> vector<16x128xf32>
    %95 = arith.truncf %94 : vector<16x128xf32> to vector<16x128xbf16>
    %cst_26 = arith.constant dense<0.000000e+00> : vector<16x128xf32>
    %96 = tpu.matmul %95, %29, %cst_26 {dimension_numbers = #tpu.dot_dimension_numbers<[1], [0], [0], [1], [0, 0, 1, 1], [], []>} : vector<16x128xbf16>, vector<128x128xbf16>, vector<16x128xf32> -> vector<16x128xf32>
    %97 = vector.broadcast %33 : vector<1x128xf32> to vector<16x128xf32>
    %98 = arith.addf %96, %97 : vector<16x128xf32>
    %99 = arith.addf %98, %25 : vector<16x128xf32>
    %cst_27 = arith.constant dense<0.000000e+00> : vector<16xf32>
    %100 = vector.multi_reduction <add>, %99, %cst_27 [1] : vector<16x128xf32> to vector<16xf32>
    %101 = vector.shape_cast %100 : vector<16xf32> to vector<16x1xf32>
    %cst_28 = arith.constant 1.280000e+02 : f32
    %102 = vector.broadcast %cst_28 : f32 to vector<16x1xf32>
    %103 = arith.divf %101, %102 : vector<16x1xf32>
    %104 = vector.broadcast %103 : vector<16x1xf32> to vector<16x128xf32>
    %105 = arith.subf %99, %104 : vector<16x128xf32>
    %106 = arith.mulf %105, %105 : vector<16x128xf32>
    %cst_29 = arith.constant dense<0.000000e+00> : vector<16xf32>
    %107 = vector.multi_reduction <add>, %106, %cst_29 [1] : vector<16x128xf32> to vector<16xf32>
    %108 = vector.shape_cast %107 : vector<16xf32> to vector<16x1xf32>
    %cst_30 = arith.constant 1.280000e+02 : f32
    %109 = vector.broadcast %cst_30 : f32 to vector<16x1xf32>
    %110 = arith.divf %108, %109 : vector<16x1xf32>
    %cst_31 = arith.constant 9.99999996E-13 : f32
    %111 = vector.broadcast %cst_31 : f32 to vector<16x1xf32>
    %112 = arith.addf %110, %111 : vector<16x1xf32>
    %113 = math.rsqrt %112 : vector<16x1xf32>
    %114 = vector.broadcast %113 : vector<16x1xf32> to vector<16x128xf32>
    %115 = arith.mulf %105, %114 : vector<16x128xf32>
    %116 = vector.broadcast %34 : vector<1x128xf32> to vector<16x128xf32>
    %117 = arith.mulf %115, %116 : vector<16x128xf32>
    %118 = vector.broadcast %35 : vector<1x128xf32> to vector<16x128xf32>
    %119 = arith.addf %117, %118 : vector<16x128xf32>
    %120 = arith.truncf %119 : vector<16x128xf32> to vector<16x128xbf16>
    %cst_32 = arith.constant dense<0.000000e+00> : vector<16x512xf32>
    %121 = tpu.matmul %120, %30, %cst_32 {dimension_numbers = #tpu.dot_dimension_numbers<[1], [0], [0], [1], [0, 0, 1, 1], [], []>} : vector<16x128xbf16>, vector<128x512xbf16>, vector<16x512xf32> -> vector<16x512xf32>
    %122 = vector.broadcast %37 : vector<1x512xf32> to vector<16x512xf32>
    %123 = arith.addf %121, %122 : vector<16x512xf32>
    %cst_33 = arith.constant 5.000000e-01 : f32
    %124 = vector.broadcast %cst_33 : f32 to vector<16x512xf32>
    %125 = arith.mulf %124, %123 : vector<16x512xf32>
    %cst_34 = arith.constant 4.471500e-02 : f32
    %126 = vector.broadcast %cst_34 : f32 to vector<16x512xf32>
    %127 = arith.mulf %126, %123 : vector<16x512xf32>
    %128 = arith.mulf %127, %123 : vector<16x512xf32>
    %129 = arith.mulf %128, %123 : vector<16x512xf32>
    %130 = arith.addf %123, %129 : vector<16x512xf32>
    %cst_35 = arith.constant 0.797884583 : f32
    %131 = vector.broadcast %cst_35 : f32 to vector<16x512xf32>
    %132 = arith.mulf %131, %130 : vector<16x512xf32>
    %133 = math.tanh %132 : vector<16x512xf32>
    %cst_36 = arith.constant 1.000000e+00 : f32
    %134 = vector.broadcast %cst_36 : f32 to vector<16x512xf32>
    %135 = arith.addf %134, %133 : vector<16x512xf32>
    %136 = arith.mulf %125, %135 : vector<16x512xf32>
    %137 = arith.truncf %136 : vector<16x512xf32> to vector<16x512xbf16>
    %cst_37 = arith.constant dense<0.000000e+00> : vector<16x128xf32>
    %138 = tpu.matmul %137, %31, %cst_37 {dimension_numbers = #tpu.dot_dimension_numbers<[1], [0], [0], [1], [0, 0, 1, 1], [], []>} : vector<16x512xbf16>, vector<512x128xbf16>, vector<16x128xf32> -> vector<16x128xf32>
    %139 = vector.broadcast %36 : vector<1x128xf32> to vector<16x128xf32>
    %140 = arith.addf %138, %139 : vector<16x128xf32>
    %141 = arith.addf %140, %119 : vector<16x128xf32>
    %cst_38 = arith.constant dense<0.000000e+00> : vector<16xf32>
    %142 = vector.multi_reduction <add>, %141, %cst_38 [1] : vector<16x128xf32> to vector<16xf32>
    %143 = vector.shape_cast %142 : vector<16xf32> to vector<16x1xf32>
    %cst_39 = arith.constant 1.280000e+02 : f32
    %144 = vector.broadcast %cst_39 : f32 to vector<16x1xf32>
    %145 = arith.divf %143, %144 : vector<16x1xf32>
    %146 = vector.broadcast %145 : vector<16x1xf32> to vector<16x128xf32>
    %147 = arith.subf %141, %146 : vector<16x128xf32>
    %148 = arith.mulf %147, %147 : vector<16x128xf32>
    %cst_40 = arith.constant dense<0.000000e+00> : vector<16xf32>
    %149 = vector.multi_reduction <add>, %148, %cst_40 [1] : vector<16x128xf32> to vector<16xf32>
    %150 = vector.shape_cast %149 : vector<16xf32> to vector<16x1xf32>
    %cst_41 = arith.constant 1.280000e+02 : f32
    %151 = vector.broadcast %cst_41 : f32 to vector<16x1xf32>
    %152 = arith.divf %150, %151 : vector<16x1xf32>
    %cst_42 = arith.constant 9.99999996E-13 : f32
    %153 = vector.broadcast %cst_42 : f32 to vector<16x1xf32>
    %154 = arith.addf %152, %153 : vector<16x1xf32>
    %155 = math.rsqrt %154 : vector<16x1xf32>
    %156 = vector.broadcast %155 : vector<16x1xf32> to vector<16x128xf32>
    %157 = arith.mulf %147, %156 : vector<16x128xf32>
    %158 = vector.broadcast %38 : vector<1x128xf32> to vector<16x128xf32>
    %159 = arith.mulf %157, %158 : vector<16x128xf32>
    %160 = vector.broadcast %39 : vector<1x128xf32> to vector<16x128xf32>
    %161 = arith.addf %159, %160 : vector<16x128xf32>
    %c0_43 = arith.constant 0 : index
    %c0_44 = arith.constant 0 : index
    %162 = vector.load %arg7[%c0_43, %c0_44] : memref<128x384xbf16, #tpu.memory_space<vmem>>, vector<128x384xbf16>
    %c0_45 = arith.constant 0 : index
    %c0_46 = arith.constant 0 : index
    %163 = vector.load %arg8[%c0_45, %c0_46] : memref<128x128xbf16, #tpu.memory_space<vmem>>, vector<128x128xbf16>
    %c0_47 = arith.constant 0 : index
    %c0_48 = arith.constant 0 : index
    %164 = vector.load %arg9[%c0_47, %c0_48] : memref<128x512xbf16, #tpu.memory_space<vmem>>, vector<128x512xbf16>
    %c0_49 = arith.constant 0 : index
    %c0_50 = arith.constant 0 : index
    %165 = vector.load %arg10[%c0_49, %c0_50] : memref<512x128xbf16, #tpu.memory_space<vmem>>, vector<512x128xbf16>
    %166 = vector.extract_strided_slice %0 {offsets = [6, 0], sizes = [1, 384], strides = [1, 1]} : vector<10x512xf32> to vector<1x384xf32>
    %167 = vector.extract_strided_slice %0 {offsets = [7, 0], sizes = [1, 128], strides = [1, 1]} : vector<10x512xf32> to vector<1x128xf32>
    %168 = vector.extract_strided_slice %0 {offsets = [7, 128], sizes = [1, 128], strides = [1, 1]} : vector<10x512xf32> to vector<1x128xf32>
    %169 = vector.extract_strided_slice %0 {offsets = [7, 256], sizes = [1, 128], strides = [1, 1]} : vector<10x512xf32> to vector<1x128xf32>
    %170 = vector.extract_strided_slice %0 {offsets = [7, 384], sizes = [1, 128], strides = [1, 1]} : vector<10x512xf32> to vector<1x128xf32>
    %171 = vector.extract_strided_slice %0 {offsets = [8, 0], sizes = [1, 512], strides = [1, 1]} : vector<10x512xf32> to vector<1x512xf32>
    %172 = vector.extract_strided_slice %0 {offsets = [9, 0], sizes = [1, 128], strides = [1, 1]} : vector<10x512xf32> to vector<1x128xf32>
    %173 = vector.extract_strided_slice %0 {offsets = [9, 128], sizes = [1, 128], strides = [1, 1]} : vector<10x512xf32> to vector<1x128xf32>
    %174 = arith.truncf %161 : vector<16x128xf32> to vector<16x128xbf16>
    %cst_51 = arith.constant dense<0.000000e+00> : vector<16x384xf32>
    %175 = tpu.matmul %174, %162, %cst_51 {dimension_numbers = #tpu.dot_dimension_numbers<[1], [0], [0], [1], [0, 0, 1, 1], [], []>} : vector<16x128xbf16>, vector<128x384xbf16>, vector<16x384xf32> -> vector<16x384xf32>
    %176 = vector.broadcast %166 : vector<1x384xf32> to vector<16x384xf32>
    %177 = arith.addf %175, %176 : vector<16x384xf32>
    %178 = vector.extract_strided_slice %177 {offsets = [0, 0], sizes = [16, 128], strides = [1, 1]} : vector<16x384xf32> to vector<16x128xf32>
    %179 = vector.shape_cast %178 : vector<16x128xf32> to vector<2x8x128xf32>
    %180 = vector.extract_strided_slice %177 {offsets = [0, 128], sizes = [16, 128], strides = [1, 1]} : vector<16x384xf32> to vector<16x128xf32>
    %181 = vector.shape_cast %180 : vector<16x128xf32> to vector<2x8x128xf32>
    %182 = vector.extract_strided_slice %177 {offsets = [0, 256], sizes = [16, 128], strides = [1, 1]} : vector<16x384xf32> to vector<16x128xf32>
    %183 = vector.shape_cast %182 : vector<16x128xf32> to vector<2x8x128xf32>
    %184 = vector.extract_strided_slice %179 {offsets = [0, 0, 0], sizes = [2, 8, 64], strides = [1, 1, 1]} : vector<2x8x128xf32> to vector<2x8x64xf32>
    %185 = arith.truncf %184 : vector<2x8x64xf32> to vector<2x8x64xbf16>
    %186 = vector.extract_strided_slice %181 {offsets = [0, 0, 0], sizes = [2, 8, 64], strides = [1, 1, 1]} : vector<2x8x128xf32> to vector<2x8x64xf32>
    %187 = arith.truncf %186 : vector<2x8x64xf32> to vector<2x8x64xbf16>
    "tpu.trace_start"() <{level = 10 : i32, message = "bqd,bkd->bqk"}> : () -> ()
    %cst_52 = arith.constant dense<0.000000e+00> : vector<2x8x8xf32>
    %188 = tpu.matmul %185, %187, %cst_52 {dimension_numbers = #tpu.dot_dimension_numbers<[2], [2], [1], [1], [0, 0, 0, 1, 1, 1], [0], [0]>} : vector<2x8x64xbf16>, vector<2x8x64xbf16>, vector<2x8x8xf32> -> vector<2x8x8xf32>
    "tpu.trace_stop"() : () -> ()
    %189 = vector.broadcast %27 : vector<2x1x8xf32> to vector<2x8x8xf32>
    %190 = arith.addf %188, %189 : vector<2x8x8xf32>
    %cst_53 = arith.constant dense<0xFF800000> : vector<2x8xf32>
    %191 = vector.multi_reduction <maximumf>, %190, %cst_53 [2] : vector<2x8x8xf32> to vector<2x8xf32>
    %192 = vector.shape_cast %191 : vector<2x8xf32> to vector<2x8x1xf32>
    %193 = vector.broadcast %192 : vector<2x8x1xf32> to vector<2x8x8xf32>
    %194 = arith.subf %190, %193 : vector<2x8x8xf32>
    %195 = math.exp %194 : vector<2x8x8xf32>
    %cst_54 = arith.constant dense<0.000000e+00> : vector<2x8xf32>
    %196 = vector.multi_reduction <add>, %195, %cst_54 [2] : vector<2x8x8xf32> to vector<2x8xf32>
    %197 = vector.shape_cast %196 : vector<2x8xf32> to vector<2x8x1xf32>
    %198 = tpu.reciprocal %197 {approx = true} : vector<2x8x1xf32> -> vector<2x8x1xf32>
    %199 = vector.broadcast %198 : vector<2x8x1xf32> to vector<2x8x8xf32>
    %200 = arith.mulf %195, %199 : vector<2x8x8xf32>
    %201 = arith.truncf %200 : vector<2x8x8xf32> to vector<2x8x8xbf16>
    %202 = vector.extract_strided_slice %183 {offsets = [0, 0, 0], sizes = [2, 8, 64], strides = [1, 1, 1]} : vector<2x8x128xf32> to vector<2x8x64xf32>
    %203 = arith.truncf %202 : vector<2x8x64xf32> to vector<2x8x64xbf16>
    "tpu.trace_start"() <{level = 10 : i32, message = "bqk,bkd->bqd"}> : () -> ()
    %cst_55 = arith.constant dense<0.000000e+00> : vector<2x8x64xf32>
    %204 = tpu.matmul %201, %203, %cst_55 {dimension_numbers = #tpu.dot_dimension_numbers<[2], [1], [1], [2], [0, 0, 0, 1, 1, 2], [0], [0]>} : vector<2x8x8xbf16>, vector<2x8x64xbf16>, vector<2x8x64xf32> -> vector<2x8x64xf32>
    "tpu.trace_stop"() : () -> ()
    %205 = vector.shape_cast %204 : vector<2x8x64xf32> to vector<16x64xf32>
    %206 = vector.extract_strided_slice %179 {offsets = [0, 0, 64], sizes = [2, 8, 64], strides = [1, 1, 1]} : vector<2x8x128xf32> to vector<2x8x64xf32>
    %207 = arith.truncf %206 : vector<2x8x64xf32> to vector<2x8x64xbf16>
    %208 = vector.extract_strided_slice %181 {offsets = [0, 0, 64], sizes = [2, 8, 64], strides = [1, 1, 1]} : vector<2x8x128xf32> to vector<2x8x64xf32>
    %209 = arith.truncf %208 : vector<2x8x64xf32> to vector<2x8x64xbf16>
    "tpu.trace_start"() <{level = 10 : i32, message = "bqd,bkd->bqk"}> : () -> ()
    %cst_56 = arith.constant dense<0.000000e+00> : vector<2x8x8xf32>
    %210 = tpu.matmul %207, %209, %cst_56 {dimension_numbers = #tpu.dot_dimension_numbers<[2], [2], [1], [1], [0, 0, 0, 1, 1, 1], [0], [0]>} : vector<2x8x64xbf16>, vector<2x8x64xbf16>, vector<2x8x8xf32> -> vector<2x8x8xf32>
    "tpu.trace_stop"() : () -> ()
    %211 = vector.broadcast %27 : vector<2x1x8xf32> to vector<2x8x8xf32>
    %212 = arith.addf %210, %211 : vector<2x8x8xf32>
    %cst_57 = arith.constant dense<0xFF800000> : vector<2x8xf32>
    %213 = vector.multi_reduction <maximumf>, %212, %cst_57 [2] : vector<2x8x8xf32> to vector<2x8xf32>
    %214 = vector.shape_cast %213 : vector<2x8xf32> to vector<2x8x1xf32>
    %215 = vector.broadcast %214 : vector<2x8x1xf32> to vector<2x8x8xf32>
    %216 = arith.subf %212, %215 : vector<2x8x8xf32>
    %217 = math.exp %216 : vector<2x8x8xf32>
    %cst_58 = arith.constant dense<0.000000e+00> : vector<2x8xf32>
    %218 = vector.multi_reduction <add>, %217, %cst_58 [2] : vector<2x8x8xf32> to vector<2x8xf32>
    %219 = vector.shape_cast %218 : vector<2x8xf32> to vector<2x8x1xf32>
    %220 = tpu.reciprocal %219 {approx = true} : vector<2x8x1xf32> -> vector<2x8x1xf32>
    %221 = vector.broadcast %220 : vector<2x8x1xf32> to vector<2x8x8xf32>
    %222 = arith.mulf %217, %221 : vector<2x8x8xf32>
    %223 = arith.truncf %222 : vector<2x8x8xf32> to vector<2x8x8xbf16>
    %224 = vector.extract_strided_slice %183 {offsets = [0, 0, 64], sizes = [2, 8, 64], strides = [1, 1, 1]} : vector<2x8x128xf32> to vector<2x8x64xf32>
    %225 = arith.truncf %224 : vector<2x8x64xf32> to vector<2x8x64xbf16>
    "tpu.trace_start"() <{level = 10 : i32, message = "bqk,bkd->bqd"}> : () -> ()
    %cst_59 = arith.constant dense<0.000000e+00> : vector<2x8x64xf32>
    %226 = tpu.matmul %223, %225, %cst_59 {dimension_numbers = #tpu.dot_dimension_numbers<[2], [1], [1], [2], [0, 0, 0, 1, 1, 2], [0], [0]>} : vector<2x8x8xbf16>, vector<2x8x64xbf16>, vector<2x8x64xf32> -> vector<2x8x64xf32>
    "tpu.trace_stop"() : () -> ()
    %227 = vector.shape_cast %226 : vector<2x8x64xf32> to vector<16x64xf32>
    %228 = tpu.concatenate %205, %227 in 1 : vector<16x64xf32>, vector<16x64xf32> -> vector<16x128xf32>
    %229 = arith.truncf %228 : vector<16x128xf32> to vector<16x128xbf16>
    %cst_60 = arith.constant dense<0.000000e+00> : vector<16x128xf32>
    %230 = tpu.matmul %229, %163, %cst_60 {dimension_numbers = #tpu.dot_dimension_numbers<[1], [0], [0], [1], [0, 0, 1, 1], [], []>} : vector<16x128xbf16>, vector<128x128xbf16>, vector<16x128xf32> -> vector<16x128xf32>
    %231 = vector.broadcast %167 : vector<1x128xf32> to vector<16x128xf32>
    %232 = arith.addf %230, %231 : vector<16x128xf32>
    %233 = arith.addf %232, %161 : vector<16x128xf32>
    %cst_61 = arith.constant dense<0.000000e+00> : vector<16xf32>
    %234 = vector.multi_reduction <add>, %233, %cst_61 [1] : vector<16x128xf32> to vector<16xf32>
    %235 = vector.shape_cast %234 : vector<16xf32> to vector<16x1xf32>
    %cst_62 = arith.constant 1.280000e+02 : f32
    %236 = vector.broadcast %cst_62 : f32 to vector<16x1xf32>
    %237 = arith.divf %235, %236 : vector<16x1xf32>
    %238 = vector.broadcast %237 : vector<16x1xf32> to vector<16x128xf32>
    %239 = arith.subf %233, %238 : vector<16x128xf32>
    %240 = arith.mulf %239, %239 : vector<16x128xf32>
    %cst_63 = arith.constant dense<0.000000e+00> : vector<16xf32>
    %241 = vector.multi_reduction <add>, %240, %cst_63 [1] : vector<16x128xf32> to vector<16xf32>
    %242 = vector.shape_cast %241 : vector<16xf32> to vector<16x1xf32>
    %cst_64 = arith.constant 1.280000e+02 : f32
    %243 = vector.broadcast %cst_64 : f32 to vector<16x1xf32>
    %244 = arith.divf %242, %243 : vector<16x1xf32>
    %cst_65 = arith.constant 9.99999996E-13 : f32
    %245 = vector.broadcast %cst_65 : f32 to vector<16x1xf32>
    %246 = arith.addf %244, %245 : vector<16x1xf32>
    %247 = math.rsqrt %246 : vector<16x1xf32>
    %248 = vector.broadcast %247 : vector<16x1xf32> to vector<16x128xf32>
    %249 = arith.mulf %239, %248 : vector<16x128xf32>
    %250 = vector.broadcast %168 : vector<1x128xf32> to vector<16x128xf32>
    %251 = arith.mulf %249, %250 : vector<16x128xf32>
    %252 = vector.broadcast %169 : vector<1x128xf32> to vector<16x128xf32>
    %253 = arith.addf %251, %252 : vector<16x128xf32>
    %254 = arith.truncf %253 : vector<16x128xf32> to vector<16x128xbf16>
    %cst_66 = arith.constant dense<0.000000e+00> : vector<16x512xf32>
    %255 = tpu.matmul %254, %164, %cst_66 {dimension_numbers = #tpu.dot_dimension_numbers<[1], [0], [0], [1], [0, 0, 1, 1], [], []>} : vector<16x128xbf16>, vector<128x512xbf16>, vector<16x512xf32> -> vector<16x512xf32>
    %256 = vector.broadcast %171 : vector<1x512xf32> to vector<16x512xf32>
    %257 = arith.addf %255, %256 : vector<16x512xf32>
    %cst_67 = arith.constant 5.000000e-01 : f32
    %258 = vector.broadcast %cst_67 : f32 to vector<16x512xf32>
    %259 = arith.mulf %258, %257 : vector<16x512xf32>
    %cst_68 = arith.constant 4.471500e-02 : f32
    %260 = vector.broadcast %cst_68 : f32 to vector<16x512xf32>
    %261 = arith.mulf %260, %257 : vector<16x512xf32>
    %262 = arith.mulf %261, %257 : vector<16x512xf32>
    %263 = arith.mulf %262, %257 : vector<16x512xf32>
    %264 = arith.addf %257, %263 : vector<16x512xf32>
    %cst_69 = arith.constant 0.797884583 : f32
    %265 = vector.broadcast %cst_69 : f32 to vector<16x512xf32>
    %266 = arith.mulf %265, %264 : vector<16x512xf32>
    %267 = math.tanh %266 : vector<16x512xf32>
    %cst_70 = arith.constant 1.000000e+00 : f32
    %268 = vector.broadcast %cst_70 : f32 to vector<16x512xf32>
    %269 = arith.addf %268, %267 : vector<16x512xf32>
    %270 = arith.mulf %259, %269 : vector<16x512xf32>
    %271 = arith.truncf %270 : vector<16x512xf32> to vector<16x512xbf16>
    %cst_71 = arith.constant dense<0.000000e+00> : vector<16x128xf32>
    %272 = tpu.matmul %271, %165, %cst_71 {dimension_numbers = #tpu.dot_dimension_numbers<[1], [0], [0], [1], [0, 0, 1, 1], [], []>} : vector<16x512xbf16>, vector<512x128xbf16>, vector<16x128xf32> -> vector<16x128xf32>
    %273 = vector.broadcast %170 : vector<1x128xf32> to vector<16x128xf32>
    %274 = arith.addf %272, %273 : vector<16x128xf32>
    %275 = arith.addf %274, %253 : vector<16x128xf32>
    %cst_72 = arith.constant dense<0.000000e+00> : vector<16xf32>
    %276 = vector.multi_reduction <add>, %275, %cst_72 [1] : vector<16x128xf32> to vector<16xf32>
    %277 = vector.shape_cast %276 : vector<16xf32> to vector<16x1xf32>
    %cst_73 = arith.constant 1.280000e+02 : f32
    %278 = vector.broadcast %cst_73 : f32 to vector<16x1xf32>
    %279 = arith.divf %277, %278 : vector<16x1xf32>
    %280 = vector.broadcast %279 : vector<16x1xf32> to vector<16x128xf32>
    %281 = arith.subf %275, %280 : vector<16x128xf32>
    %282 = arith.mulf %281, %281 : vector<16x128xf32>
    %cst_74 = arith.constant dense<0.000000e+00> : vector<16xf32>
    %283 = vector.multi_reduction <add>, %282, %cst_74 [1] : vector<16x128xf32> to vector<16xf32>
    %284 = vector.shape_cast %283 : vector<16xf32> to vector<16x1xf32>
    %cst_75 = arith.constant 1.280000e+02 : f32
    %285 = vector.broadcast %cst_75 : f32 to vector<16x1xf32>
    %286 = arith.divf %284, %285 : vector<16x1xf32>
    %cst_76 = arith.constant 9.99999996E-13 : f32
    %287 = vector.broadcast %cst_76 : f32 to vector<16x1xf32>
    %288 = arith.addf %286, %287 : vector<16x1xf32>
    %289 = math.rsqrt %288 : vector<16x1xf32>
    %290 = vector.broadcast %289 : vector<16x1xf32> to vector<16x128xf32>
    %291 = arith.mulf %281, %290 : vector<16x128xf32>
    %292 = vector.broadcast %172 : vector<1x128xf32> to vector<16x128xf32>
    %293 = arith.mulf %291, %292 : vector<16x128xf32>
    %294 = vector.broadcast %173 : vector<1x128xf32> to vector<16x128xf32>
    %295 = arith.addf %293, %294 : vector<16x128xf32>
    %296 = vector.shape_cast %295 : vector<16x128xf32> to vector<2x8x128xf32>
    %297 = vector.extract_strided_slice %296 {offsets = [0, 0, 0], sizes = [2, 1, 128], strides = [1, 1, 1]} : vector<2x8x128xf32> to vector<2x1x128xf32>
    %298 = vector.shape_cast %297 : vector<2x1x128xf32> to vector<2x128xf32>
    %299 = arith.truncf %298 : vector<2x128xf32> to vector<2x128xbf16>
    %c0_77 = arith.constant 0 : index
    %c0_78 = arith.constant 0 : index
    %300 = vector.load %arg11[%c0_77, %c0_78] : memref<128x128xbf16, #tpu.memory_space<vmem>>, vector<128x128xbf16>
    %cst_79 = arith.constant dense<0.000000e+00> : vector<2x128xf32>
    %301 = tpu.matmul %299, %300, %cst_79 {dimension_numbers = #tpu.dot_dimension_numbers<[1], [0], [0], [1], [0, 0, 1, 1], [], []>} : vector<2x128xbf16>, vector<128x128xbf16>, vector<2x128xf32> -> vector<2x128xf32>
    %302 = vector.broadcast %3 : vector<1x128xf32> to vector<2x128xf32>
    %303 = arith.addf %301, %302 : vector<2x128xf32>
    %304 = math.tanh %303 : vector<2x128xf32>
    %305 = arith.truncf %304 : vector<2x128xf32> to vector<2x128xbf16>
    %c0_80 = arith.constant 0 : index
    %c0_81 = arith.constant 0 : index
    %306 = vector.load %arg12[%c0_80, %c0_81] : memref<128x256xbf16, #tpu.memory_space<vmem>>, vector<128x256xbf16>
    %cst_82 = arith.constant dense<0.000000e+00> : vector<2x256xf32>
    %307 = tpu.matmul %305, %306, %cst_82 {dimension_numbers = #tpu.dot_dimension_numbers<[1], [0], [0], [1], [0, 0, 1, 1], [], []>} : vector<2x128xbf16>, vector<128x256xbf16>, vector<2x256xf32> -> vector<2x256xf32>
    %308 = vector.broadcast %4 : vector<1x256xf32> to vector<2x256xf32>
    %309 = arith.addf %307, %308 : vector<2x256xf32>
    %cst_83 = arith.constant 0.000000e+00 : f32
    %310 = vector.broadcast %cst_83 : f32 to vector<2x256xf32>
    %311 = arith.maximumf %309, %310 : vector<2x256xf32>
    %c0_84 = arith.constant 0 : index
    %c0_85 = arith.constant 0 : index
    %312 = vector.load %arg13[%c0_84, %c0_85] : memref<2x256xf32, #tpu.memory_space<vmem>>, vector<2x256xf32>
    tpu.vector_store %arg13[%c0_84, %c0_85], %311 {strides = array<i32>} : memref<2x256xf32, #tpu.memory_space<vmem>>, vector<2x256xf32>,
    return
  }
}

</mosaic_0001>

<bundles_post_ra>
// kernel: emotion_classifier_forward.1
= control target key start
LH: loop header
LB: loop body
LE: loop exit
PB: predicated region body
PF: predicated region fallthrough
CT: control target
= control target key end

     0   :  { %18 = vsyncpa [#allocation3], 0  ;;  %s5751_s0 = inlined_call_operand.vmem [shape: f32[16,128], index: 0, kind: input, shape index: {}]   ;;  %s5752_s1 = inlined_call_operand.vmem [shape: f32[2,8], index: 1, kind: input, shape index: {}]   ;;  %s5753_s2 = inlined_call_operand.hbm [shape: f32[10,512], index: 2, kind: input, shape index: {}]   ;;  %s5754_s3 = inlined_call_operand.hbm [shape: bf16[128,384], index: 3, kind: input, shape index: {}]   ;;  %s5755_s4 = inlined_call_operand.hbm [shape: bf16[128,128], index: 4, kind: input, shape index: {}]   ;;  %s5756_s5 = inlined_call_operand.hbm [shape: bf16[128,512], index: 5, kind: input, shape index: {}]   ;;  %s5757_s6 = inlined_call_operand.hbm [shape: bf16[512,128], index: 6, kind: input, shape index: {}]   ;;  %s5758_s7 = inlined_call_operand.hbm [shape: bf16[128,384], index: 7, kind: input, shape index: {}]   ;;  %s5759_s8 = inlined_call_operand.hbm [shape: bf16[128,128], index: 8, kind: input, shape index: {}]   ;;  %s5760_s9 = inlined_call_operand.hbm [shape: bf16[128,512], index: 9, kind: input, shape index: {}]   ;;  %s5761_s10 = inlined_call_operand.hbm [shape: bf16[512,128], index: 10, kind: input, shape index: {}]   ;;  %s5762_s11 = inlined_call_operand.hbm [shape: bf16[128,128], index: 11, kind: input, shape index: {}]   ;;  %s5763_s12 = inlined_call_operand.hbm [shape: bf16[128,256], index: 12, kind: input, shape index: {}]   ;;  %s5764_s13 = inlined_call_operand.vmem [shape: f32[2,256], index: 13, kind: output, shape index: {}]  }
   0x1   :  { %19 = vsyncpa [#allocation5], 0 }
   0x2   :  { %20 = vsyncpa [#allocation8], 0 }
   0x3   :  { %21 = vsyncpa [#allocation11], 0 }
   0x4   :  { %22 = vsyncpa [#allocation14], 0 }
   0x5   :  { %23 = vsyncpa [#allocation17], 0  ;;  %s5019_s25 = smov [#allocation4]   ;;  %s4765_s29 = scalar_lea.hbm %s5754_s3, 3072 }
   0x6   :  { %s45_s26 = sshll.u32 %s5019_s25, 4  ;;  %p4766_p0 = scmp.ne.s32.totalorder %s5754_s3, %s4765_s29  ;;  %s46_s26 = int_to_ptr.vmem [resolvable:$true] %s45_s26 }
   0x7   :  { %p4769_p1 = scmp.lt.u32.totalorder %s4765_s29, %s5754_s3 }
   0x9   :  { %p4771_p2 = pnand %p4769_p1, %p4766_p0 }
   0xb   :  { %4774 = shalt.err (!%p4771_p2)
}
   0xc   :  { %s4775_s17 = scalar_lea.vmem %s46_s26, 3072  ;;  %p4780_p4 = scmp.lt.s32.totalorder %s46_s26, %s46_s26 }
   0xd   :  { %p4776_p3 = scmp.ne.s32.totalorder %s46_s26, %s4775_s17  ;;  %p4781_p5 = scmp.lt.s32.totalorder %s4775_s17, %s4775_s17 }
   0xf   :  { %p4782_p6 = por %p4781_p5, %p4780_p4 }
  0x11   :  { %p4783_p7 = pnand %p4782_p6, %p4776_p3 }
  0x13   :  { %4786 = shalt.err (!%p4783_p7)
}
  0x14   :  { %s5020_s18 = smov 192   ;;  %s5021_s19 = smov 12  }
  0x15   :  { %51 = dma.hbm_to_vmem [thread:$0]  %s5754_s3, 3072, %s46_s26, [#allocation5], %s5020_s18, %s5020_s18, %s5021_s19  }
  0x16   :  { %s5022_s22 = smov [#allocation7]   ;;  %s4787_s27 = scalar_lea.hbm %s5756_s5, 4096 }
  0x17   :  { %s69_s23 = sshll.u32 %s5022_s22, 4  ;;  %p4788_p8 = scmp.ne.s32.totalorder %s5756_s5, %s4787_s27  ;;  %s70_s23 = int_to_ptr.vmem [resolvable:$true] %s69_s23 }
  0x18   :  { %p4791_p9 = scmp.lt.u32.totalorder %s4787_s27, %s5756_s5 }
  0x1a   :  { %p4793_p10 = pnand %p4791_p9, %p4788_p8 }
  0x1c   :  { %4796 = shalt.err (!%p4793_p10)
}
  0x1d   :  { %s4797_s15 = scalar_lea.vmem %s70_s23, 4096  ;;  %p4802_p12 = scmp.lt.s32.totalorder %s70_s23, %s70_s23 }
  0x1e   :  { %p4798_p11 = scmp.ne.s32.totalorder %s70_s23, %s4797_s15  ;;  %p4803_p13 = scmp.lt.s32.totalorder %s4797_s15, %s4797_s15 }
  0x20   :  { %p4804_p0 = por %p4803_p13, %p4802_p12 }
  0x22   :  { %p4805_p1 = pnand %p4804_p0, %p4798_p11 }
  0x24   :  { %4808 = shalt.err (!%p4805_p1)
}
  0x25   :  { %s5023_s3 = smov 256   ;;  %s5024_s26 = smov 16  }
  0x26   :  { %75 = dma.hbm_to_vmem [thread:$0]  %s5756_s5, 4096, %s70_s23, [#allocation8], %s5023_s3, %s5023_s3, %s5024_s26  }
  0x27   :  { %s5025_s20 = smov [#allocation10]   ;;  %s5026_s22 = smov [#allocation13]  }
  0x28   :  { %s93_s21 = sshll.u32 %s5025_s20, 4  ;;  %s117_s24 = sshll.u32 %s5026_s22, 4  ;;  %s94_s21 = int_to_ptr.vmem [resolvable:$true] %s93_s21  ;;  %s5144_s24 = int_to_ptr.vmem [resolvable:$true] %s117_s24 }
  0x29   :  { %s4809_s28 = scalar_lea.hbm %s5758_s7, 3072 }
  0x2a   :  { %p4810_p2 = scmp.ne.s32.totalorder %s5758_s7, %s4809_s28  ;;  %p4813_p3 = scmp.lt.u32.totalorder %s4809_s28, %s5758_s7 }
  0x2c   :  { %p4815_p4 = pnand %p4813_p3, %p4810_p2 }
  0x2e   :  { %4818 = shalt.err (!%p4815_p4)
}
  0x2f   :  { %s4819_s5 = scalar_lea.vmem %s94_s21, 3072  ;;  %p4824_p6 = scmp.lt.s32.totalorder %s94_s21, %s94_s21 }
  0x30   :  { %p4820_p5 = scmp.ne.s32.totalorder %s94_s21, %s4819_s5  ;;  %p4825_p7 = scmp.lt.s32.totalorder %s4819_s5, %s4819_s5 }
  0x32   :  { %p4826_p8 = por %p4825_p7, %p4824_p6 }
  0x34   :  { %p4827_p9 = pnand %p4826_p8, %p4820_p5 }
  0x36   :  { %4830 = shalt.err (!%p4827_p9)
}
  0x37   :  { %99 = dma.hbm_to_vmem [thread:$0]  %s5758_s7, 3072, %s94_s21, [#allocation11], %s5020_s18, %s5020_s18, %s5021_s19  }
  0x38   :  { %s4831_s22 = scalar_lea.hbm %s5760_s9, 4096 }
  0x39   :  { %p4832_p10 = scmp.ne.s32.totalorder %s5760_s9, %s4831_s22  ;;  %p4835_p11 = scmp.lt.u32.totalorder %s4831_s22, %s5760_s9 }
  0x3b   :  { %p4837_p12 = pnand %p4835_p11, %p4832_p10 }
  0x3d   :  { %4840 = shalt.err (!%p4837_p12)
}
  0x3e   :  { %s4841_s30 = scalar_lea.vmem %s5144_s24, 4096  ;;  %p4846_p0 = scmp.lt.s32.totalorder %s5144_s24, %s5144_s24 }
  0x3f   :  { %p4842_p13 = scmp.ne.s32.totalorder %s5144_s24, %s4841_s30  ;;  %p4847_p1 = scmp.lt.s32.totalorder %s4841_s30, %s4841_s30 }
  0x41   :  { %p4848_p2 = por %p4847_p1, %p4846_p0 }
  0x43   :  { %p4849_p3 = pnand %p4848_p2, %p4842_p13 }
  0x45   :  { %4852 = shalt.err (!%p4849_p3)
}
  0x46   :  { %123 = dma.hbm_to_vmem [thread:$0]  %s5760_s9, 4096, %s5144_s24, [#allocation14], %s5023_s3, %s5023_s3, %s5024_s26  }
  0x47   :  { %s5027_s19 = smov [#allocation16]   ;;  %s5028_s14 = smov [#allocation2]  }
  0x48   :  { %s141_s21 = sshll.u32 %s5027_s19, 4  ;;  %s33_s15 = sshll.u32 %s5028_s14, 4  ;;  %s142_s21 = int_to_ptr.vmem [resolvable:$true] %s141_s21  ;;  %s5181_s15 = int_to_ptr.vmem [resolvable:$true] %s33_s15 }
  0x49   :  { %s4853_s16 = scalar_lea.hbm %s5762_s11, 1024 }
  0x4a   :  { %p4854_p4 = scmp.ne.s32.totalorder %s5762_s11, %s4853_s16  ;;  %p4857_p5 = scmp.lt.u32.totalorder %s4853_s16, %s5762_s11 }
  0x4c   :  { %p4859_p6 = pnand %p4857_p5, %p4854_p4 }
  0x4e   :  { %4862 = shalt.err (!%p4859_p6)
}
  0x4f   :  { %s4863_s9 = scalar_lea.vmem %s142_s21, 1024  ;;  %p4868_p8 = scmp.lt.s32.totalorder %s142_s21, %s142_s21 }
  0x50   :  { %p4864_p7 = scmp.ne.s32.totalorder %s142_s21, %s4863_s9  ;;  %p4869_p9 = scmp.lt.s32.totalorder %s4863_s9, %s4863_s9 }
  0x52   :  { %p4870_p10 = por %p4869_p9, %p4868_p8 }
  0x54   :  { %p4871_p11 = pnand %p4870_p10, %p4864_p7 }
  0x56   :  { %4874 = shalt.err (!%p4871_p11)
}
  0x57   :  { %s5029_s3 = smov 64   ;;  %s5030_s26 = smov 4  }
  0x58   :  { %147 = dma.hbm_to_vmem [thread:$0]  %s5762_s11, 1024, %s142_s21, [#allocation17], %s5029_s3, %s5029_s3, %s5030_s26  }
  0x59   :  { %s4875_s30 = scalar_lea.hbm %s5753_s2, 1024 }
  0x5a   :  { %p4876_p12 = scmp.ne.s32.totalorder %s5753_s2, %s4875_s30  ;;  %p4879_p13 = scmp.lt.u32.totalorder %s4875_s30, %s5753_s2 }
  0x5c   :  { %p4881_p0 = pnand %p4879_p13, %p4876_p12 }
  0x5e   :  { %4884 = shalt.err (!%p4881_p0)
}
  0x5f   :  { %s4885_s5 = scalar_lea.vmem %s5181_s15, 1024  ;;  %p4890_p2 = scmp.lt.s32.totalorder %s5181_s15, %s5181_s15 }
  0x60   :  { %p4886_p1 = scmp.ne.s32.totalorder %s5181_s15, %s4885_s5  ;;  %p4891_p3 = scmp.lt.s32.totalorder %s4885_s5, %s4885_s5 }
  0x62   :  { %p4892_p4 = por %p4891_p3, %p4890_p2 }
  0x64   :  { %p4893_p5 = pnand %p4892_p4, %p4886_p1 }
  0x66   :  { %4896 = shalt.err (!%p4893_p5)
}
  0x67   :  { %s5031_s11 = smov 512   ;;  %s5032_s21 = smov 32  }
  0x68   :  { %39 = dma.hbm_to_vmem [thread:$0]  %s5753_s2, 1024, %s5181_s15, [#allocation3], %s5031_s11, %s5031_s11, %s5032_s21  }
  0x69   :  { %s5033_s17 = smov [#allocation6]   ;;  %s5034_s22 = smov [#allocation9]  }
  0x6a   :  { %s57_s20 = sshll.u32 %s5033_s17, 4  ;;  %s81_s25 = sshll.u32 %s5034_s22, 4  ;;  %s58_s20 = int_to_ptr.vmem [resolvable:$true] %s57_s20  ;;  %s5215_s25 = int_to_ptr.vmem [resolvable:$true] %s81_s25 }
  0x6b   :  { %s4897_s27 = scalar_lea.hbm %s5755_s4, 1024 }
  0x6c   :  { %p4898_p6 = scmp.ne.s32.totalorder %s5755_s4, %s4897_s27  ;;  %p4901_p7 = scmp.lt.u32.totalorder %s4897_s27, %s5755_s4 }
  0x6e   :  { %p4903_p8 = pnand %p4901_p7, %p4898_p6 }
  0x70   :  { %4906 = shalt.err (!%p4903_p8)
}
  0x71   :  { %s4907_s2 = scalar_lea.vmem %s58_s20, 1024  ;;  %p4912_p10 = scmp.lt.s32.totalorder %s58_s20, %s58_s20 }
  0x72   :  { %p4908_p9 = scmp.ne.s32.totalorder %s58_s20, %s4907_s2  ;;  %p4913_p11 = scmp.lt.s32.totalorder %s4907_s2, %s4907_s2 }
  0x74   :  { %p4914_p12 = por %p4913_p11, %p4912_p10 }
  0x76   :  { %p4915_p13 = pnand %p4914_p12, %p4908_p9 }
  0x78   :  { %4918 = shalt.err (!%p4915_p13)
}
  0x79   :  { %63 = dma.hbm_to_vmem [thread:$0]  %s5755_s4, 1024, %s58_s20, [#allocation5], %s5029_s3, %s5029_s3, %s5030_s26  }
  0x7a   :  { %s4919_s5 = scalar_lea.hbm %s5757_s6, 4096 }
  0x7b   :  { %p4920_p0 = scmp.ne.s32.totalorder %s5757_s6, %s4919_s5  ;;  %p4923_p1 = scmp.lt.u32.totalorder %s4919_s5, %s5757_s6 }
  0x7d   :  { %p4925_p2 = pnand %p4923_p1, %p4920_p0 }
  0x7f   :  { %4928 = shalt.err (!%p4925_p2)
}
  0x80   :  { %s4929_s17 = scalar_lea.vmem %s5215_s25, 4096  ;;  %p4934_p4 = scmp.lt.s32.totalorder %s5215_s25, %s5215_s25 }
  0x81   :  { %p4930_p3 = scmp.ne.s32.totalorder %s5215_s25, %s4929_s17  ;;  %p4935_p5 = scmp.lt.s32.totalorder %s4929_s17, %s4929_s17 }
  0x83   :  { %p4936_p6 = por %p4935_p5, %p4934_p4 }
  0x85   :  { %p4937_p7 = pnand %p4936_p6, %p4930_p3 }
  0x87   :  { %4940 = shalt.err (!%p4937_p7)
}
  0x88   :  { %87 = dma.hbm_to_vmem [thread:$0]  %s5757_s6, 4096, %s5215_s25, [#allocation8], %s5029_s3, %s5029_s3, %s5030_s26  }
  0x89   :  { %s5035_s22 = smov [#allocation12]   ;;  %s5036_s24 = smov [#allocation15]  }
  0x8a   :  { %s105_s9 = sshll.u32 %s5035_s22, 4  ;;  %s129_s27 = sshll.u32 %s5036_s24, 4  ;;  %s106_s9 = int_to_ptr.vmem [resolvable:$true] %s105_s9  ;;  %s5252_s27 = int_to_ptr.vmem [resolvable:$true] %s129_s27 }
  0x8b   :  { %s4941_s30 = scalar_lea.hbm %s5759_s8, 1024 }
  0x8c   :  { %p4942_p8 = scmp.ne.s32.totalorder %s5759_s8, %s4941_s30  ;;  %p4945_p9 = scmp.lt.u32.totalorder %s4941_s30, %s5759_s8 }
  0x8e   :  { %p4947_p10 = pnand %p4945_p9, %p4942_p8 }
  0x90   :  { %4950 = shalt.err (!%p4947_p10)
}
  0x91   :  { %s4951_s6 = scalar_lea.vmem %s106_s9, 1024  ;;  %p4956_p12 = scmp.lt.s32.totalorder %s106_s9, %s106_s9 }
  0x92   :  { %p4952_p11 = scmp.ne.s32.totalorder %s106_s9, %s4951_s6  ;;  %p4957_p13 = scmp.lt.s32.totalorder %s4951_s6, %s4951_s6 }
  0x94   :  { %p4958_p0 = por %p4957_p13, %p4956_p12 }
  0x96   :  { %p4959_p1 = pnand %p4958_p0, %p4952_p11 }
  0x98   :  { %4962 = shalt.err (!%p4959_p1)
}
  0x99   :  { %111 = dma.hbm_to_vmem [thread:$0]  %s5759_s8, 1024, %s106_s9, [#allocation11], %s5029_s3, %s5029_s3, %s5030_s26  }
  0x9a   :  { %s4963_s11 = scalar_lea.hbm %s5761_s10, 4096 }
  0x9b   :  { %p4964_p2 = scmp.ne.s32.totalorder %s5761_s10, %s4963_s11  ;;  %p4967_p3 = scmp.lt.u32.totalorder %s4963_s11, %s5761_s10 }
  0x9d   :  { %p4969_p4 = pnand %p4967_p3, %p4964_p2 }
  0x9f   :  { %4972 = shalt.err (!%p4969_p4)
}
  0xa0   :  { %s4973_s4 = scalar_lea.vmem %s5252_s27, 4096  ;;  %p4978_p6 = scmp.lt.s32.totalorder %s5252_s27, %s5252_s27 }
  0xa1   :  { %p4974_p5 = scmp.ne.s32.totalorder %s5252_s27, %s4973_s4  ;;  %p4979_p7 = scmp.lt.s32.totalorder %s4973_s4, %s4973_s4 }
  0xa3   :  { %p4980_p8 = por %p4979_p7, %p4978_p6 }
  0xa5   :  { %p4981_p9 = pnand %p4980_p8, %p4974_p5 }
  0xa7   :  { %4984 = shalt.err (!%p4981_p9)
}
  0xa8   :  { %135 = dma.hbm_to_vmem [thread:$0]  %s5761_s10, 4096, %s5252_s27, [#allocation14], %s5029_s3, %s5029_s3, %s5030_s26  }
  0xa9   :  { %s5037_s22 = smov [#allocation18]   ;;  %s4985_s29 = scalar_lea.hbm %s5763_s12, 2048 }
  0xaa   :  { %s153_s9 = sshll.u32 %s5037_s22, 4  ;;  %p4986_p10 = scmp.ne.s32.totalorder %s5763_s12, %s4985_s29  ;;  %s154_s9 = int_to_ptr.vmem [resolvable:$true] %s153_s9 }
  0xab   :  { %p4989_p11 = scmp.lt.u32.totalorder %s4985_s29, %s5763_s12 }
  0xad   :  { %p4991_p12 = pnand %p4989_p11, %p4986_p10 }
  0xaf   :  { %4994 = shalt.err (!%p4991_p12)
}
  0xb0   :  { %s4995_s18 = scalar_lea.vmem %s154_s9, 2048  ;;  %p5000_p0 = scmp.lt.s32.totalorder %s154_s9, %s154_s9 }
  0xb1   :  { %p4996_p13 = scmp.ne.s32.totalorder %s154_s9, %s4995_s18  ;;  %p5001_p1 = scmp.lt.s32.totalorder %s4995_s18, %s4995_s18 }
  0xb3   :  { %p5002_p2 = por %p5001_p1, %p5000_p0 }
  0xb5   :  { %p5003_p3 = pnand %p5002_p2, %p4996_p13 }
  0xb7   :  { %5006 = shalt.err (!%p5003_p3)
}
  0xb8   :  { %s5038_s10 = smov 128   ;;  %s5039_s26 = smov 8  }
  0xb9   :  { %159 = dma.hbm_to_vmem [thread:$0]  %s5763_s12, 2048, %s154_s9, [#allocation17], %s5038_s10, %s5038_s10, %s5039_s26  }
  0xba   :  { %5007 = dma.done.wait [#allocation3], 1024  }
  0xbb   :  { %5008 = vsyncadd [#allocation3], 4294966272 }
  0xbc   :  { %5009 = dma.done.wait [#allocation5], 4096  }
  0xbd   :  { %5010 = vsyncadd [#allocation5], 4294963200 }
  0xbe   :  { %5011 = dma.done.wait [#allocation8], 8192  }
  0xbf   :  { %5012 = vsyncadd [#allocation8], 4294959104 }
  0xc0   :  { %5013 = dma.done.wait [#allocation11], 4096  }
  0xc1   :  { %5014 = vsyncadd [#allocation11], 4294963200 }
  0xc2   :  { %5015 = dma.done.wait [#allocation14], 8192  }
  0xc3   :  { %5016 = vsyncadd [#allocation14], 4294959104 }
  0xc4   :  { %5017 = dma.done.wait [#allocation17], 3072  }
  0xc5   :  { %5018 = vsyncadd [#allocation17], 4294964224  ;;  %v202_v0 = vld [vmem:[%s5751_s0] sm:$0xff]  ;;  %v203_v1 = vld [vmem:[%s5751_s0 + $0x8] sm:$0xff]  ;;  %v5040_v4 = vmov 0.0   ;;  %v5041_v30 = vmov 0   ;;  %v227_v40 = vlaneseq }
  0xc6   :  { %204 = vadd.xlane.f32.xlu0 %v202_v0  ;;  %v4400_v2 = vld [vmem:[#allocation4 + $0x4] ss:$12 sps:$4 sm:$0xff]   ;;  %v4402_v3 = vld [vmem:[#allocation4] ss:$12 sps:$4 sm:$0xff]   ;;  %4169 = vmatprep.subr.bf16.mxu1 %v5040_v4  ;;  %v4403_v5 = vld [vmem:[#allocation4 + $0x8] ss:$12 sps:$4 sm:$0xff]  }
  0xc7   :  { %v4404_v6 = vld [vmem:[#allocation4 + $0x1c] ss:$12 sps:$4 sm:$0xff]   ;;  %548 = vmatprep.subr.bf16.mxu0 %v4400_v2  ;;  %4170 = vmatpush3.bf16.msra.mxu1 %v4403_v5  ;;  %v4406_v15 = vld [vmem:[#allocation4 + $0x18] ss:$12 sps:$4 sm:$0xff]   ;;  %v4407_v16 = vld [vmem:[#allocation4 + $0x20] ss:$12 sps:$4 sm:$0xff]  }
  0xc8   :  { %549 = vmatpush1.bf16.msra.mxu0 %v4402_v3  ;;  %4171 = vmatprep.subr.bf16.mxu1 %v5040_v4  ;;  %v4408_v17 = vld [vmem:[#allocation4 + $0x34] ss:$12 sps:$4 sm:$0xff]   ;;  %v4410_v18 = vld [vmem:[#allocation4 + $0x30] ss:$12 sps:$4 sm:$0xff]   ;;  %v4411_v19 = vld [vmem:[#allocation4 + $0x38] ss:$12 sps:$4 sm:$0xff]  }
  0xc9   :  { %550 = vmatprep.subr.bf16.mxu0 %v4404_v6  ;;  %v4412_v20 = vld [vmem:[#allocation4 + $0x4c] ss:$12 sps:$4 sm:$0xff]   ;;  %v4414_v21 = vld [vmem:[#allocation4 + $0x48] ss:$12 sps:$4 sm:$0xff]   ;;  %v4415_v22 = vld [vmem:[#allocation4 + $0x50] ss:$12 sps:$4 sm:$0xff]   ;;  %580 = vmatprep.mubr.bf16.mxu0 %v5041_v30 }
  0xca   :  { %206 = vadd.xlane.f32.xlu0 %v203_v1  ;;  %v4416_v23 = vld [vmem:[#allocation4 + $0x64] ss:$12 sps:$4 sm:$0xff]   ;;  %v4418_v24 = vld [vmem:[#allocation4 + $0x60] ss:$12 sps:$4 sm:$0xff]   ;;  %v4419_v25 = vld [vmem:[#allocation4 + $0x68] ss:$12 sps:$4 sm:$0xff]  }
  0xcb   :  { %4172 = vmatpush3.bf16.msra.mxu1 %v4407_v16  ;;  %v4420_v26 = vld [vmem:[#allocation4 + $0x7c] ss:$12 sps:$4 sm:$0xff]   ;;  %v4422_v27 = vld [vmem:[#allocation4 + $0x78] ss:$12 sps:$4 sm:$0xff]   ;;  %v4423_v28 = vld [vmem:[#allocation4 + $0x80] ss:$12 sps:$4 sm:$0xff]  }
  0xcc   :  { %551 = vmatpush1.bf16.msra.mxu0 %v4406_v15  ;;  %4173 = vmatprep.subr.bf16.mxu1 %v5040_v4  ;;  %v4424_v29 = vld [vmem:[#allocation4 + $0x94] ss:$12 sps:$4 sm:$0xff]   ;;  %vm5042_vm0 = vmmov 0   ;;  %v4426_v31 = vld [vmem:[#allocation4 + $0x90] ss:$12 sps:$4 sm:$0xff]   ;;  %v5328_v43 = vshrl.u32 %v227_v40, 7 }
  0xcd   :  { %552 = vmatprep.subr.bf16.mxu0 %v4408_v17  ;;  %4185 = vmatprep.mubr.msk.bf16.mxu1 %vm5042_vm0, %v5040_v4  ;;  %v4427_v32 = vld [vmem:[#allocation4 + $0x98] ss:$12 sps:$4 sm:$0xff]   ;;  %v4430_v34 = vld [vmem:[#allocation4 + $0xa8] ss:$12 sps:$4 sm:$0xff]   ;;  %v4431_v35 = vld [vmem:[#allocation4 + $0xb0] ss:$12 sps:$4 sm:$0xff]  }
  0xce   :  { %v4428_v33 = vld [vmem:[#allocation4 + $0xac] ss:$12 sps:$4 sm:$0xff]   ;;  %v5331_v44 = vsub.s32 0, %v5328_v43  ;;  %v5333_v45 = vld [vmem:[#allocation2] sm:$0xff]  ;;  %v410_v58 = vsub.s32 2, %v5328_v43  ;;  %v5354_v59 = vld [vmem:[#allocation2 + $0x10] sm:$0xff] }
  0xcf   :  { %4174 = vmatpush3.bf16.msra.mxu1 %v4411_v19  ;;  %v5338_v49 = vld [vmem:[#allocation2 + $0x8] sm:$0xff]  ;;  %vm646_vm1 = vcmask 523264   ;;  %vm769_vm2 = vcmask 1043456   ;;  %vm739_vm3 = vcmask 64512   ;;  %vm3507_vm4 = vcmask 1041409  }
  0xd0   :  { %553 = vmatpush1.bf16.msra.mxu0 %v4410_v18  ;;  %4175 = vmatprep.subr.bf16.mxu1 %v5040_v4  ;;  %v230_v48 = vrot.slane %v5333_v45, %v5331_v44  ;;  %v236_v53 = vrot.slane %v5338_v49, %v5331_v44  ;;  %v415_v60 = vrot.slane %v5338_v49, %v410_v58 }
  0xd1   :  { %554 = vmatprep.subr.bf16.mxu0 %v4412_v20  ;;  %v419_v63 = vrot.slane %v5354_v59, %v410_v58 }
  0xd3   :  { %4176 = vmatpush3.bf16.msra.mxu1 %v4415_v22  ;;  %v5043_v22 = vmov 1966171168  }
  0xd4   :  { %555 = vmatpush1.bf16.msra.mxu0 %v4414_v21  ;;  %4177 = vmatprep.subr.bf16.mxu1 %v5040_v4 }
  0xd5   :  { %556 = vmatprep.subr.bf16.mxu0 %v4416_v23  ;;  %v250_v23 = vunpack.c.l.s4 %v5043_v22 }
  0xd7   :  { %4178 = vmatpush3.bf16.msra.mxu1 %v4419_v25 }
  0xd8   :  { %557 = vmatpush1.bf16.msra.mxu0 %v4418_v24  ;;  %4179 = vmatprep.subr.bf16.mxu1 %v5040_v4  ;;  %v251_v24 = vunpack.c.0.s8 %v250_v23 }
  0xd9   :  { %558 = vmatprep.subr.bf16.mxu0 %v4420_v26  ;;  %v3770_v26 = vld.sshfl [vmem:[%s5752_s1] sm:$0x11 pattern:$0x75316420] }
  0xda   :  { %v254_v25 = vsub.s32 %v251_v24, %v5328_v43 }
  0xdb   :  { %4180 = vmatpush3.bf16.msra.mxu1 %v4423_v28 }
  0xdc   :  { %559 = vmatpush1.bf16.msra.mxu0 %v4422_v27  ;;  %4181 = vmatprep.subr.bf16.mxu1 %v5040_v4  ;;  %v255_v27 = vrot.slane %v3770_v26, %v254_v25 }
  0xdd   :  { %560 = vmatprep.subr.bf16.mxu0 %v4424_v29  ;;  %v248_v29 = vcombine.high %v3770_v26, %v3770_v26 }
  0xde   :  { %v5381_v28 = vrot.slane %v255_v27, %v5331_v44 }
  0xdf   :  { %4182 = vmatpush3.bf16.msra.mxu1 %v4427_v32 }
  0xe0   :  { %561 = vmatpush1.bf16.msra.mxu0 %v4426_v31  ;;  %4183 = vmatprep.subr.bf16.mxu1 %v5040_v4 }
  0xe1   :  { %562 = vmatprep.subr.bf16.mxu0 %v4428_v33 }
  0xe3   :  { %4184 = vmatpush3.bf16.msra.mxu1 %v4431_v35 }
  0xe4   :  { %563 = vmatpush1.bf16.msra.mxu0 %v4430_v34  ;;  %4189 = vmatprep.subr.bf16.mxu1 %v5040_v4  ;;  %v262_v34 = vrot.slane %v248_v29, %v254_v25 }
  0xe5   :  { %4213 = vmatprep.subr.bf16.mxu0 %v5040_v4 }
 0x153   :  { %v205_v7 = vpop.xlane.xlu0 %204 }
 0x154   :  { %v209_v8 = vmul.f32 0.0078125, %v205_v7 }
 0x156   :  { %v5309_v9 = vsub.f32 %v202_v0, %v209_v8 }
 0x157   :  { %v207_v10 = vpop.xlane.xlu0 %206 }
 0x158   :  { %v210_v11 = vmul.f32 0.0078125, %v207_v10  ;;  %v213_v12 = vmul.f32 %v5309_v9, %v5309_v9 }
 0x15a   :  { %v5313_v13 = vsub.f32 %v203_v1, %v210_v11  ;;  %215 = vadd.xlane.f32.xlu1 %v213_v12 }
 0x15c   :  { %v214_v14 = vmul.f32 %v5313_v13, %v5313_v13 }
 0x15e   :  { %217 = vadd.xlane.f32.xlu1 %v214_v14 }
 0x1e7   :  { %v216_v36 = vpop.xlane.xlu1 %215 }
 0x1e8   :  { %v219_v37 = vmul.f32 0.0078125, %v216_v36 }
 0x1ea   :  { %v221_v38 = vadd.f32 1e-12, %v219_v37 }
 0x1eb   :  { %v218_v39 = vpop.xlane.xlu1 %217 }
 0x1ec   :  { %4672 = vrsqrt.f32 %v221_v38  ;;  %v220_v41 = vmul.f32 0.0078125, %v218_v39  ;;  %v5386_v38 = vrot.slane %v262_v34, %v5331_v44 }
 0x1ee   :  { %v222_v42 = vadd.f32 1e-12, %v220_v41 }
 0x1f0   :  { %4674 = vrsqrt.f32 %v222_v42 }
 0x1f6   :  { %v4673_v46 = vpop.eup %4672 }
 0x1f7   :  { %v225_v47 = vmul.f32 %v4673_v46, %v5309_v9  ;;  %v411_v9 = vrot.slane %v5333_v45, %v410_v58 }
 0x1f9   :  { %v231_v52 = vmul.f32 %v230_v48, %v225_v47 }
 0x1fa   :  { %v4675_v50 = vpop.eup %4674 }
 0x1fb   :  { %v226_v51 = vmul.f32 %v4675_v50, %v5313_v13  ;;  %v5343_v55 = vadd.f32 %v236_v53, %v231_v52 }
 0x1fd   :  { %v232_v54 = vmul.f32 %v230_v48, %v226_v51 }
 0x1ff   :  { %v5345_v56 = vadd.f32 %v236_v53, %v232_v54 }
 0x201   :  { %v407_v57 = vpack.c.bf16 %v5345_v56, %v5343_v55 }
 0x203   :  { %581 = vmatmul.mubr.bf16.vlgmr.msra.gmra.mrb[0].mxu0 %v407_v57  ;;  %4186 = vmatmul.mubr.bf16.vlgmr.msra.gmra.mrb[0].mxu1 %v407_v57 }
 0x204   :  { %4191 = vmatprep.mubr.msk.bf16.mxu1 %vm5042_vm0, %v5040_v4  ;;  %4215 = vmatprep.mubr.msk.bf16.mxu0 %vm5042_vm0, %v5040_v4 }
 0x2d6   :  { %v582_v61 = vpop.f32.mrb[0].mxu0  ;;  %v625_v62 = vpop.f32.mrb[0].mxu1 }
 0x2d7   :  { %v584_v0 = vpop.f32.mrb[1].mxu0  ;;  %v4187_v1 = vpop.f32.mrb[1].mxu1  ;;  %v583_v13 = vadd.f32 %v582_v61, %v411_v9  ;;  %v626_v16 = vadd.f32 %v625_v62, %v419_v63 }
 0x2d8   :  { %v585_v2 = vadd.f32 %v584_v0, %v415_v60  ;;  %v586_v3 = vpop.f32.mrb[2].mxu0  ;;  %v628_v5 = vpop.f32.mrb[2].mxu1 }
 0x2d9   :  { %v5358_v6 = vadd.f32 %v628_v5, %v419_v63  ;;  %v588_v7 = vpop.f32.mrb[3].mxu0  ;;  %v4188_v8 = vpop.f32.mrb[3].mxu1  ;;  %v632_v15 = vpack.c.bf16 %v583_v13, %v583_v13  ;;  %v587_v18 = vadd.f32 %v586_v3, %v411_v9  ;;  %v5368_v19 = vpack.c.bf16 %v626_v16, %v626_v16 }
 0x2da   :  { %v634_v10 = vpack.c.bf16 %v585_v2, %v585_v2  ;;  %v589_v12 = vadd.f32 %v588_v7, %v415_v60 }
 0x2db   :  { %v633_v20 = vpack.c.bf16 %v587_v18, %v587_v18  ;;  %v771_v21 = vsel %vm769_vm2, %v5368_v19, 0  ;;  %v765_v5 = vpack.c.bf16 %v5358_v6, %v5358_v6 }
 0x2dc   :  { %v651_v11 = vsel %vm646_vm1, %v634_v10, 0  ;;  %v635_v14 = vpack.c.bf16 %v589_v12, %v589_v12 }
 0x2dd   :  { %4190 = vmatpush3.bf16.xpose.msra.mxu1 %v651_v11 }
 0x2de   :  { %4195 = vmatprep.subr.bf16.mxu1 %v5040_v4  ;;  %v697_v17 = vsel %vm646_vm1, %v635_v14, 0 }
 0x2e4   :  { %4192 = vmatmul.mubr.msk.bf16.vlgmr.msra.gmra.mrb[4].mxu1 %vm646_vm1, %v632_v15 }
 0x2e5   :  { %4196 = vmatpush3.bf16.xpose.msra.mxu1 %v697_v17  ;;  %4197 = vmatprep.mubr.msk.bf16.mxu1 %vm5042_vm0, %v5040_v4 }
 0x2e6   :  { %4201 = vmatprep.subr.bf16.mxu1 %v5040_v4 }
 0x2ec   :  { %4198 = vmatmul.mubr.msk.bf16.vlgmr.msra.gmra.mrb[8].mxu1 %vm646_vm1, %v633_v20 }
 0x2ed   :  { %4202 = vmatpush3.bf16.msra.mxu1 %v771_v21  ;;  %4203 = vmatprep.mubr.msk.bf16.mxu1 %vm5042_vm0, %v5040_v4 }
 0x2ee   :  { %4207 = vmatprep.subr.bf16.mxu1 %v5040_v4 }
 0x3b7   :  { %v687_v31 = vpop.f32.mrb[4].mxu1 }
 0x3b8   :  { %v688_v32 = vadd.f32 %v687_v31, %v5381_v28  ;;  %v4193_v33 = vpop.f32.mrb[5].mxu1 }
 0x3b9   :  { %v690_v35 = vpop.f32.mrb[6].mxu1 }
 0x3ba   :  { %v4194_v36 = vpop.f32.mrb[7].mxu1  ;;  %v740_v37 = vsel %vm739_vm3, %v688_v32, -inf }
 0x3bb   :  { %741 = vmax.xlane.f32.xlu0 %v740_v37 }
 0x3bf   :  { %v733_v39 = vpop.f32.mrb[8].mxu1 }
 0x3c0   :  { %v734_v40 = vadd.f32 %v733_v39, %v5386_v38  ;;  %v4199_v41 = vpop.f32.mrb[9].mxu1 }
 0x3c1   :  { %v736_v42 = vpop.f32.mrb[10].mxu1 }
 0x3c2   :  { %v4200_v46 = vpop.f32.mrb[11].mxu1  ;;  %v743_v47 = vsel %vm739_vm3, %v734_v40, -inf }
 0x3c3   :  { %744 = vmax.xlane.f32.xlu1 %v743_v47 }
 0x3d4   :  { %915 = vrot.lane.b32.xlu1 %v635_v14, %s5029_s3 }
 0x448   :  { %v742_v48 = vpop.xlane.xlu0 %741 }
 0x449   :  { %v746_v50 = vsub.f32 %v688_v32, %v742_v48 }
 0x44b   :  { %v748_v51 = vmul.f32 1.442695, %v746_v50 }
 0x44d   :  { %4676 = vpow2.f32 %v748_v51 }
 0x450   :  { %v745_v52 = vpop.xlane.xlu1 %744 }
 0x451   :  { %v747_v53 = vsub.f32 %v734_v40, %v745_v52 }
 0x453   :  { %v750_v54 = vmul.f32 1.442695, %v747_v53 }
 0x454   :  { %v916_v63 = vpop.permute.xlu1 %915 }
 0x455   :  { %4678 = vpow2.f32 %v750_v54  ;;  %v921_v13 = vsel %vm646_vm1, %v916_v63, 0 }
 0x457   :  { %v4677_v57 = vpop.eup %4676 }
 0x458   :  { %v752_v58 = vsel %vm739_vm3, %v4677_v57, 0.0 }
 0x459   :  { %753 = vadd.xlane.f32.xlu0 %v752_v58 }
 0x45f   :  { %v4679_v60 = vpop.eup %4678 }
 0x460   :  { %v755_v61 = vsel %vm739_vm3, %v4679_v60, 0.0 }
 0x461   :  { %756 = vadd.xlane.f32.xlu1 %v755_v61 }
 0x46f   :  { %863 = vrot.lane.b32.xlu0 %v634_v10, %s5029_s3  ;;  %v817_v10 = vsel %vm769_vm2, %v765_v5, 0 }
 0x472   :  { %860 = vrot.lane.b32.xlu1 %v632_v15, %s5029_s3 }
 0x476   :  { %912 = vrot.lane.b32.xlu1 %v633_v20, %s5029_s3 }
 0x4e6   :  { %v754_v62 = vpop.xlane.xlu0 %753 }
 0x4e7   :  { %4680 = vrcp.f32 %v754_v62 }
 0x4ea   :  { %v864_v0 = vpop.permute.xlu0 %863 }
 0x4eb   :  { %v869_v1 = vsel %vm646_vm1, %v864_v0, 0 }
 0x4ec   :  { %4214 = vmatpush3.bf16.xpose.msra.mxu0 %v869_v1 }
 0x4ed   :  { %4225 = vmatprep.subr.bf16.mxu0 %v5040_v4 }
 0x4ee   :  { %v757_v2 = vpop.xlane.xlu1 %756 }
 0x4ef   :  { %4682 = vrcp.f32 %v757_v2 }
 0x4f1   :  { %v4681_v3 = vpop.eup %4680 }
 0x4f2   :  { %v760_v7 = vmul.f32 %v4681_v3, %v4677_v57  ;;  %v861_v8 = vpop.permute.xlu1 %860  ;;  %v4432_v3 = vld [vmem:[#allocation6] sm:$0xff]  }
 0x4f3   :  { %4216 = vmatmul.mubr.msk.bf16.vlgmr.msra.gmra.mrb[4].mxu0 %vm646_vm1, %v861_v8  ;;  %v4435_v8 = vld [vmem:[#allocation6 + $0x18] sm:$0xff]  }
 0x4f4   :  { %v762_v9 = vpack.c.bf16 %v760_v7, %v760_v7  ;;  %4227 = vmatprep.mubr.msk.bf16.mxu0 %vm5042_vm0, %v5040_v4  ;;  %v4434_v7 = vld [vmem:[#allocation6 + $0x10] sm:$0xff]  }
 0x4f6   :  { %4204 = vmatmul.mubr.msk.bf16.vlgmr.msra.gmra.mrb[12].mxu1 %vm739_vm3, %v762_v9  ;;  %v913_v14 = vpop.permute.xlu1 %912  ;;  %v4436_v9 = vld [vmem:[#allocation6 + $0x20] sm:$0xff]  }
 0x4f7   :  { %4208 = vmatpush3.bf16.msra.mxu1 %v817_v10  ;;  %4209 = vmatprep.mubr.msk.bf16.mxu1 %vm5042_vm0, %v5040_v4  ;;  %v4437_v10 = vld [vmem:[#allocation6 + $0x28] sm:$0xff]  }
 0x4f8   :  { %4219 = vmatprep.subr.bf16.mxu1 %v5040_v4 }
 0x4f9   :  { %v4683_v11 = vpop.eup %4682 }
 0x4fa   :  { %v761_v6 = vmul.f32 %v4683_v11, %v4679_v60  ;;  %v4438_v11 = vld [vmem:[#allocation6 + $0x30] sm:$0xff]  }
 0x4fc   :  { %v763_v12 = vpack.c.bf16 %v761_v6, %v761_v6  ;;  %v4439_v6 = vld [vmem:[#allocation6 + $0x38] sm:$0xff]  }
 0x4fe   :  { %4210 = vmatmul.mubr.msk.bf16.vlgmr.msra.gmra.mrb[16].mxu1 %vm739_vm3, %v763_v12 }
 0x4ff   :  { %4221 = vmatprep.mubr.msk.bf16.mxu1 %vm5042_vm0, %v5040_v4 }
 0x500   :  { %4220 = vmatpush3.bf16.xpose.msra.mxu1 %v921_v13 }
 0x501   :  { %4231 = vmatprep.subr.bf16.mxu1 %v5040_v4 }
 0x507   :  { %4222 = vmatmul.mubr.msk.bf16.vlgmr.msra.gmra.mrb[20].mxu1 %vm646_vm1, %v913_v14 }
 0x508   :  { %4233 = vmatprep.mubr.msk.bf16.mxu1 %vm5042_vm0, %v5040_v4 }
 0x5c6   :  { %v905_v15 = vpop.f32.mrb[4].mxu0 }
 0x5c7   :  { %v906_v16 = vadd.f32 %v905_v15, %v5381_v28  ;;  %v4217_v17 = vpop.f32.mrb[5].mxu0 }
 0x5c8   :  { %v908_v18 = vpop.f32.mrb[6].mxu0 }
 0x5c9   :  { %v5417_v20 = vpop.f32.mrb[12].mxu1  ;;  %v4218_v21 = vpop.f32.mrb[7].mxu0  ;;  %v963_v22 = vsel %vm739_vm3, %v906_v16, -inf }
 0x5ca   :  { %964 = vmax.xlane.f32.xlu0 %v963_v22  ;;  %v4205_v23 = vpop.f32.mrb[13].mxu1 }
 0x5cb   :  { %v810_v24 = vpop.f32.mrb[14].mxu1 }
 0x5cc   :  { %v4206_v25 = vpop.f32.mrb[15].mxu1 }
 0x5d1   :  { %v5420_v26 = vpop.f32.mrb[16].mxu1 }
 0x5d2   :  { %v4211_v27 = vpop.f32.mrb[17].mxu1 }
 0x5d3   :  { %v856_v29 = vpop.f32.mrb[18].mxu1 }
 0x5d4   :  { %v4212_v31 = vpop.f32.mrb[19].mxu1 }
 0x5da   :  { %v957_v32 = vpop.f32.mrb[20].mxu1 }
 0x5db   :  { %v958_v33 = vadd.f32 %v957_v32, %v5386_v38  ;;  %v4223_v34 = vpop.f32.mrb[21].mxu1  ;;  %v5451_v32 = vsub.s32 3, %v5328_v43 }
 0x5dc   :  { %v960_v35 = vpop.f32.mrb[22].mxu1 }
 0x5dd   :  { %v4224_v36 = vpop.f32.mrb[23].mxu1  ;;  %v966_v37 = vsel %vm739_vm3, %v958_v33, -inf }
 0x5de   :  { %967 = vmax.xlane.f32.xlu1 %v966_v37 }
 0x5ef   :  { %1037 = vrot.lane.b32.xlu1 %v765_v5, %s5029_s3  ;;  %v4433_v5 = vld [vmem:[#allocation6 + $0x8] sm:$0xff]  }
 0x657   :  { %v965_v39 = vpop.xlane.xlu0 %964 }
 0x658   :  { %v969_v40 = vsub.f32 %v906_v16, %v965_v39 }
 0x65a   :  { %v971_v41 = vmul.f32 1.442695, %v969_v40 }
 0x65c   :  { %4684 = vpow2.f32 %v971_v41  ;;  %v4440_v41 = vld [vmem:[#allocation7] ss:$16 sps:$4 sm:$0xff]  }
 0x666   :  { %v4685_v42 = vpop.eup %4684 }
 0x667   :  { %v975_v46 = vsel %vm739_vm3, %v4685_v42, 0.0 }
 0x668   :  { %976 = vadd.xlane.f32.xlu0 %v975_v46  ;;  %v4443_v46 = vld [vmem:[#allocation7 + $0x8] ss:$16 sps:$4 sm:$0xff]  }
 0x66b   :  { %v968_v47 = vpop.xlane.xlu1 %967 }
 0x66c   :  { %v970_v48 = vsub.f32 %v958_v33, %v968_v47  ;;  %v1099_v33 = vrot.slane %v5333_v45, %v5451_v32  ;;  %v4445_v47 = vld [vmem:[#allocation7 + $0xc] ss:$16 sps:$4 sm:$0xff]  }
 0x66e   :  { %v973_v50 = vmul.f32 1.442695, %v970_v48  ;;  %v4448_v48 = vld [vmem:[#allocation7 + $0x24] ss:$16 sps:$4 sm:$0xff]  }
 0x66f   :  { %v1038_v51 = vpop.permute.xlu1 %1037 }
 0x670   :  { %4686 = vpow2.f32 %v973_v50  ;;  %v1043_v52 = vsel %vm769_vm2, %v1038_v51, 0  ;;  %v4451_v50 = vld [vmem:[#allocation7 + $0x2c] ss:$16 sps:$4 sm:$0xff]   ;;  %v4446_v51 = vld [vmem:[#allocation7 + $0x20] ss:$16 sps:$4 sm:$0xff]  }
 0x671   :  { %4232 = vmatpush3.bf16.msra.mxu1 %v1043_v52  ;;  %v4449_v52 = vld [vmem:[#allocation7 + $0x28] ss:$16 sps:$4 sm:$0xff]  }
 0x67a   :  { %v4687_v53 = vpop.eup %4686 }
 0x67b   :  { %v978_v54 = vsel %vm739_vm3, %v4687_v53, 0.0 }
 0x67c   :  { %979 = vadd.xlane.f32.xlu0 %v978_v54 }
 0x692   :  { %988 = vrot.lane.b32.xlu0 %v5368_v19, %s5029_s3 }
 0x6f5   :  { %v977_v57 = vpop.xlane.xlu0 %976 }
 0x6f6   :  { %4688 = vrcp.f32 %v977_v57 }
 0x700   :  { %v4689_v58 = vpop.eup %4688 }
 0x701   :  { %v983_v61 = vmul.f32 %v4689_v58, %v4685_v42  ;;  %v4442_v42 = vld [vmem:[#allocation7 + $0x4] ss:$16 sps:$4 sm:$0xff]  }
 0x702   :  { %1402 = vmatprep.subr.bf16.mxu1 %v4442_v42 }
 0x703   :  { %v985_v0 = vpack.c.bf16 %v983_v61, %v983_v61 }
 0x709   :  { %v980_v60 = vpop.xlane.xlu0 %979 }
 0x70a   :  { %4690 = vrcp.f32 %v980_v60 }
 0x70d   :  { %v989_v62 = vpop.permute.xlu0 %988 }
 0x70e   :  { %v994_v63 = vsel %vm769_vm2, %v989_v62, 0  ;;  %v4454_v62 = vld [vmem:[#allocation7 + $0x44] ss:$16 sps:$4 sm:$0xff]  }
 0x70f   :  { %4226 = vmatpush3.bf16.msra.mxu0 %v994_v63  ;;  %v4457_v63 = vld [vmem:[#allocation7 + $0x4c] ss:$16 sps:$4 sm:$0xff]  }
 0x710   :  { %4237 = vmatprep.subr.bf16.mxu0 %v5040_v4 }
 0x712   :  { %4228 = vmatmul.mubr.msk.bf16.vlgmr.msra.gmra.mrb[8].mxu0 %vm739_vm3, %v985_v0  ;;  %v4452_v0 = vld [vmem:[#allocation7 + $0x40] ss:$16 sps:$4 sm:$0xff]  }
 0x713   :  { %4253 = vmatprep.mubr.msk.bf16.mxu0 %vm5042_vm0, %v5040_v4  ;;  %4238 = vmatpush3.bf16.msra.mxu0 %v4432_v3  ;;  %v4458_v3 = vld [vmem:[#allocation7 + $0x60] ss:$16 sps:$4 sm:$0xff]  }
 0x714   :  { %v4691_v1 = vpop.eup %4690  ;;  %4239 = vmatprep.subr.bf16.mxu0 %v5040_v4 }
 0x715   :  { %v984_v19 = vmul.f32 %v4691_v1, %v4687_v53  ;;  %v4455_v1 = vld [vmem:[#allocation7 + $0x48] ss:$16 sps:$4 sm:$0xff]  }
 0x717   :  { %v986_v2 = vpack.c.bf16 %v984_v19, %v984_v19  ;;  %4240 = vmatpush3.bf16.msra.mxu0 %v4433_v5  ;;  %v4460_v19 = vld [vmem:[#allocation7 + $0x64] ss:$16 sps:$4 sm:$0xff]   ;;  %v4461_v5 = vld [vmem:[#allocation7 + $0x68] ss:$16 sps:$4 sm:$0xff]  }
 0x718   :  { %4241 = vmatprep.subr.bf16.mxu0 %v5040_v4 }
 0x719   :  { %4234 = vmatmul.mubr.msk.bf16.vlgmr.msra.gmra.mrb[24].mxu1 %vm739_vm3, %v986_v2  ;;  %v4463_v2 = vld [vmem:[#allocation7 + $0x6c] ss:$16 sps:$4 sm:$0xff]  }
 0x71a   :  { %1434 = vmatprep.mubr.bf16.mxu1 %v5041_v30  ;;  %1403 = vmatpush1.bf16.msra.mxu1 %v4440_v41 }
 0x71b   :  { %4242 = vmatpush3.bf16.msra.mxu0 %v4434_v7  ;;  %1404 = vmatprep.subr.bf16.mxu1 %v4448_v48  ;;  %v4466_v7 = vld [vmem:[#allocation7 + $0x84] ss:$16 sps:$4 sm:$0xff]  }
 0x71c   :  { %4243 = vmatprep.subr.bf16.mxu0 %v5040_v4  ;;  %v4489_v48 = vld [vmem:[#allocation9 + $0xc0] sm:$0xff]  }
 0x71e   :  { %1405 = vmatpush1.bf16.msra.mxu1 %v4446_v51  ;;  %v4491_v51 = vld [vmem:[#allocation9 + $0x80] sm:$0xff]  }
 0x71f   :  { %4244 = vmatpush3.bf16.msra.mxu0 %v4435_v8  ;;  %1406 = vmatprep.subr.bf16.mxu1 %v4454_v62  ;;  %v4469_v8 = vld [vmem:[#allocation7 + $0x8c] ss:$16 sps:$4 sm:$0xff]  }
 0x720   :  { %4245 = vmatprep.subr.bf16.mxu0 %v5040_v4  ;;  %v4501_v62 = vld [vmem:[#allocation9 + $0xd8] sm:$0xff]  }
 0x722   :  { %1407 = vmatpush1.bf16.msra.mxu1 %v4452_v0  ;;  %v4503_v0 = vld [vmem:[#allocation9 + $0x98] sm:$0xff]  }
 0x723   :  { %4246 = vmatpush3.bf16.msra.mxu0 %v4436_v9  ;;  %1408 = vmatprep.subr.bf16.mxu1 %v4460_v19  ;;  %v4464_v9 = vld [vmem:[#allocation7 + $0x80] ss:$16 sps:$4 sm:$0xff]  }
 0x724   :  { %4247 = vmatprep.subr.bf16.mxu0 %v5040_v4  ;;  %v4505_v19 = vld [vmem:[#allocation9 + $0xe0] sm:$0xff]  }
 0x726   :  { %1409 = vmatpush1.bf16.msra.mxu1 %v4458_v3  ;;  %v4507_v3 = vld [vmem:[#allocation9 + $0xa0] sm:$0xff]  }
 0x727   :  { %4248 = vmatpush3.bf16.msra.mxu0 %v4437_v10  ;;  %v4467_v10 = vld [vmem:[#allocation7 + $0x88] ss:$16 sps:$4 sm:$0xff]   ;;  %1410 = vmatprep.subr.bf16.mxu1 %v4466_v7 }
 0x728   :  { %4249 = vmatprep.subr.bf16.mxu0 %v5040_v4  ;;  %v4509_v7 = vld [vmem:[#allocation9 + $0xe8] sm:$0xff]  }
 0x72a   :  { %1411 = vmatpush1.bf16.msra.mxu1 %v4464_v9  ;;  %v4511_v9 = vld [vmem:[#allocation9 + $0xa8] sm:$0xff]  }
 0x72b   :  { %4250 = vmatpush3.bf16.msra.mxu0 %v4438_v11  ;;  %v4472_v11 = vld [vmem:[#allocation7 + $0xa4] ss:$16 sps:$4 sm:$0xff]  }
 0x72c   :  { %4251 = vmatprep.subr.bf16.mxu0 %v5040_v4  ;;  %1412 = vmatprep.subr.bf16.mxu1 %v4472_v11  ;;  %v4513_v11 = vld [vmem:[#allocation9 + $0xf0] sm:$0xff]  }
 0x72f   :  { %4252 = vmatpush3.bf16.msra.mxu0 %v4439_v6  ;;  %v4475_v6 = vld [vmem:[#allocation7 + $0xac] ss:$16 sps:$4 sm:$0xff]  }
 0x730   :  { %1445 = vmatprep.subr.bf16.mxu0 %v4445_v47  ;;  %v4488_v47 = vld [vmem:[#allocation9 + $0x40] sm:$0xff]  }
 0x7e5   :  { %v1030_v12 = vpop.f32.mrb[8].mxu0 }
 0x7e6   :  { %v4229_v13 = vpop.f32.mrb[9].mxu0 }
 0x7e7   :  { %v1033_v14 = vpop.f32.mrb[10].mxu0  ;;  %v4473_v13 = vld [vmem:[#allocation7 + $0xa8] ss:$16 sps:$4 sm:$0xff]  }
 0x7e8   :  { %v4230_v15 = vpop.f32.mrb[11].mxu0  ;;  %v4478_v14 = vld [vmem:[#allocation7 + $0xc4] ss:$16 sps:$4 sm:$0xff]  }
 0x7e9   :  { %v4481_v15 = vld [vmem:[#allocation7 + $0xcc] ss:$16 sps:$4 sm:$0xff]  }
 0x7ec   :  { %v1079_v16 = vpop.f32.mrb[24].mxu1 }
 0x7ed   :  { %v4390_v17 = vpack.i.bf16 %v1079_v16, %v1030_v12  ;;  %v4235_v18 = vpop.f32.mrb[25].mxu1  ;;  %v4470_v12 = vld [vmem:[#allocation7 + $0xa0] ss:$16 sps:$4 sm:$0xff]  }
 0x7ee   :  { %v1082_v21 = vpop.f32.mrb[26].mxu1  ;;  %1413 = vmatpush1.bf16.msra.mxu1 %v4470_v12  ;;  %v4476_v16 = vld [vmem:[#allocation7 + $0xc0] ss:$16 sps:$4 sm:$0xff]   ;;  %v4484_v18 = vld [vmem:[#allocation7 + $0xe4] ss:$16 sps:$4 sm:$0xff]  }
 0x7ef   :  { %4391 = vrot.lane.b32.xlu1 %v4390_v17, %s5029_s3  ;;  %v4236_v22 = vpop.f32.mrb[27].mxu1  ;;  %v4479_v17 = vld [vmem:[#allocation7 + $0xc8] ss:$16 sps:$4 sm:$0xff]   ;;  %1414 = vmatprep.subr.bf16.mxu1 %v4478_v14  ;;  %v4482_v21 = vld [vmem:[#allocation7 + $0xe0] ss:$16 sps:$4 sm:$0xff]  }
 0x7f0   :  { %v4485_v22 = vld [vmem:[#allocation7 + $0xe8] ss:$16 sps:$4 sm:$0xff]   ;;  %v4515_v12 = vld [vmem:[#allocation9 + $0xb0] sm:$0xff]  }
 0x7f1   :  { %v4517_v14 = vld [vmem:[#allocation9 + $0xf8] sm:$0xff]  }
 0x7f2   :  { %1415 = vmatpush1.bf16.msra.mxu1 %v4476_v16  ;;  %v4519_v16 = vld [vmem:[#allocation9 + $0xb8] sm:$0xff]  }
 0x7f3   :  { %1416 = vmatprep.subr.bf16.mxu1 %v4484_v18  ;;  %v5479_v18 = vld [vmem:[#allocation2 + $0x18] sm:$0xff] }
 0x7f6   :  { %1417 = vmatpush1.bf16.msra.mxu1 %v4482_v21 }
 0x7f7   :  { %4038 = vmatprep.subr.bf16.mxu1 %v4488_v47 }
 0x861   :  { %v4392_v23 = vpop.permute.xlu1 %4391 }
 0x862   :  { %v4394_v24 = vunpack.i.h.bf16 %v4392_v23  ;;  %v4393_v25 = vunpack.i.l.bf16 %v4392_v23  ;;  %v4487_v23 = vld [vmem:[#allocation7 + $0xec] ss:$16 sps:$4 sm:$0xff]  }
 0x864   :  { %v1094_v27 = vsel %vm646_vm1, %v5420_v26, %v4394_v24  ;;  %v1093_v29 = vsel %vm646_vm1, %v5417_v20, %v4393_v25 }
 0x865   :  { %v1095_v31 = vpack.c.bf16 %v1094_v27, %v1093_v29 }
 0x867   :  { %4254 = vmatmul.mubr.bf16.vlgmr.msra.gmra.mrb[12].mxu0 %v1095_v31 }
 0x868   :  { %1477 = vmatprep.mubr.bf16.mxu0 %v5041_v30  ;;  %1446 = vmatpush1.bf16.msra.mxu0 %v4443_v46 }
 0x869   :  { %1447 = vmatprep.subr.bf16.mxu0 %v4451_v50  ;;  %v4490_v50 = vld [vmem:[#allocation9] sm:$0xff]  }
 0x86c   :  { %1448 = vmatpush1.bf16.msra.mxu0 %v4449_v52  ;;  %v4492_v52 = vld [vmem:[#allocation9 + $0x48] sm:$0xff]  }
 0x86d   :  { %1449 = vmatprep.subr.bf16.mxu0 %v4457_v63  ;;  %v4502_v63 = vld [vmem:[#allocation9 + $0x18] sm:$0xff]  }
 0x870   :  { %1450 = vmatpush1.bf16.msra.mxu0 %v4455_v1  ;;  %v4504_v1 = vld [vmem:[#allocation9 + $0x60] sm:$0xff]  }
 0x871   :  { %1451 = vmatprep.subr.bf16.mxu0 %v4463_v2  ;;  %v4506_v2 = vld [vmem:[#allocation9 + $0x20] sm:$0xff]  }
 0x874   :  { %1452 = vmatpush1.bf16.msra.mxu0 %v4461_v5  ;;  %v4508_v5 = vld [vmem:[#allocation9 + $0x68] sm:$0xff]  }
 0x875   :  { %1453 = vmatprep.subr.bf16.mxu0 %v4469_v8  ;;  %v4510_v8 = vld [vmem:[#allocation9 + $0x28] sm:$0xff]  }
 0x878   :  { %1454 = vmatpush1.bf16.msra.mxu0 %v4467_v10  ;;  %v4512_v10 = vld [vmem:[#allocation9 + $0x70] sm:$0xff]  }
 0x879   :  { %1455 = vmatprep.subr.bf16.mxu0 %v4475_v6  ;;  %v4514_v6 = vld [vmem:[#allocation9 + $0x30] sm:$0xff]  }
 0x87c   :  { %1456 = vmatpush1.bf16.msra.mxu0 %v4473_v13  ;;  %v4516_v13 = vld [vmem:[#allocation9 + $0x78] sm:$0xff]  }
 0x87d   :  { %1457 = vmatprep.subr.bf16.mxu0 %v4481_v15  ;;  %v4518_v15 = vld [vmem:[#allocation9 + $0x38] sm:$0xff]  }
 0x880   :  { %1458 = vmatpush1.bf16.msra.mxu0 %v4479_v17  ;;  %v1228_v17 = vsub.s32 4, %v5328_v43 }
 0x881   :  { %1459 = vmatprep.subr.bf16.mxu0 %v4487_v23 }
 0x882   :  { %v1229_v21 = vrot.slane %v5333_v45, %v1228_v17  ;;  %v1233_v23 = vrot.slane %v5338_v49, %v1228_v17 }
 0x884   :  { %1460 = vmatpush1.bf16.msra.mxu0 %v4485_v22  ;;  %v1237_v22 = vrot.slane %v5354_v59, %v1228_v17 }
 0x885   :  { %4060 = vmatprep.subr.bf16.mxu0 %v4489_v48 }
 0x93a   :  { %v1182_v34 = vpop.f32.mrb[12].mxu0 }
 0x93b   :  { %v1183_v35 = vadd.f32 %v1182_v34, %v1099_v33  ;;  %v4255_v36 = vpop.f32.mrb[13].mxu0 }
 0x93c   :  { %v1185_v37 = vpop.f32.mrb[14].mxu0  ;;  %v1216_v36 = vrot.slane %v5338_v49, %v5451_v32 }
 0x93d   :  { %v1186_v39 = vadd.f32 %v1185_v37, %v1099_v33  ;;  %v4256_v40 = vpop.f32.mrb[15].mxu0  ;;  %v1189_v26 = vadd.f32 %v1183_v35, %v5343_v55 }
 0x93f   :  { %1191 = vadd.xlane.f32.xlu1 %v1189_v26  ;;  %v1190_v20 = vadd.f32 %v1186_v39, %v5345_v56 }
 0x941   :  { %1193 = vadd.xlane.f32.xlu0 %v1190_v20 }
 0x9cc   :  { %v1192_v55 = vpop.xlane.xlu1 %1191 }
 0x9cd   :  { %v1195_v53 = vmul.f32 0.0078125, %v1192_v55  ;;  %v4493_v55 = vld [vmem:[#allocation9 + $0xc8] sm:$0xff]  }
 0x9ce   :  { %v1194_v56 = vpop.xlane.xlu0 %1193 }
 0x9cf   :  { %v5457_v54 = vsub.f32 %v1189_v26, %v1195_v53  ;;  %v1196_v57 = vmul.f32 0.0078125, %v1194_v56  ;;  %v1222_v26 = vrot.slane %v5354_v59, %v5451_v32  ;;  %v4494_v53 = vld [vmem:[#allocation9 + $0x8] sm:$0xff]  }
 0x9d0   :  { %v4495_v56 = vld [vmem:[#allocation9 + $0x88] sm:$0xff]  }
 0x9d1   :  { %v5459_v58 = vsub.f32 %v1190_v20, %v1196_v57  ;;  %v1199_v60 = vmul.f32 %v5457_v54, %v5457_v54  ;;  %v4497_v57 = vld [vmem:[#allocation9 + $0xd0] sm:$0xff]  }
 0x9d3   :  { %1201 = vadd.xlane.f32.xlu0 %v1199_v60  ;;  %v1200_v61 = vmul.f32 %v5459_v58, %v5459_v58  ;;  %v4499_v60 = vld [vmem:[#allocation9 + $0x90] sm:$0xff]  }
 0x9d7   :  { %1203 = vadd.xlane.f32.xlu0 %v1200_v61  ;;  %v4500_v61 = vld [vmem:[#allocation9 + $0x58] sm:$0xff]  }
 0xa60   :  { %v1202_v24 = vpop.xlane.xlu0 %1201 }
 0xa61   :  { %v1205_v25 = vmul.f32 0.0078125, %v1202_v24  ;;  %v1241_v24 = vrot.slane %v5479_v18, %v1228_v17 }
 0xa63   :  { %v1207_v27 = vadd.f32 1e-12, %v1205_v25 }
 0xa64   :  { %v1204_v29 = vpop.xlane.xlu0 %1203 }
 0xa65   :  { %4692 = vrsqrt.f32 %v1207_v27  ;;  %v1206_v31 = vmul.f32 0.0078125, %v1204_v29 }
 0xa67   :  { %v1208_v33 = vadd.f32 1e-12, %v1206_v31 }
 0xa69   :  { %4694 = vrsqrt.f32 %v1208_v33 }
 0xa6f   :  { %v4693_v34 = vpop.eup %4692 }
 0xa70   :  { %v1211_v35 = vmul.f32 %v4693_v34, %v5457_v54  ;;  %v4496_v54 = vld [vmem:[#allocation9 + $0x50] sm:$0xff]  }
 0xa72   :  { %v1217_v40 = vmul.f32 %v1216_v36, %v1211_v35 }
 0xa73   :  { %v4695_v37 = vpop.eup %4694 }
 0xa74   :  { %v1212_v39 = vmul.f32 %v4695_v37, %v5459_v58  ;;  %v5471_v41 = vadd.f32 %v1222_v26, %v1217_v40  ;;  %v4498_v58 = vld [vmem:[#allocation9 + $0x10] sm:$0xff]  }
 0xa76   :  { %v1218_v20 = vmul.f32 %v1216_v36, %v1212_v39 }
 0xa78   :  { %v5473_v42 = vadd.f32 %v1222_v26, %v1218_v20 }
 0xa7a   :  { %v1225_v46 = vpack.c.bf16 %v5473_v42, %v5471_v41 }
 0xa7c   :  { %1435 = vmatmul.mubr.bf16.vlgmr.msra.gmra.mrb[28].mxu1 %v1225_v46  ;;  %1478 = vmatmul.mubr.bf16.vlgmr.msra.gmra.mrb[16].mxu0 %v1225_v46 }
 0xa7d   :  { %4039 = vmatpush3.bf16.msra.mxu1 %v4490_v50  ;;  %4061 = vmatpush3.bf16.msra.mxu0 %v4491_v51 }
 0xa7e   :  { %4040 = vmatprep.subr.bf16.mxu1 %v4492_v52  ;;  %4062 = vmatprep.subr.bf16.mxu0 %v4493_v55 }
 0xa81   :  { %4041 = vmatpush3.bf16.msra.mxu1 %v4494_v53  ;;  %4063 = vmatpush3.bf16.msra.mxu0 %v4495_v56 }
 0xa82   :  { %4042 = vmatprep.subr.bf16.mxu1 %v4496_v54  ;;  %4064 = vmatprep.subr.bf16.mxu0 %v4497_v57 }
 0xa85   :  { %4043 = vmatpush3.bf16.msra.mxu1 %v4498_v58  ;;  %4065 = vmatpush3.bf16.msra.mxu0 %v4499_v60 }
 0xa86   :  { %4044 = vmatprep.subr.bf16.mxu1 %v4500_v61  ;;  %4066 = vmatprep.subr.bf16.mxu0 %v4501_v62 }
 0xa89   :  { %4045 = vmatpush3.bf16.msra.mxu1 %v4502_v63  ;;  %4067 = vmatpush3.bf16.msra.mxu0 %v4503_v0 }
 0xa8a   :  { %4046 = vmatprep.subr.bf16.mxu1 %v4504_v1  ;;  %4068 = vmatprep.subr.bf16.mxu0 %v4505_v19 }
 0xa8d   :  { %4047 = vmatpush3.bf16.msra.mxu1 %v4506_v2  ;;  %4069 = vmatpush3.bf16.msra.mxu0 %v4507_v3 }
 0xa8e   :  { %4048 = vmatprep.subr.bf16.mxu1 %v4508_v5  ;;  %4070 = vmatprep.subr.bf16.mxu0 %v4509_v7 }
 0xa91   :  { %4049 = vmatpush3.bf16.msra.mxu1 %v4510_v8  ;;  %4071 = vmatpush3.bf16.msra.mxu0 %v4511_v9 }
 0xa92   :  { %4050 = vmatprep.subr.bf16.mxu1 %v4512_v10  ;;  %4072 = vmatprep.subr.bf16.mxu0 %v4513_v11 }
 0xa95   :  { %4051 = vmatpush3.bf16.msra.mxu1 %v4514_v6  ;;  %4073 = vmatpush3.bf16.msra.mxu0 %v4515_v12 }
 0xa96   :  { %4052 = vmatprep.subr.bf16.mxu1 %v4516_v13  ;;  %4074 = vmatprep.subr.bf16.mxu0 %v4517_v14 }
 0xa99   :  { %4053 = vmatpush3.bf16.msra.mxu1 %v4518_v15  ;;  %4075 = vmatpush3.bf16.msra.mxu0 %v4519_v16 }
 0xa9a   :  { %4257 = vmatprep.subr.bf16.mxu0 %v5040_v4 }
 0xb4f   :  { %v1436_v25 = vpop.f32.mrb[28].mxu1  ;;  %v1479_v27 = vpop.f32.mrb[16].mxu0 }
 0xb50   :  { %v5485_v29 = vadd.f32 %v1436_v25, %v1229_v21  ;;  %v5487_v31 = vadd.f32 %v1479_v27, %v1237_v22  ;;  %v1438_v33 = vpop.f32.mrb[29].mxu1  ;;  %v1481_v34 = vpop.f32.mrb[17].mxu0 }
 0xb51   :  { %v5489_v35 = vadd.f32 %v1438_v33, %v1233_v23  ;;  %v5491_v36 = vadd.f32 %v1481_v34, %v1241_v24  ;;  %v1440_v37 = vpop.f32.mrb[30].mxu1  ;;  %v1483_v45 = vpop.f32.mrb[18].mxu0 }
 0xb52   :  { %v1496_v59 = vmul.f32 0.044715, %v5485_v29  ;;  %v1498_v49 = vmul.f32 0.044715, %v5487_v31  ;;  %v1441_v39 = vadd.f32 %v1440_v37, %v1229_v21  ;;  %v1484_v40 = vadd.f32 %v1483_v45, %v1237_v22  ;;  %v1442_v26 = vpop.f32.mrb[31].mxu1  ;;  %v1485_v20 = vpop.f32.mrb[19].mxu0 }
 0xb53   :  { %v1497_v46 = vmul.f32 0.044715, %v5489_v35  ;;  %v1499_v47 = vmul.f32 0.044715, %v5491_v36  ;;  %v5497_v48 = vadd.f32 %v1442_v26, %v1233_v23  ;;  %v5499_v50 = vadd.f32 %v1485_v20, %v1241_v24 }
 0xb54   :  { %v1504_v51 = vmul.f32 %v1496_v59, %v5485_v29  ;;  %v1506_v52 = vmul.f32 %v1498_v49, %v5487_v31  ;;  %v1500_v55 = vmul.f32 0.044715, %v1441_v39  ;;  %v1502_v53 = vmul.f32 0.044715, %v1484_v40 }
 0xb55   :  { %v1505_v56 = vmul.f32 %v1497_v46, %v5489_v35  ;;  %v1507_v54 = vmul.f32 %v1499_v47, %v5491_v36  ;;  %v1501_v57 = vmul.f32 0.044715, %v5497_v48  ;;  %v1503_v58 = vmul.f32 0.044715, %v5499_v50 }
 0xb56   :  { %v1512_v60 = vmul.f32 %v1504_v51, %v5485_v29  ;;  %v1514_v61 = vmul.f32 %v1506_v52, %v5487_v31  ;;  %v1508_v62 = vmul.f32 %v1500_v55, %v1441_v39  ;;  %v1510_v63 = vmul.f32 %v1502_v53, %v1484_v40 }
 0xb57   :  { %v1513_v0 = vmul.f32 %v1505_v56, %v5489_v35  ;;  %v1515_v1 = vmul.f32 %v1507_v54, %v5491_v36  ;;  %v1509_v19 = vmul.f32 %v1501_v57, %v5497_v48  ;;  %v1511_v2 = vmul.f32 %v1503_v58, %v5499_v50 }
 0xb58   :  { %v1520_v3 = vadd.f32 %v1512_v60, %v5485_v29  ;;  %v1522_v5 = vadd.f32 %v1514_v61, %v5487_v31  ;;  %v1516_v7 = vmul.f32 %v1508_v62, %v1441_v39  ;;  %v1518_v8 = vmul.f32 %v1510_v63, %v1484_v40 }
 0xb59   :  { %v1517_v9 = vmul.f32 %v1509_v19, %v5497_v48  ;;  %v1519_v10 = vmul.f32 %v1511_v2, %v5499_v50  ;;  %v1521_v14 = vadd.f32 %v1513_v0, %v5489_v35  ;;  %v1523_v21 = vadd.f32 %v1515_v1, %v5491_v36 }
 0xb5a   :  { %v1528_v11 = vmul.f32 0.7978846, %v1520_v3  ;;  %v1530_v6 = vmul.f32 0.7978846, %v1522_v5  ;;  %v1524_v12 = vadd.f32 %v1516_v7, %v1441_v39  ;;  %v1526_v13 = vadd.f32 %v1518_v8, %v1484_v40 }
 0xb5b   :  { %v1525_v15 = vadd.f32 %v1517_v9, %v5497_v48  ;;  %v1529_v22 = vmul.f32 0.7978846, %v1521_v14  ;;  %v1527_v24 = vadd.f32 %v1519_v10, %v5499_v50  ;;  %v1531_v25 = vmul.f32 0.7978846, %v1523_v21 }
 0xb5c   :  { %4696 = vtanh.f32 %v1528_v11  ;;  %v1532_v16 = vmul.f32 0.7978846, %v1524_v12  ;;  %v1534_v17 = vmul.f32 0.7978846, %v1526_v13  ;;  %v1488_v26 = vmul.f32 0.5, %v5485_v29 }
 0xb5d   :  { %4698 = vtanh.f32 %v1530_v6  ;;  %v1533_v23 = vmul.f32 0.7978846, %v1525_v15  ;;  %v1535_v27 = vmul.f32 0.7978846, %v1527_v24  ;;  %v1492_v20 = vmul.f32 0.5, %v1441_v39 }
 0xb5e   :  { %4700 = vtanh.f32 %v1532_v16  ;;  %v1490_v51 = vmul.f32 0.5, %v5487_v31  ;;  %v1494_v52 = vmul.f32 0.5, %v1484_v40  ;;  %v1489_v56 = vmul.f32 0.5, %v5489_v35 }
 0xb5f   :  { %4702 = vtanh.f32 %v1534_v17  ;;  %v1493_v61 = vmul.f32 0.5, %v5497_v48  ;;  %v1491_v39 = vmul.f32 0.5, %v5491_v36  ;;  %v1495_v1 = vmul.f32 0.5, %v5499_v50 }
 0xb60   :  { %4704 = vtanh.f32 %v1529_v22  ;;  %v1567_v48 = vrot.slane %v5479_v18, %v5451_v32  ;;  %v4520_v18 = vld [vmem:[#allocation10] ss:$12 sps:$4 sm:$0xff]  }
 0xb61   :  { %4706 = vtanh.f32 %v1533_v23 }
 0xb62   :  { %4708 = vtanh.f32 %v1531_v25 }
 0xb63   :  { %4710 = vtanh.f32 %v1535_v27 }
 0xb66   :  { %v4697_v33 = vpop.eup %4696 }
 0xb67   :  { %v4699_v34 = vpop.eup %4698  ;;  %v1544_v37 = vadd.f32 1.0, %v4697_v33  ;;  %v4522_v33 = vld [vmem:[#allocation10 + $0x4] ss:$12 sps:$4 sm:$0xff]  }
 0xb68   :  { %v4701_v45 = vpop.eup %4700  ;;  %v1546_v59 = vadd.f32 1.0, %v4699_v34  ;;  %v4523_v34 = vld [vmem:[#allocation10 + $0x8] ss:$12 sps:$4 sm:$0xff]   ;;  %2163 = vmatprep.subr.bf16.mxu1 %v4522_v33 }
 0xb69   :  { %v4703_v49 = vpop.eup %4702  ;;  %v1548_v46 = vadd.f32 1.0, %v4701_v45  ;;  %v1552_v57 = vmul.f32 %v1544_v37, %v1488_v26  ;;  %v4526_v37 = vld [vmem:[#allocation10 + $0x1c] ss:$12 sps:$4 sm:$0xff]   ;;  %v4527_v45 = vld [vmem:[#allocation10 + $0x20] ss:$12 sps:$4 sm:$0xff]  }
 0xb6a   :  { %v4705_v47 = vpop.eup %4704  ;;  %v1550_v55 = vadd.f32 1.0, %v4703_v49  ;;  %v1554_v63 = vmul.f32 %v1546_v59, %v1490_v51  ;;  %v4524_v59 = vld [vmem:[#allocation10 + $0x18] ss:$12 sps:$4 sm:$0xff]  }
 0xb6b   :  { %v4707_v53 = vpop.eup %4706  ;;  %v1545_v54 = vadd.f32 1.0, %v4705_v47  ;;  %v1556_v58 = vmul.f32 %v1548_v46, %v1492_v20 }
 0xb6c   :  { %v4709_v60 = vpop.eup %4708  ;;  %v1549_v62 = vadd.f32 1.0, %v4707_v53  ;;  %v1558_v0 = vmul.f32 %v1550_v55, %v1494_v52  ;;  %v4530_v52 = vld [vmem:[#allocation10 + $0x34] ss:$12 sps:$4 sm:$0xff]   ;;  %v4528_v55 = vld [vmem:[#allocation10 + $0x30] ss:$12 sps:$4 sm:$0xff]  }
 0xb6d   :  { %v4711_v29 = vpop.eup %4710  ;;  %v1547_v31 = vadd.f32 1.0, %v4709_v60  ;;  %v1560_v40 = vpack.c.bf16 %v1556_v58, %v1552_v57  ;;  %v1553_v19 = vmul.f32 %v1545_v54, %v1489_v56  ;;  %v4531_v53 = vld [vmem:[#allocation10 + $0x38] ss:$12 sps:$4 sm:$0xff]   ;;  %v4532_v54 = vld [vmem:[#allocation10 + $0x48] ss:$12 sps:$4 sm:$0xff]  }
 0xb6e   :  { %v1557_v2 = vmul.f32 %v1549_v62, %v1493_v61  ;;  %v1551_v3 = vadd.f32 1.0, %v4711_v29  ;;  %v1562_v35 = vpack.c.bf16 %v1558_v0, %v1554_v63  ;;  %v4534_v56 = vld [vmem:[#allocation10 + $0x4c] ss:$12 sps:$4 sm:$0xff]   ;;  %v4535_v57 = vld [vmem:[#allocation10 + $0x50] ss:$12 sps:$4 sm:$0xff]  }
 0xb6f   :  { %v1555_v7 = vmul.f32 %v1547_v31, %v1491_v39  ;;  %v4536_v58 = vld [vmem:[#allocation10 + $0x60] ss:$12 sps:$4 sm:$0xff]   ;;  %v4538_v60 = vld [vmem:[#allocation10 + $0x64] ss:$12 sps:$4 sm:$0xff]   ;;  %v4539_v61 = vld [vmem:[#allocation10 + $0x68] ss:$12 sps:$4 sm:$0xff]  }
 0xb70   :  { %v1561_v5 = vpack.c.bf16 %v1557_v2, %v1553_v19  ;;  %v1559_v8 = vmul.f32 %v1551_v3, %v1495_v1  ;;  %v4542_v62 = vld [vmem:[#allocation10 + $0x7c] ss:$12 sps:$4 sm:$0xff]   ;;  %v4540_v63 = vld [vmem:[#allocation10 + $0x78] ss:$12 sps:$4 sm:$0xff]   ;;  %v4543_v0 = vld [vmem:[#allocation10 + $0x80] ss:$12 sps:$4 sm:$0xff]  }
 0xb71   :  { %v4546_v29 = vld [vmem:[#allocation10 + $0x94] ss:$12 sps:$4 sm:$0xff]   ;;  %v4544_v39 = vld [vmem:[#allocation10 + $0x90] ss:$12 sps:$4 sm:$0xff]   ;;  %v4547_v1 = vld [vmem:[#allocation10 + $0x98] ss:$12 sps:$4 sm:$0xff]  }
 0xb72   :  { %1792 = vmatprep.mubr.bf16.mxu1 %v1561_v5  ;;  %v1563_v9 = vpack.c.bf16 %v1559_v8, %v1555_v7  ;;  %v4550_v31 = vld [vmem:[#allocation10 + $0xac] ss:$12 sps:$4 sm:$0xff]   ;;  %v4551_v19 = vld [vmem:[#allocation10 + $0xb0] ss:$12 sps:$4 sm:$0xff]  }
 0xb73   :  { %1793 = vmatmul.mubr.bf16.vlgmr.msra.gmra.mrb[32].mxu1 %v1560_v40  ;;  %v4548_v40 = vld [vmem:[#allocation10 + $0xa8] ss:$12 sps:$4 sm:$0xff]  }
 0xb74   :  { %1833 = vmatprep.mubr.bf16.mxu0 %v1563_v9  ;;  %2195 = vmatprep.mubr.bf16.mxu1 %v5041_v30  ;;  %v1868_v9 = vsub.s32 5, %v5328_v43 }
 0xb75   :  { %1834 = vmatmul.mubr.bf16.vlgmr.msra.gmra.mrb[20].mxu0 %v1562_v35  ;;  %2164 = vmatpush1.bf16.msra.mxu1 %v4520_v18 }
 0xb76   :  { %4273 = vmatprep.mubr.msk.bf16.mxu0 %vm5042_vm0, %v5040_v4  ;;  %4258 = vmatpush3.bf16.msra.mxu0 %v4523_v34 }
 0xb77   :  { %4259 = vmatprep.subr.bf16.mxu0 %v5040_v4  ;;  %2165 = vmatprep.subr.bf16.mxu1 %v4526_v37 }
 0xb79   :  { %2166 = vmatpush1.bf16.msra.mxu1 %v4524_v59 }
 0xb7a   :  { %4260 = vmatpush3.bf16.msra.mxu0 %v4527_v45  ;;  %2167 = vmatprep.subr.bf16.mxu1 %v4530_v52 }
 0xb7b   :  { %4261 = vmatprep.subr.bf16.mxu0 %v5040_v4 }
 0xb7d   :  { %2168 = vmatpush1.bf16.msra.mxu1 %v4528_v55 }
 0xb7e   :  { %4262 = vmatpush3.bf16.msra.mxu0 %v4531_v53  ;;  %2169 = vmatprep.subr.bf16.mxu1 %v4534_v56 }
 0xb7f   :  { %4263 = vmatprep.subr.bf16.mxu0 %v5040_v4 }
 0xb81   :  { %2170 = vmatpush1.bf16.msra.mxu1 %v4532_v54 }
 0xb82   :  { %4264 = vmatpush3.bf16.msra.mxu0 %v4535_v57  ;;  %2171 = vmatprep.subr.bf16.mxu1 %v4538_v60 }
 0xb83   :  { %4265 = vmatprep.subr.bf16.mxu0 %v5040_v4 }
 0xb85   :  { %2172 = vmatpush1.bf16.msra.mxu1 %v4536_v58 }
 0xb86   :  { %4266 = vmatpush3.bf16.msra.mxu0 %v4539_v61  ;;  %2173 = vmatprep.subr.bf16.mxu1 %v4542_v62 }
 0xb87   :  { %4267 = vmatprep.subr.bf16.mxu0 %v5040_v4 }
 0xb89   :  { %2174 = vmatpush1.bf16.msra.mxu1 %v4540_v63 }
 0xb8a   :  { %4268 = vmatpush3.bf16.msra.mxu0 %v4543_v0  ;;  %2175 = vmatprep.subr.bf16.mxu1 %v4546_v29 }
 0xb8b   :  { %4269 = vmatprep.subr.bf16.mxu0 %v5040_v4 }
 0xb8d   :  { %2176 = vmatpush1.bf16.msra.mxu1 %v4544_v39 }
 0xb8e   :  { %4270 = vmatpush3.bf16.msra.mxu0 %v4547_v1  ;;  %2177 = vmatprep.subr.bf16.mxu1 %v4550_v31 }
 0xb8f   :  { %4271 = vmatprep.subr.bf16.mxu0 %v5040_v4 }
 0xb91   :  { %2178 = vmatpush1.bf16.msra.mxu1 %v4548_v40 }
 0xb92   :  { %4272 = vmatpush3.bf16.msra.mxu0 %v4551_v19  ;;  %4277 = vmatprep.subr.bf16.mxu1 %v5040_v4 }
 0xb93   :  { %4301 = vmatprep.subr.bf16.mxu0 %v5040_v4 }
 0xc46   :  { %v4054_v36 = vpop.f32.mrb[32].mxu1 }
 0xc47   :  { %v4055_v50 = vpop.f32.mrb[33].mxu1 }
 0xc48   :  { %v4076_v10 = vpop.f32.mrb[20].mxu0  ;;  %v4056_v11 = vadd.f32 %v4055_v50, %v4054_v36  ;;  %v4057_v6 = vpop.f32.mrb[34].mxu1  ;;  %v5544_v36 = vld [vmem:[#allocation2] sm:$0xff] }
 0xc49   :  { %v4077_v12 = vpop.f32.mrb[21].mxu0  ;;  %v4058_v13 = vpop.f32.mrb[35].mxu1 }
 0xc4a   :  { %v1795_v14 = vadd.f32 %v4056_v11, %v1567_v48  ;;  %v4078_v15 = vadd.f32 %v4077_v12, %v4076_v10  ;;  %v4079_v16 = vpop.f32.mrb[22].mxu0  ;;  %v4059_v17 = vadd.f32 %v4058_v13, %v4057_v6  ;;  %v5547_v13 = vld [vmem:[#allocation2 + $0x8] sm:$0xff] }
 0xc4b   :  { %v4080_v21 = vpop.f32.mrb[23].mxu0 }
 0xc4c   :  { %v1836_v22 = vadd.f32 %v4078_v15, %v1795_v14  ;;  %v1798_v23 = vadd.f32 %v4059_v17, %v1567_v48  ;;  %v4081_v24 = vadd.f32 %v4080_v21, %v4079_v16  ;;  %v1869_v48 = vrot.slane %v5544_v36, %v1868_v9 }
 0xc4d   :  { %v1875_v14 = vrot.slane %v5547_v13, %v1868_v9 }
 0xc4e   :  { %v1839_v25 = vadd.f32 %v4081_v24, %v1798_v23  ;;  %v1842_v27 = vadd.f32 %v1836_v22, %v5471_v41  ;;  %v2025_v22 = vsub.s32 6, %v5328_v43 }
 0xc50   :  { %1844 = vadd.xlane.f32.xlu1 %v1842_v27  ;;  %v1843_v32 = vadd.f32 %v1839_v25, %v5473_v42  ;;  %v2030_v23 = vrot.slane %v5547_v13, %v2025_v22 }
 0xc52   :  { %1846 = vadd.xlane.f32.xlu0 %v1843_v32 }
 0xcdd   :  { %v1845_v41 = vpop.xlane.xlu1 %1844 }
 0xcde   :  { %v1848_v49 = vmul.f32 0.0078125, %v1845_v41 }
 0xcdf   :  { %v1847_v42 = vpop.xlane.xlu0 %1846 }
 0xce0   :  { %v1850_v26 = vsub.f32 %v1842_v27, %v1848_v49  ;;  %v1849_v20 = vmul.f32 0.0078125, %v1847_v42  ;;  %v5562_v27 = vld [vmem:[#allocation2 + $0x10] sm:$0xff]  ;;  %v2026_v42 = vrot.slane %v5544_v36, %v2025_v22 }
 0xce2   :  { %v1851_v46 = vsub.f32 %v1843_v32, %v1849_v20  ;;  %v1852_v47 = vmul.f32 %v1850_v26, %v1850_v26  ;;  %v2034_v32 = vrot.slane %v5562_v27, %v2025_v22 }
 0xce4   :  { %1854 = vadd.xlane.f32.xlu1 %v1852_v47  ;;  %v1853_v51 = vmul.f32 %v1851_v46, %v1851_v46 }
 0xce6   :  { %1856 = vadd.xlane.f32.xlu0 %v1853_v51 }
 0xd71   :  { %v1855_v2 = vpop.xlane.xlu1 %1854 }
 0xd72   :  { %v1858_v3 = vmul.f32 0.0078125, %v1855_v2 }
 0xd73   :  { %v1857_v35 = vpop.xlane.xlu0 %1856 }
 0xd74   :  { %v1860_v5 = vadd.f32 1e-12, %v1858_v3  ;;  %v1859_v7 = vmul.f32 0.0078125, %v1857_v35 }
 0xd76   :  { %4712 = vrsqrt.f32 %v1860_v5  ;;  %v1861_v8 = vadd.f32 1e-12, %v1859_v7 }
 0xd78   :  { %4714 = vrsqrt.f32 %v1861_v8 }
 0xd80   :  { %v4713_v50 = vpop.eup %4712 }
 0xd81   :  { %v1864_v10 = vmul.f32 %v4713_v50, %v1850_v26 }
 0xd82   :  { %v4715_v11 = vpop.eup %4714 }
 0xd83   :  { %v1865_v6 = vmul.f32 %v4715_v11, %v1851_v46  ;;  %v1870_v12 = vmul.f32 %v1869_v48, %v1864_v10 }
 0xd85   :  { %v1871_v15 = vmul.f32 %v1869_v48, %v1865_v6  ;;  %v5550_v16 = vadd.f32 %v1875_v14, %v1870_v12 }
 0xd87   :  { %v5552_v17 = vadd.f32 %v1875_v14, %v1871_v15 }
 0xd89   :  { %v2022_v21 = vpack.c.bf16 %v5552_v17, %v5550_v16 }
 0xd8b   :  { %2196 = vmatmul.mubr.bf16.vlgmr.msra.gmra.mrb[36].mxu1 %v2022_v21  ;;  %4274 = vmatmul.mubr.bf16.vlgmr.msra.gmra.mrb[24].mxu0 %v2022_v21 }
 0xd8c   :  { %4279 = vmatprep.mubr.msk.bf16.mxu1 %vm5042_vm0, %v5040_v4  ;;  %4303 = vmatprep.mubr.msk.bf16.mxu0 %vm5042_vm0, %v5040_v4 }
 0xe5e   :  { %v2197_v24 = vpop.f32.mrb[36].mxu1  ;;  %v2240_v25 = vpop.f32.mrb[24].mxu0 }
 0xe5f   :  { %v2199_v18 = vpop.f32.mrb[37].mxu1  ;;  %v4275_v33 = vpop.f32.mrb[25].mxu0  ;;  %v2198_v47 = vadd.f32 %v2197_v24, %v2026_v42  ;;  %v2241_v55 = vadd.f32 %v2240_v25, %v2034_v32 }
 0xe60   :  { %v2200_v34 = vadd.f32 %v2199_v18, %v2030_v23  ;;  %v2201_v37 = vpop.f32.mrb[38].mxu1  ;;  %v2243_v45 = vpop.f32.mrb[26].mxu0 }
 0xe61   :  { %v5565_v59 = vadd.f32 %v2243_v45, %v2034_v32  ;;  %v2203_v41 = vpop.f32.mrb[39].mxu1  ;;  %v4276_v49 = vpop.f32.mrb[27].mxu0  ;;  %v2247_v52 = vpack.c.bf16 %v2198_v47, %v2198_v47  ;;  %v2202_v56 = vadd.f32 %v2201_v37, %v2026_v42  ;;  %v5575_v54 = vpack.c.bf16 %v2241_v55, %v2241_v55 }
 0xe62   :  { %v2249_v26 = vpack.c.bf16 %v2200_v34, %v2200_v34  ;;  %v2204_v46 = vadd.f32 %v2203_v41, %v2030_v23 }
 0xe63   :  { %v2248_v57 = vpack.c.bf16 %v2202_v56, %v2202_v56  ;;  %v2373_v58 = vsel %vm769_vm2, %v5575_v54, 0  ;;  %v5597_v22 = vpack.c.bf16 %v5565_v59, %v5565_v59 }
 0xe64   :  { %v2255_v20 = vsel %vm646_vm1, %v2249_v26, 0  ;;  %v2250_v51 = vpack.c.bf16 %v2204_v46, %v2204_v46 }
 0xe65   :  { %4278 = vmatpush3.bf16.xpose.msra.mxu1 %v2255_v20  ;;  %v2419_v32 = vsel %vm769_vm2, %v5597_v22, 0 }
 0xe66   :  { %4283 = vmatprep.subr.bf16.mxu1 %v5040_v4  ;;  %v2301_v53 = vsel %vm646_vm1, %v2250_v51, 0 }
 0xe6c   :  { %4280 = vmatmul.mubr.msk.bf16.vlgmr.msra.gmra.mrb[40].mxu1 %vm646_vm1, %v2247_v52 }
 0xe6d   :  { %4284 = vmatpush3.bf16.xpose.msra.mxu1 %v2301_v53  ;;  %4285 = vmatprep.mubr.msk.bf16.mxu1 %vm5042_vm0, %v5040_v4 }
 0xe6e   :  { %4289 = vmatprep.subr.bf16.mxu1 %v5040_v4 }
 0xe74   :  { %4286 = vmatmul.mubr.msk.bf16.vlgmr.msra.gmra.mrb[44].mxu1 %vm646_vm1, %v2248_v57 }
 0xe75   :  { %4290 = vmatpush3.bf16.msra.mxu1 %v2373_v58  ;;  %4291 = vmatprep.mubr.msk.bf16.mxu1 %vm5042_vm0, %v5040_v4 }
 0xe76   :  { %4295 = vmatprep.subr.bf16.mxu1 %v5040_v4 }
 0xf3f   :  { %v2291_v60 = vpop.f32.mrb[40].mxu1 }
 0xf40   :  { %v2292_v61 = vadd.f32 %v2291_v60, %v5381_v28  ;;  %v4281_v62 = vpop.f32.mrb[41].mxu1 }
 0xf41   :  { %v2294_v63 = vpop.f32.mrb[42].mxu1 }
 0xf42   :  { %v4282_v0 = vpop.f32.mrb[43].mxu1  ;;  %v2343_v29 = vsel %vm739_vm3, %v2292_v61, -inf }
 0xf43   :  { %2344 = vmax.xlane.f32.xlu1 %v2343_v29 }
 0xf47   :  { %v2337_v39 = vpop.f32.mrb[44].mxu1 }
 0xf48   :  { %v2338_v1 = vadd.f32 %v2337_v39, %v5386_v38  ;;  %v4287_v31 = vpop.f32.mrb[45].mxu1 }
 0xf49   :  { %v2340_v40 = vpop.f32.mrb[46].mxu1 }
 0xf4a   :  { %v4288_v19 = vpop.f32.mrb[47].mxu1  ;;  %v2346_v2 = vsel %vm739_vm3, %v2338_v1, -inf }
 0xf4b   :  { %2347 = vmax.xlane.f32.xlu0 %v2346_v2 }
 0xfd0   :  { %v2345_v3 = vpop.xlane.xlu1 %2344 }
 0xfd1   :  { %v2349_v35 = vsub.f32 %v2292_v61, %v2345_v3 }
 0xfd3   :  { %v2351_v5 = vmul.f32 1.442695, %v2349_v35 }
 0xfd5   :  { %4716 = vpow2.f32 %v2351_v5 }
 0xfd8   :  { %v2348_v7 = vpop.xlane.xlu0 %2347 }
 0xfd9   :  { %v2350_v8 = vsub.f32 %v2338_v1, %v2348_v7 }
 0xfdb   :  { %v2353_v9 = vmul.f32 1.442695, %v2350_v8 }
 0xfdd   :  { %4718 = vpow2.f32 %v2353_v9 }
 0xfdf   :  { %v4717_v48 = vpop.eup %4716 }
 0xfe0   :  { %v2355_v50 = vsel %vm739_vm3, %v4717_v48, 0.0 }
 0xfe1   :  { %2356 = vadd.xlane.f32.xlu1 %v2355_v50 }
 0xfe7   :  { %v4719_v10 = vpop.eup %4718 }
 0xfe8   :  { %v2358_v11 = vsel %vm739_vm3, %v4719_v10, 0.0 }
 0xfe9   :  { %2359 = vadd.xlane.f32.xlu0 %v2358_v11 }
 0xff2   :  { %2465 = vrot.lane.b32.xlu1 %v2249_v26, %s5029_s3 }
 0xff6   :  { %2462 = vrot.lane.b32.xlu1 %v2247_v52, %s5029_s3 }
 0xffa   :  { %2514 = vrot.lane.b32.xlu1 %v2248_v57, %s5029_s3 }
 0xfff   :  { %2517 = vrot.lane.b32.xlu0 %v2250_v51, %s5029_s3 }
0x106e   :  { %v2357_v6 = vpop.xlane.xlu1 %2356 }
0x106f   :  { %4720 = vrcp.f32 %v2357_v6 }
0x1072   :  { %v2466_v12 = vpop.permute.xlu1 %2465 }
0x1073   :  { %v2471_v14 = vsel %vm646_vm1, %v2466_v12, 0 }
0x1074   :  { %4302 = vmatpush3.bf16.xpose.msra.mxu0 %v2471_v14 }
0x1075   :  { %4313 = vmatprep.subr.bf16.mxu0 %v5040_v4 }
0x1076   :  { %v2360_v15 = vpop.xlane.xlu0 %2359  ;;  %v2463_v24 = vpop.permute.xlu1 %2462 }
0x1077   :  { %4722 = vrcp.f32 %v2360_v15  ;;  %v4552_v15 = vld [vmem:[#allocation12] sm:$0xff]  }
0x1079   :  { %v4721_v21 = vpop.eup %4720 }
0x107a   :  { %v2363_v23 = vmul.f32 %v4721_v21, %v4717_v48  ;;  %v2518_v34 = vpop.permute.xlu0 %2517  ;;  %v2515_v59 = vpop.permute.xlu1 %2514  ;;  %v4553_v21 = vld [vmem:[#allocation12 + $0x8] sm:$0xff]  }
0x107b   :  { %4304 = vmatmul.mubr.msk.bf16.vlgmr.msra.gmra.mrb[28].mxu0 %vm646_vm1, %v2463_v24  ;;  %v2523_v45 = vsel %vm646_vm1, %v2518_v34, 0  ;;  %v4556_v24 = vld [vmem:[#allocation12 + $0x20] sm:$0xff]  }
0x107c   :  { %v2365_v25 = vpack.c.bf16 %v2363_v23, %v2363_v23  ;;  %4315 = vmatprep.mubr.msk.bf16.mxu0 %vm5042_vm0, %v5040_v4  ;;  %v4555_v23 = vld [vmem:[#allocation12 + $0x18] sm:$0xff]  }
0x107e   :  { %4292 = vmatmul.mubr.msk.bf16.vlgmr.msra.gmra.mrb[48].mxu1 %vm739_vm3, %v2365_v25  ;;  %v4557_v25 = vld [vmem:[#allocation12 + $0x28] sm:$0xff]  }
0x107f   :  { %4296 = vmatpush3.bf16.msra.mxu1 %v2419_v32  ;;  %4297 = vmatprep.mubr.msk.bf16.mxu1 %vm5042_vm0, %v5040_v4  ;;  %v4558_v32 = vld [vmem:[#allocation12 + $0x30] sm:$0xff]  }
0x1080   :  { %4307 = vmatprep.subr.bf16.mxu1 %v5040_v4 }
0x1081   :  { %v4723_v18 = vpop.eup %4722 }
0x1082   :  { %v2364_v33 = vmul.f32 %v4723_v18, %v4719_v10 }
0x1084   :  { %v2366_v37 = vpack.c.bf16 %v2364_v33, %v2364_v33 }
0x1086   :  { %4298 = vmatmul.mubr.msk.bf16.vlgmr.msra.gmra.mrb[52].mxu1 %vm739_vm3, %v2366_v37 }
0x1087   :  { %4309 = vmatprep.mubr.msk.bf16.mxu1 %vm5042_vm0, %v5040_v4 }
0x1088   :  { %4308 = vmatpush3.bf16.xpose.msra.mxu1 %v2523_v45  ;;  %v4559_v45 = vld [vmem:[#allocation12 + $0x38] sm:$0xff]  }
0x1089   :  { %4319 = vmatprep.subr.bf16.mxu1 %v5040_v4 }
0x108f   :  { %4310 = vmatmul.mubr.msk.bf16.vlgmr.msra.gmra.mrb[56].mxu1 %vm646_vm1, %v2515_v59 }
0x1090   :  { %4321 = vmatprep.mubr.msk.bf16.mxu1 %vm5042_vm0, %v5040_v4 }
0x114e   :  { %v2507_v41 = vpop.f32.mrb[28].mxu0 }
0x114f   :  { %v2508_v49 = vadd.f32 %v2507_v41, %v5381_v28  ;;  %v4305_v42 = vpop.f32.mrb[29].mxu0 }
0x1150   :  { %v2510_v26 = vpop.f32.mrb[30].mxu0 }
0x1151   :  { %v5617_v20 = vpop.f32.mrb[48].mxu1  ;;  %v4306_v46 = vpop.f32.mrb[31].mxu0  ;;  %v2565_v47 = vsel %vm739_vm3, %v2508_v49, -inf }
0x1152   :  { %2566 = vmax.xlane.f32.xlu1 %v2565_v47  ;;  %v4293_v51 = vpop.f32.mrb[49].mxu1 }
0x1153   :  { %v2412_v52 = vpop.f32.mrb[50].mxu1 }
0x1154   :  { %v4294_v55 = vpop.f32.mrb[51].mxu1 }
0x1159   :  { %v5620_v53 = vpop.f32.mrb[52].mxu1 }
0x115a   :  { %v4299_v56 = vpop.f32.mrb[53].mxu1 }
0x115b   :  { %v2458_v57 = vpop.f32.mrb[54].mxu1 }
0x115c   :  { %v4300_v58 = vpop.f32.mrb[55].mxu1  ;;  %v5652_v57 = vsub.s32 7, %v5328_v43 }
0x115e   :  { %v2701_v58 = vrot.slane %v5544_v36, %v5652_v57  ;;  %v4566_v36 = vld [vmem:[#allocation13 + $0x20] ss:$16 sps:$4 sm:$0xff]  }
0x1162   :  { %v2559_v60 = vpop.f32.mrb[56].mxu1 }
0x1163   :  { %v2560_v61 = vadd.f32 %v2559_v60, %v5386_v38  ;;  %v4311_v28 = vpop.f32.mrb[57].mxu1  ;;  %2590 = vrot.lane.b32.xlu1 %v5575_v54, %s5029_s3 }
0x1164   :  { %v2562_v62 = vpop.f32.mrb[58].mxu1 }
0x1165   :  { %v4312_v63 = vpop.f32.mrb[59].mxu1  ;;  %v2568_v0 = vsel %vm739_vm3, %v2560_v61, -inf }
0x1166   :  { %2569 = vmax.xlane.f32.xlu0 %v2568_v0 }
0x11df   :  { %v2567_v29 = vpop.xlane.xlu1 %2566 }
0x11e0   :  { %v2571_v39 = vsub.f32 %v2508_v49, %v2567_v29  ;;  %v4560_v29 = vld [vmem:[#allocation13] ss:$16 sps:$4 sm:$0xff]  }
0x11e2   :  { %v2573_v1 = vmul.f32 1.442695, %v2571_v39  ;;  %v4562_v39 = vld [vmem:[#allocation13 + $0x4] ss:$16 sps:$4 sm:$0xff]  }
0x11e3   :  { %v2591_v31 = vpop.permute.xlu1 %2590 }
0x11e4   :  { %4724 = vpow2.f32 %v2573_v1  ;;  %v2596_v40 = vsel %vm769_vm2, %v2591_v31, 0  ;;  %v4563_v1 = vld [vmem:[#allocation13 + $0x8] ss:$16 sps:$4 sm:$0xff]   ;;  %v4565_v31 = vld [vmem:[#allocation13 + $0xc] ss:$16 sps:$4 sm:$0xff]  }
0x11e5   :  { %4314 = vmatpush3.bf16.msra.mxu0 %v2596_v40  ;;  %v4568_v40 = vld [vmem:[#allocation13 + $0x24] ss:$16 sps:$4 sm:$0xff]  }
0x11e6   :  { %4325 = vmatprep.subr.bf16.mxu0 %v5040_v4 }
0x11ee   :  { %v4725_v38 = vpop.eup %4724 }
0x11ef   :  { %v2577_v19 = vsel %vm739_vm3, %v4725_v38, 0.0 }
0x11f0   :  { %2578 = vadd.xlane.f32.xlu0 %v2577_v19  ;;  %v4569_v19 = vld [vmem:[#allocation13 + $0x28] ss:$16 sps:$4 sm:$0xff]  }
0x11f3   :  { %v2570_v54 = vpop.xlane.xlu0 %2569 }
0x11f4   :  { %v2572_v2 = vsub.f32 %v2560_v61, %v2570_v54 }
0x11f6   :  { %v2575_v3 = vmul.f32 1.442695, %v2572_v2 }
0x11f8   :  { %4726 = vpow2.f32 %v2575_v3 }
0x1202   :  { %v4727_v35 = vpop.eup %4726 }
0x1203   :  { %v2580_v5 = vsel %vm739_vm3, %v4727_v35, 0.0 }
0x1204   :  { %2581 = vadd.xlane.f32.xlu0 %v2580_v5 }
0x121a   :  { %2639 = vrot.lane.b32.xlu0 %v5597_v22, %s5029_s3  ;;  %v4554_v22 = vld [vmem:[#allocation12 + $0x10] sm:$0xff]  }
0x127d   :  { %v2579_v7 = vpop.xlane.xlu0 %2578 }
0x127e   :  { %4728 = vrcp.f32 %v2579_v7 }
0x1288   :  { %v4729_v8 = vpop.eup %4728 }
0x1289   :  { %v2585_v9 = vmul.f32 %v4729_v8, %v4725_v38  ;;  %v4571_v38 = vld [vmem:[#allocation13 + $0x2c] ss:$16 sps:$4 sm:$0xff]   ;;  %v4574_v8 = vld [vmem:[#allocation13 + $0x44] ss:$16 sps:$4 sm:$0xff]  }
0x128b   :  { %v2587_v48 = vpack.c.bf16 %v2585_v9, %v2585_v9  ;;  %v4577_v9 = vld [vmem:[#allocation13 + $0x4c] ss:$16 sps:$4 sm:$0xff]  }
0x128d   :  { %4316 = vmatmul.mubr.msk.bf16.vlgmr.msra.gmra.mrb[32].mxu0 %vm739_vm3, %v2587_v48  ;;  %v4572_v48 = vld [vmem:[#allocation13 + $0x40] ss:$16 sps:$4 sm:$0xff]  }
0x128e   :  { %4341 = vmatprep.mubr.msk.bf16.mxu0 %vm5042_vm0, %v5040_v4  ;;  %4326 = vmatpush3.bf16.msra.mxu0 %v4552_v15  ;;  %v4586_v15 = vld [vmem:[#allocation13 + $0x84] ss:$16 sps:$4 sm:$0xff]  }
0x128f   :  { %4327 = vmatprep.subr.bf16.mxu0 %v5040_v4 }
0x1291   :  { %v2582_v50 = vpop.xlane.xlu0 %2581 }
0x1292   :  { %4730 = vrcp.f32 %v2582_v50  ;;  %4328 = vmatpush3.bf16.msra.mxu0 %v4553_v21  ;;  %v4575_v50 = vld [vmem:[#allocation13 + $0x48] ss:$16 sps:$4 sm:$0xff]  }
0x1293   :  { %4329 = vmatprep.subr.bf16.mxu0 %v5040_v4  ;;  %v4587_v21 = vld [vmem:[#allocation13 + $0x88] ss:$16 sps:$4 sm:$0xff]  }
0x1295   :  { %v2640_v10 = vpop.permute.xlu0 %2639 }
0x1296   :  { %v2645_v11 = vsel %vm769_vm2, %v2640_v10, 0  ;;  %4330 = vmatpush3.bf16.msra.mxu0 %v4554_v22  ;;  %v4580_v10 = vld [vmem:[#allocation13 + $0x64] ss:$16 sps:$4 sm:$0xff]   ;;  %v4589_v22 = vld [vmem:[#allocation13 + $0x8c] ss:$16 sps:$4 sm:$0xff]  }
0x1297   :  { %4320 = vmatpush3.bf16.msra.mxu1 %v2645_v11  ;;  %4331 = vmatprep.subr.bf16.mxu0 %v5040_v4  ;;  %v4583_v11 = vld [vmem:[#allocation13 + $0x6c] ss:$16 sps:$4 sm:$0xff]  }
0x1298   :  { %3004 = vmatprep.subr.bf16.mxu1 %v4562_v39  ;;  %v4610_v39 = vld [vmem:[#allocation15] sm:$0xff]  }
0x129a   :  { %4332 = vmatpush3.bf16.msra.mxu0 %v4555_v23  ;;  %v4592_v23 = vld [vmem:[#allocation13 + $0xa4] ss:$16 sps:$4 sm:$0xff]  }
0x129b   :  { %4333 = vmatprep.subr.bf16.mxu0 %v5040_v4 }
0x129c   :  { %v4731_v6 = vpop.eup %4730 }
0x129d   :  { %v2586_v12 = vmul.f32 %v4731_v6, %v4727_v35  ;;  %v4578_v6 = vld [vmem:[#allocation13 + $0x60] ss:$16 sps:$4 sm:$0xff]  }
0x129e   :  { %4334 = vmatpush3.bf16.msra.mxu0 %v4556_v24  ;;  %v4595_v24 = vld [vmem:[#allocation13 + $0xac] ss:$16 sps:$4 sm:$0xff]  }
0x129f   :  { %v2588_v14 = vpack.c.bf16 %v2586_v12, %v2586_v12  ;;  %4335 = vmatprep.subr.bf16.mxu0 %v5040_v4  ;;  %v4581_v12 = vld [vmem:[#allocation13 + $0x68] ss:$16 sps:$4 sm:$0xff]  }
0x12a1   :  { %4322 = vmatmul.mubr.msk.bf16.vlgmr.msra.gmra.mrb[60].mxu1 %vm739_vm3, %v2588_v14  ;;  %v4584_v14 = vld [vmem:[#allocation13 + $0x80] ss:$16 sps:$4 sm:$0xff]  }
0x12a2   :  { %3036 = vmatprep.mubr.bf16.mxu1 %v5041_v30  ;;  %4336 = vmatpush3.bf16.msra.mxu0 %v4557_v25  ;;  %v4590_v25 = vld [vmem:[#allocation13 + $0xa0] ss:$16 sps:$4 sm:$0xff]  }
0x12a3   :  { %4337 = vmatprep.subr.bf16.mxu0 %v5040_v4  ;;  %3005 = vmatpush1.bf16.msra.mxu1 %v4560_v29  ;;  %v4609_v29 = vld [vmem:[#allocation15 + $0xc0] sm:$0xff]  }
0x12a4   :  { %3006 = vmatprep.subr.bf16.mxu1 %v4568_v40  ;;  %v4614_v40 = vld [vmem:[#allocation15 + $0x8] sm:$0xff]  }
0x12a6   :  { %4338 = vmatpush3.bf16.msra.mxu0 %v4558_v32  ;;  %v4593_v32 = vld [vmem:[#allocation13 + $0xa8] ss:$16 sps:$4 sm:$0xff]  }
0x12a7   :  { %4339 = vmatprep.subr.bf16.mxu0 %v5040_v4  ;;  %3007 = vmatpush1.bf16.msra.mxu1 %v4566_v36  ;;  %v4616_v36 = vld [vmem:[#allocation15 + $0x50] sm:$0xff]  }
0x12a8   :  { %3008 = vmatprep.subr.bf16.mxu1 %v4574_v8  ;;  %v4626_v8 = vld [vmem:[#allocation15 + $0x20] sm:$0xff]  }
0x12aa   :  { %4340 = vmatpush3.bf16.msra.mxu0 %v4559_v45  ;;  %v4604_v45 = vld [vmem:[#allocation13 + $0xe4] ss:$16 sps:$4 sm:$0xff]  }
0x12ab   :  { %3047 = vmatprep.subr.bf16.mxu0 %v4565_v31  ;;  %3009 = vmatpush1.bf16.msra.mxu1 %v4572_v48  ;;  %v4612_v31 = vld [vmem:[#allocation15 + $0x48] sm:$0xff]  }
0x12ac   :  { %3010 = vmatprep.subr.bf16.mxu1 %v4580_v10  ;;  %v4628_v48 = vld [vmem:[#allocation15 + $0x68] sm:$0xff]  }
0x12ad   :  { %v4630_v10 = vld [vmem:[#allocation15 + $0x28] sm:$0xff]  }
0x12af   :  { %3011 = vmatpush1.bf16.msra.mxu1 %v4578_v6  ;;  %v4632_v6 = vld [vmem:[#allocation15 + $0x70] sm:$0xff]  }
0x12b0   :  { %3012 = vmatprep.subr.bf16.mxu1 %v4586_v15  ;;  %v4635_v15 = vld [vmem:[#allocation15 + $0xb0] sm:$0xff]  }
0x12b3   :  { %3013 = vmatpush1.bf16.msra.mxu1 %v4584_v14  ;;  %v4634_v14 = vld [vmem:[#allocation15 + $0x30] sm:$0xff]  }
0x12b4   :  { %3014 = vmatprep.subr.bf16.mxu1 %v4592_v23  ;;  %v4638_v23 = vld [vmem:[#allocation15 + $0x38] sm:$0xff]  }
0x12b7   :  { %3015 = vmatpush1.bf16.msra.mxu1 %v4590_v25  ;;  %v5679_v25 = vld [vmem:[#allocation2 + $0x20] sm:$0x3] }
0x1360   :  { %v2632_v18 = vpop.f32.mrb[32].mxu0 }
0x1361   :  { %v4317_v33 = vpop.f32.mrb[33].mxu0 }
0x1362   :  { %v2635_v34 = vpop.f32.mrb[34].mxu0  ;;  %v4601_v33 = vld [vmem:[#allocation13 + $0xcc] ss:$16 sps:$4 sm:$0xff]  }
0x1363   :  { %v4318_v37 = vpop.f32.mrb[35].mxu0  ;;  %v4596_v34 = vld [vmem:[#allocation13 + $0xc0] ss:$16 sps:$4 sm:$0xff]  }
0x1364   :  { %v4599_v37 = vld [vmem:[#allocation13 + $0xc8] ss:$16 sps:$4 sm:$0xff]  }
0x1374   :  { %v2681_v59 = vpop.f32.mrb[60].mxu1 }
0x1375   :  { %v4395_v41 = vpack.i.bf16 %v2681_v59, %v2632_v18  ;;  %v4323_v49 = vpop.f32.mrb[61].mxu1  ;;  %v4598_v18 = vld [vmem:[#allocation13 + $0xc4] ss:$16 sps:$4 sm:$0xff]   ;;  %v4607_v59 = vld [vmem:[#allocation13 + $0xec] ss:$16 sps:$4 sm:$0xff]  }
0x1376   :  { %v2684_v42 = vpop.f32.mrb[62].mxu1  ;;  %3016 = vmatprep.subr.bf16.mxu1 %v4598_v18  ;;  %v4605_v49 = vld [vmem:[#allocation13 + $0xe8] ss:$16 sps:$4 sm:$0xff]  }
0x1377   :  { %4396 = vrot.lane.b32.xlu1 %v4395_v41, %s5029_s3  ;;  %v4324_v26 = vpop.f32.mrb[63].mxu1  ;;  %3017 = vmatpush1.bf16.msra.mxu1 %v4596_v34  ;;  %v4602_v41 = vld [vmem:[#allocation13 + $0xe0] ss:$16 sps:$4 sm:$0xff]   ;;  %v5681_v18 = vld [vmem:[#allocation2 + $0x28] sm:$0x3]  ;;  %v2831_v34 = vrot.slane %v5679_v25, %v5331_v44 }
0x1378   :  { %3018 = vmatprep.subr.bf16.mxu1 %v4604_v45  ;;  %v2835_v45 = vrot.slane %v5681_v18, %v5331_v44 }
0x137b   :  { %3019 = vmatpush1.bf16.msra.mxu1 %v4602_v41 }
0x13e9   :  { %v4397_v46 = vpop.permute.xlu1 %4396 }
0x13ea   :  { %v4399_v47 = vunpack.i.h.bf16 %v4397_v46  ;;  %v4398_v51 = vunpack.i.l.bf16 %v4397_v46 }
0x13ec   :  { %v2696_v52 = vsel %vm646_vm1, %v5620_v53, %v4399_v47  ;;  %v2695_v55 = vsel %vm646_vm1, %v5617_v20, %v4398_v51 }
0x13ed   :  { %v2697_v56 = vpack.c.bf16 %v2696_v52, %v2695_v55  ;;  %v2818_v55 = vrot.slane %v5547_v13, %v5652_v57  ;;  %v4608_v13 = vld [vmem:[#allocation15 + $0x40] sm:$0xff]  }
0x13ee   :  { %4116 = vmatprep.subr.bf16.mxu1 %v4608_v13 }
0x13ef   :  { %4342 = vmatmul.mubr.bf16.vlgmr.msra.gmra.mrb[36].mxu0 %v2697_v56 }
0x13f0   :  { %3079 = vmatprep.mubr.bf16.mxu0 %v5041_v30  ;;  %3048 = vmatpush1.bf16.msra.mxu0 %v4563_v1  ;;  %v4611_v1 = vld [vmem:[#allocation15 + $0x80] sm:$0xff]  }
0x13f1   :  { %3049 = vmatprep.subr.bf16.mxu0 %v4571_v38  ;;  %v4615_v38 = vld [vmem:[#allocation15 + $0x88] sm:$0xff]  }
0x13f4   :  { %3050 = vmatpush1.bf16.msra.mxu0 %v4569_v19  ;;  %v4617_v19 = vld [vmem:[#allocation15 + $0xd0] sm:$0xff]  }
0x13f5   :  { %3051 = vmatprep.subr.bf16.mxu0 %v4577_v9  ;;  %v4627_v9 = vld [vmem:[#allocation15 + $0xa0] sm:$0xff]  }
0x13f8   :  { %3052 = vmatpush1.bf16.msra.mxu0 %v4575_v50  ;;  %v4629_v50 = vld [vmem:[#allocation15 + $0xe8] sm:$0xff]  }
0x13f9   :  { %3053 = vmatprep.subr.bf16.mxu0 %v4583_v11  ;;  %v4631_v11 = vld [vmem:[#allocation15 + $0xa8] sm:$0xff]  }
0x13fc   :  { %3054 = vmatpush1.bf16.msra.mxu0 %v4581_v12  ;;  %v4633_v12 = vld [vmem:[#allocation15 + $0xf0] sm:$0xff]  }
0x13fd   :  { %3055 = vmatprep.subr.bf16.mxu0 %v4589_v22  ;;  %v4637_v22 = vld [vmem:[#allocation15 + $0xf8] sm:$0xff]  }
0x1400   :  { %3056 = vmatpush1.bf16.msra.mxu0 %v4587_v21  ;;  %v4636_v21 = vld [vmem:[#allocation15 + $0x78] sm:$0xff]  }
0x1401   :  { %3057 = vmatprep.subr.bf16.mxu0 %v4595_v24  ;;  %v4639_v24 = vld [vmem:[#allocation15 + $0xb8] sm:$0xff]  }
0x1404   :  { %3058 = vmatpush1.bf16.msra.mxu0 %v4593_v32  ;;  %v200_v32 = vld [vmem:[#allocation2 + $0x30] sm:$0x3] }
0x1405   :  { %3059 = vmatprep.subr.bf16.mxu0 %v4601_v33  ;;  %v201_v33 = vld [vmem:[#allocation2 + $0x38] sm:$0x3] }
0x1408   :  { %3060 = vmatpush1.bf16.msra.mxu0 %v4599_v37  ;;  %v2839_v37 = vrot.slane %v200_v32, %v5331_v44 }
0x1409   :  { %3061 = vmatprep.subr.bf16.mxu0 %v4607_v59  ;;  %v2843_v59 = vrot.slane %v201_v33, %v5331_v44 }
0x140c   :  { %3062 = vmatpush1.bf16.msra.mxu0 %v4605_v49 }
0x140d   :  { %4138 = vmatprep.subr.bf16.mxu0 %v4609_v29 }
0x14c2   :  { %v2784_v60 = vpop.f32.mrb[36].mxu0 }
0x14c3   :  { %v2785_v61 = vadd.f32 %v2784_v60, %v2701_v58  ;;  %v4343_v28 = vpop.f32.mrb[37].mxu0 }
0x14c4   :  { %v2787_v62 = vpop.f32.mrb[38].mxu0 }
0x14c5   :  { %v2788_v63 = vadd.f32 %v2787_v62, %v2701_v58  ;;  %v4344_v0 = vpop.f32.mrb[39].mxu0  ;;  %v2791_v53 = vadd.f32 %v2785_v61, %v5550_v16  ;;  %v2824_v62 = vrot.slane %v5562_v27, %v5652_v57  ;;  %v4613_v27 = vld [vmem:[#allocation15 + $0xc8] sm:$0xff]  }
0x14c7   :  { %2793 = vadd.xlane.f32.xlu1 %v2791_v53  ;;  %v2792_v20 = vadd.f32 %v2788_v63, %v5552_v17 }
0x14c9   :  { %2795 = vadd.xlane.f32.xlu0 %v2792_v20 }
0x1554   :  { %v2794_v16 = vpop.xlane.xlu1 %2793 }
0x1555   :  { %v2797_v54 = vmul.f32 0.0078125, %v2794_v16  ;;  %v4618_v16 = vld [vmem:[#allocation15 + $0x10] sm:$0xff]  }
0x1556   :  { %v2796_v17 = vpop.xlane.xlu0 %2795 }
0x1557   :  { %v5658_v2 = vsub.f32 %v2791_v53, %v2797_v54  ;;  %v2798_v3 = vmul.f32 0.0078125, %v2796_v17  ;;  %v4619_v54 = vld [vmem:[#allocation15 + $0x90] sm:$0xff]   ;;  %v4620_v17 = vld [vmem:[#allocation15 + $0x58] sm:$0xff]  }
0x1559   :  { %v5660_v35 = vsub.f32 %v2792_v20, %v2798_v3  ;;  %v2801_v5 = vmul.f32 %v5658_v2, %v5658_v2  ;;  %v4622_v3 = vld [vmem:[#allocation15 + $0x18] sm:$0xff]  }
0x155b   :  { %2803 = vadd.xlane.f32.xlu0 %v2801_v5  ;;  %v2802_v7 = vmul.f32 %v5660_v35, %v5660_v35  ;;  %v4624_v5 = vld [vmem:[#allocation15 + $0x60] sm:$0xff]  }
0x155d   :  { %2805 = vadd.xlane.f32.xlu1 %v2802_v7  ;;  %v4625_v7 = vld [vmem:[#allocation15 + $0xe0] sm:$0xff]  }
0x15e8   :  { %v2804_v42 = vpop.xlane.xlu0 %2803 }
0x15e9   :  { %v2807_v26 = vmul.f32 0.0078125, %v2804_v42 }
0x15ea   :  { %v2806_v46 = vpop.xlane.xlu1 %2805 }
0x15eb   :  { %v2809_v47 = vadd.f32 1e-12, %v2807_v26  ;;  %v2808_v51 = vmul.f32 0.0078125, %v2806_v46 }
0x15ed   :  { %4732 = vrsqrt.f32 %v2809_v47  ;;  %v2810_v52 = vadd.f32 1e-12, %v2808_v51 }
0x15ef   :  { %4734 = vrsqrt.f32 %v2810_v52 }
0x15f7   :  { %v4733_v56 = vpop.eup %4732 }
0x15f8   :  { %v2813_v58 = vmul.f32 %v4733_v56, %v5658_v2  ;;  %v4621_v2 = vld [vmem:[#allocation15 + $0xd8] sm:$0xff]  }
0x15f9   :  { %v4735_v60 = vpop.eup %4734 }
0x15fa   :  { %v2814_v61 = vmul.f32 %v4735_v60, %v5660_v35  ;;  %v2819_v28 = vmul.f32 %v2818_v55, %v2813_v58  ;;  %v4623_v35 = vld [vmem:[#allocation15 + $0x98] sm:$0xff]  }
0x15fc   :  { %v2820_v63 = vmul.f32 %v2818_v55, %v2814_v61  ;;  %v5672_v0 = vadd.f32 %v2824_v62, %v2819_v28 }
0x15fe   :  { %v5674_v53 = vadd.f32 %v2824_v62, %v2820_v63 }
0x1600   :  { %v2827_v20 = vpack.c.bf16 %v5674_v53, %v5672_v0 }
0x1602   :  { %3037 = vmatmul.mubr.bf16.vlgmr.msra.gmra.mrb[64].mxu1 %v2827_v20  ;;  %3080 = vmatmul.mubr.bf16.vlgmr.msra.gmra.mrb[40].mxu0 %v2827_v20 }
0x1603   :  { %4117 = vmatpush3.bf16.msra.mxu1 %v4610_v39  ;;  %4139 = vmatpush3.bf16.msra.mxu0 %v4611_v1 }
0x1604   :  { %4118 = vmatprep.subr.bf16.mxu1 %v4612_v31  ;;  %4140 = vmatprep.subr.bf16.mxu0 %v4613_v27 }
0x1607   :  { %4119 = vmatpush3.bf16.msra.mxu1 %v4614_v40  ;;  %4141 = vmatpush3.bf16.msra.mxu0 %v4615_v38 }
0x1608   :  { %4120 = vmatprep.subr.bf16.mxu1 %v4616_v36  ;;  %4142 = vmatprep.subr.bf16.mxu0 %v4617_v19 }
0x160b   :  { %4121 = vmatpush3.bf16.msra.mxu1 %v4618_v16  ;;  %4143 = vmatpush3.bf16.msra.mxu0 %v4619_v54 }
0x160c   :  { %4122 = vmatprep.subr.bf16.mxu1 %v4620_v17  ;;  %4144 = vmatprep.subr.bf16.mxu0 %v4621_v2 }
0x160f   :  { %4123 = vmatpush3.bf16.msra.mxu1 %v4622_v3  ;;  %4145 = vmatpush3.bf16.msra.mxu0 %v4623_v35 }
0x1610   :  { %4124 = vmatprep.subr.bf16.mxu1 %v4624_v5  ;;  %4146 = vmatprep.subr.bf16.mxu0 %v4625_v7 }
0x1613   :  { %4125 = vmatpush3.bf16.msra.mxu1 %v4626_v8  ;;  %4147 = vmatpush3.bf16.msra.mxu0 %v4627_v9 }
0x1614   :  { %4126 = vmatprep.subr.bf16.mxu1 %v4628_v48  ;;  %4148 = vmatprep.subr.bf16.mxu0 %v4629_v50 }
0x1617   :  { %4127 = vmatpush3.bf16.msra.mxu1 %v4630_v10  ;;  %4149 = vmatpush3.bf16.msra.mxu0 %v4631_v11 }
0x1618   :  { %4128 = vmatprep.subr.bf16.mxu1 %v4632_v6  ;;  %4150 = vmatprep.subr.bf16.mxu0 %v4633_v12 }
0x161b   :  { %4129 = vmatpush3.bf16.msra.mxu1 %v4634_v14  ;;  %4151 = vmatpush3.bf16.msra.mxu0 %v4635_v15 }
0x161c   :  { %4130 = vmatprep.subr.bf16.mxu1 %v4636_v21  ;;  %4152 = vmatprep.subr.bf16.mxu0 %v4637_v22 }
0x161f   :  { %4131 = vmatpush3.bf16.msra.mxu1 %v4638_v23  ;;  %4153 = vmatpush3.bf16.msra.mxu0 %v4639_v24 }
0x1620   :  { %4345 = vmatprep.subr.bf16.mxu1 %v5040_v4 }
0x16d5   :  { %v3038_v41 = vpop.f32.mrb[64].mxu1  ;;  %v3081_v49 = vpop.f32.mrb[40].mxu0 }
0x16d6   :  { %v5689_v42 = vadd.f32 %v3038_v41, %v2831_v34  ;;  %v5691_v26 = vadd.f32 %v3081_v49, %v2839_v37  ;;  %v3040_v46 = vpop.f32.mrb[65].mxu1  ;;  %v3083_v47 = vpop.f32.mrb[41].mxu0 }
0x16d7   :  { %v5693_v51 = vadd.f32 %v3040_v46, %v2835_v45  ;;  %v5695_v52 = vadd.f32 %v3083_v47, %v2843_v59  ;;  %v3042_v55 = vpop.f32.mrb[66].mxu1  ;;  %v3085_v56 = vpop.f32.mrb[42].mxu0 }
0x16d8   :  { %v3098_v58 = vmul.f32 0.044715, %v5689_v42  ;;  %v3100_v60 = vmul.f32 0.044715, %v5691_v26  ;;  %v3043_v61 = vadd.f32 %v3042_v55, %v2831_v34  ;;  %v3086_v28 = vadd.f32 %v3085_v56, %v2839_v37  ;;  %v3044_v62 = vpop.f32.mrb[67].mxu1  ;;  %v3087_v63 = vpop.f32.mrb[43].mxu0 }
0x16d9   :  { %v3099_v20 = vmul.f32 0.044715, %v5693_v51  ;;  %v3101_v13 = vmul.f32 0.044715, %v5695_v52  ;;  %v5701_v29 = vadd.f32 %v3044_v62, %v2835_v45  ;;  %v5703_v39 = vadd.f32 %v3087_v63, %v2843_v59 }
0x16da   :  { %v3106_v1 = vmul.f32 %v3098_v58, %v5689_v42  ;;  %v3108_v31 = vmul.f32 %v3100_v60, %v5691_v26  ;;  %v3102_v27 = vmul.f32 0.044715, %v3043_v61  ;;  %v3104_v40 = vmul.f32 0.044715, %v3086_v28 }
0x16db   :  { %v3107_v38 = vmul.f32 %v3099_v20, %v5693_v51  ;;  %v3109_v36 = vmul.f32 %v3101_v13, %v5695_v52  ;;  %v3103_v19 = vmul.f32 0.044715, %v5701_v29  ;;  %v3105_v16 = vmul.f32 0.044715, %v5703_v39 }
0x16dc   :  { %v3114_v54 = vmul.f32 %v3106_v1, %v5689_v42  ;;  %v3116_v17 = vmul.f32 %v3108_v31, %v5691_v26  ;;  %v3110_v2 = vmul.f32 %v3102_v27, %v3043_v61  ;;  %v3112_v3 = vmul.f32 %v3104_v40, %v3086_v28 }
0x16dd   :  { %v3115_v35 = vmul.f32 %v3107_v38, %v5693_v51  ;;  %v3117_v5 = vmul.f32 %v3109_v36, %v5695_v52  ;;  %v3111_v7 = vmul.f32 %v3103_v19, %v5701_v29  ;;  %v3113_v8 = vmul.f32 %v3105_v16, %v5703_v39 }
0x16de   :  { %v3122_v9 = vadd.f32 %v3114_v54, %v5689_v42  ;;  %v3124_v48 = vadd.f32 %v3116_v17, %v5691_v26  ;;  %v3118_v50 = vmul.f32 %v3110_v2, %v3043_v61  ;;  %v3120_v10 = vmul.f32 %v3112_v3, %v3086_v28 }
0x16df   :  { %v3119_v11 = vmul.f32 %v3111_v7, %v5701_v29  ;;  %v3121_v6 = vmul.f32 %v3113_v8, %v5703_v39  ;;  %v3123_v22 = vadd.f32 %v3115_v35, %v5693_v51  ;;  %v3125_v33 = vadd.f32 %v3117_v5, %v5695_v52 }
0x16e0   :  { %v3130_v12 = vmul.f32 0.7978846, %v3122_v9  ;;  %v3132_v14 = vmul.f32 0.7978846, %v3124_v48  ;;  %v3126_v15 = vadd.f32 %v3118_v50, %v3043_v61  ;;  %v3128_v21 = vadd.f32 %v3120_v10, %v3086_v28 }
0x16e1   :  { %v3127_v23 = vadd.f32 %v3119_v11, %v5701_v29  ;;  %v3131_v34 = vmul.f32 0.7978846, %v3123_v22  ;;  %v3129_v45 = vadd.f32 %v3121_v6, %v5703_v39  ;;  %v3133_v59 = vmul.f32 0.7978846, %v3125_v33 }
0x16e2   :  { %4736 = vtanh.f32 %v3130_v12  ;;  %v3134_v24 = vmul.f32 0.7978846, %v3126_v15  ;;  %v3136_v32 = vmul.f32 0.7978846, %v3128_v21  ;;  %v3090_v60 = vmul.f32 0.5, %v5689_v42 }
0x16e3   :  { %4738 = vtanh.f32 %v3132_v14  ;;  %v3135_v37 = vmul.f32 0.7978846, %v3127_v23  ;;  %v3137_v41 = vmul.f32 0.7978846, %v3129_v45  ;;  %v3094_v62 = vmul.f32 0.5, %v3043_v61 }
0x16e4   :  { %4740 = vtanh.f32 %v3134_v24  ;;  %v3092_v13 = vmul.f32 0.5, %v5691_v26  ;;  %v3096_v1 = vmul.f32 0.5, %v3086_v28  ;;  %v3091_v40 = vmul.f32 0.5, %v5693_v51 }
0x16e5   :  { %4742 = vtanh.f32 %v3136_v32  ;;  %v3095_v54 = vmul.f32 0.5, %v5701_v29  ;;  %v3093_v61 = vmul.f32 0.5, %v5695_v52  ;;  %v3097_v35 = vmul.f32 0.5, %v5703_v39  ;;  %v4761_v29 = vld [vmem:[#allocation2 + $0x18] sm:$0xff] }
0x16e6   :  { %4744 = vtanh.f32 %v3131_v34  ;;  %v3169_v39 = vrot.slane %v4761_v29, %v5652_v57 }
0x16e7   :  { %4746 = vtanh.f32 %v3135_v37 }
0x16e8   :  { %4748 = vtanh.f32 %v3133_v59 }
0x16e9   :  { %4750 = vtanh.f32 %v3137_v41 }
0x16ec   :  { %v4737_v49 = vpop.eup %4736 }
0x16ed   :  { %v4739_v46 = vpop.eup %4738  ;;  %v3146_v47 = vadd.f32 1.0, %v4737_v49 }
0x16ee   :  { %v4741_v55 = vpop.eup %4740  ;;  %v3148_v56 = vadd.f32 1.0, %v4739_v46 }
0x16ef   :  { %v4743_v58 = vpop.eup %4742  ;;  %v3150_v63 = vadd.f32 1.0, %v4741_v55  ;;  %v3154_v36 = vmul.f32 %v3146_v47, %v3090_v60 }
0x16f0   :  { %v4745_v20 = vpop.eup %4744  ;;  %v3152_v31 = vadd.f32 1.0, %v4743_v58  ;;  %v3156_v2 = vmul.f32 %v3148_v56, %v3092_v13  ;;  %v4645_v13 = vld [vmem:[#allocation16 + $0x28] sm:$0xff]  }
0x16f1   :  { %v4747_v27 = vpop.eup %4746  ;;  %v3147_v38 = vadd.f32 1.0, %v4745_v20  ;;  %v3158_v19 = vmul.f32 %v3150_v63, %v3094_v62  ;;  %v4640_v62 = vld [vmem:[#allocation16] sm:$0xff]   ;;  %v4641_v63 = vld [vmem:[#allocation16 + $0x8] sm:$0xff]  }
0x16f2   :  { %v4749_v16 = vpop.eup %4748  ;;  %v3151_v17 = vadd.f32 1.0, %v4747_v27  ;;  %v3160_v3 = vmul.f32 %v3152_v31, %v3096_v1  ;;  %v4644_v20 = vld [vmem:[#allocation16 + $0x20] sm:$0xff]   ;;  %v4646_v1 = vld [vmem:[#allocation16 + $0x30] sm:$0xff]  }
0x16f3   :  { %v4751_v42 = vpop.eup %4750  ;;  %v3149_v26 = vadd.f32 1.0, %v4749_v16  ;;  %v3162_v28 = vpack.c.bf16 %v3158_v19, %v3154_v36  ;;  %v3155_v5 = vmul.f32 %v3147_v38, %v3091_v40  ;;  %v4648_v31 = vld [vmem:[#allocation18] ss:$8 sps:$4 sm:$0xff]   ;;  %v4650_v27 = vld [vmem:[#allocation18 + $0x4] ss:$8 sps:$4 sm:$0xff]   ;;  %v4647_v36 = vld [vmem:[#allocation16 + $0x38] sm:$0xff]  }
0x16f4   :  { %v3159_v7 = vmul.f32 %v3151_v17, %v3095_v54  ;;  %v3153_v8 = vadd.f32 1.0, %v4751_v42  ;;  %v3164_v51 = vpack.c.bf16 %v3160_v3, %v3156_v2  ;;  %v4653_v40 = vld [vmem:[#allocation18 + $0x14] ss:$8 sps:$4 sm:$0xff]   ;;  %3705 = vmatprep.subr.bf16.mxu0 %v4650_v27  ;;  %v4651_v38 = vld [vmem:[#allocation18 + $0x10] ss:$8 sps:$4 sm:$0xff]  }
0x16f5   :  { %v3157_v48 = vmul.f32 %v3149_v26, %v3093_v61  ;;  %v4656_v19 = vld [vmem:[#allocation18 + $0x24] ss:$8 sps:$4 sm:$0xff]   ;;  %v4654_v16 = vld [vmem:[#allocation18 + $0x20] ss:$8 sps:$4 sm:$0xff]   ;;  %v4659_v54 = vld [vmem:[#allocation18 + $0x34] ss:$8 sps:$4 sm:$0xff]  }
0x16f6   :  { %v3163_v9 = vpack.c.bf16 %v3159_v7, %v3155_v5  ;;  %v3161_v50 = vmul.f32 %v3153_v8, %v3097_v35  ;;  %v4657_v17 = vld [vmem:[#allocation18 + $0x30] ss:$8 sps:$4 sm:$0xff]  }
0x16f8   :  { %3394 = vmatprep.mubr.bf16.mxu1 %v3163_v9  ;;  %v3165_v10 = vpack.c.bf16 %v3161_v50, %v3157_v48 }
0x16f9   :  { %3395 = vmatmul.mubr.bf16.vlgmr.msra.gmra.mrb[68].mxu1 %v3162_v28  ;;  %v3470_v28 = vsub.s32 1, %v5328_v43 }
0x16fa   :  { %3435 = vmatprep.mubr.bf16.mxu0 %v3165_v10  ;;  %4361 = vmatprep.mubr.msk.bf16.mxu1 %vm5042_vm0, %v5040_v4 }
0x16fb   :  { %3436 = vmatmul.mubr.bf16.vlgmr.msra.gmra.mrb[44].mxu0 %v3164_v51  ;;  %4346 = vmatpush3.bf16.msra.mxu1 %v4640_v62  ;;  %v3477_v7 = vrot.slane %v5681_v18, %v3470_v28  ;;  %v4665_v18 = vld [vmem:[#allocation18 + $0x54] ss:$8 sps:$4 sm:$0xff]  }
0x16fc   :  { %3737 = vmatprep.mubr.bf16.mxu0 %v5041_v30  ;;  %4347 = vmatprep.subr.bf16.mxu1 %v5040_v4 }
0x16fd   :  { %3706 = vmatpush1.bf16.msra.mxu0 %v4648_v31 }
0x16fe   :  { %3707 = vmatprep.subr.bf16.mxu0 %v4653_v40 }
0x16ff   :  { %4348 = vmatpush3.bf16.msra.mxu1 %v4641_v63 }
0x1700   :  { %4349 = vmatprep.subr.bf16.mxu1 %v5040_v4 }
0x1701   :  { %3708 = vmatpush1.bf16.msra.mxu0 %v4651_v38 }
0x1702   :  { %3709 = vmatprep.subr.bf16.mxu0 %v4656_v19 }
0x1705   :  { %3710 = vmatpush1.bf16.msra.mxu0 %v4654_v16 }
0x1706   :  { %3711 = vmatprep.subr.bf16.mxu0 %v4659_v54 }
0x1709   :  { %3712 = vmatpush1.bf16.msra.mxu0 %v4657_v17 }
0x17cc   :  { %v4132_v52 = vpop.f32.mrb[68].mxu1 }
0x17cd   :  { %v4133_v11 = vpop.f32.mrb[69].mxu1 }
0x17ce   :  { %v4154_v6 = vpop.f32.mrb[44].mxu0  ;;  %v4134_v12 = vadd.f32 %v4133_v11, %v4132_v52  ;;  %v4135_v14 = vpop.f32.mrb[70].mxu1 }
0x17cf   :  { %v4155_v15 = vpop.f32.mrb[45].mxu0  ;;  %v4136_v21 = vpop.f32.mrb[71].mxu1 }
0x17d0   :  { %v3397_v22 = vadd.f32 %v4134_v12, %v3169_v39  ;;  %v4156_v23 = vadd.f32 %v4155_v15, %v4154_v6  ;;  %v4157_v24 = vpop.f32.mrb[46].mxu0  ;;  %v4137_v32 = vadd.f32 %v4136_v21, %v4135_v14  ;;  %v4660_v15 = vld [vmem:[#allocation18 + $0x40] ss:$8 sps:$4 sm:$0xff]   ;;  %v4663_v21 = vld [vmem:[#allocation18 + $0x50] ss:$8 sps:$4 sm:$0xff]  }
0x17d1   :  { %v4158_v33 = vpop.f32.mrb[47].mxu0 }
0x17d2   :  { %v3438_v34 = vadd.f32 %v4156_v23, %v3397_v22  ;;  %v3400_v37 = vadd.f32 %v4137_v32, %v3169_v39  ;;  %v4159_v45 = vadd.f32 %v4158_v33, %v4157_v24  ;;  %v4668_v22 = vld [vmem:[#allocation18 + $0x64] ss:$8 sps:$4 sm:$0xff]   ;;  %v4666_v23 = vld [vmem:[#allocation18 + $0x60] ss:$8 sps:$4 sm:$0xff]   ;;  %v4671_v24 = vld [vmem:[#allocation18 + $0x74] ss:$8 sps:$4 sm:$0xff]  }
0x17d3   :  { %v4669_v32 = vld [vmem:[#allocation18 + $0x70] ss:$8 sps:$4 sm:$0xff]  }
0x17d4   :  { %v3441_v59 = vadd.f32 %v4159_v45, %v3400_v37  ;;  %v3444_v30 = vadd.f32 %v3438_v34, %v5672_v0  ;;  %v4642_v0 = vld [vmem:[#allocation16 + $0x10] sm:$0xff]  }
0x17d5   :  { %4350 = vmatpush3.bf16.msra.mxu1 %v4642_v0  ;;  %v4762_v33 = vld [vmem:[#allocation2 + $0x10] sm:$0xff] }
0x17d6   :  { %3446 = vadd.xlane.f32.xlu1 %v3444_v30  ;;  %v3445_v57 = vadd.f32 %v3441_v59, %v5674_v53  ;;  %v4643_v53 = vld [vmem:[#allocation16 + $0x18] sm:$0xff]   ;;  %4351 = vmatprep.subr.bf16.mxu1 %v5040_v4  ;;  %v3501_v34 = vrot.slane %v4762_v33, %v5331_v44 }
0x17d8   :  { %3448 = vadd.xlane.f32.xlu0 %v3445_v57 }
0x17d9   :  { %4352 = vmatpush3.bf16.msra.mxu1 %v4643_v53 }
0x17da   :  { %4353 = vmatprep.subr.bf16.mxu1 %v5040_v4 }
0x17dd   :  { %4354 = vmatpush3.bf16.msra.mxu1 %v4644_v20 }
0x17de   :  { %4355 = vmatprep.subr.bf16.mxu1 %v5040_v4 }
0x17e1   :  { %4356 = vmatpush3.bf16.msra.mxu1 %v4645_v13 }
0x17e2   :  { %4357 = vmatprep.subr.bf16.mxu1 %v5040_v4 }
0x17e5   :  { %4358 = vmatpush3.bf16.msra.mxu1 %v4646_v1 }
0x17e6   :  { %4359 = vmatprep.subr.bf16.mxu1 %v5040_v4  ;;  %v3471_v4 = vrot.slane %v5679_v25, %v3470_v28  ;;  %v4662_v25 = vld [vmem:[#allocation18 + $0x44] ss:$8 sps:$4 sm:$0xff]  }
0x17e7   :  { %3713 = vmatprep.subr.bf16.mxu0 %v4662_v25 }
0x17e8   :  { %3714 = vmatpush1.bf16.msra.mxu0 %v4660_v15 }
0x17e9   :  { %4360 = vmatpush3.bf16.msra.mxu1 %v4647_v36  ;;  %3715 = vmatprep.subr.bf16.mxu0 %v4665_v18 }
0x17ec   :  { %3716 = vmatpush1.bf16.msra.mxu0 %v4663_v21 }
0x17ed   :  { %3717 = vmatprep.subr.bf16.mxu0 %v4668_v22 }
0x17f0   :  { %3718 = vmatpush1.bf16.msra.mxu0 %v4666_v23 }
0x17f1   :  { %3719 = vmatprep.subr.bf16.mxu0 %v4671_v24 }
0x17f4   :  { %3720 = vmatpush1.bf16.msra.mxu0 %v4669_v32 }
0x1863   :  { %v3447_v41 = vpop.xlane.xlu1 %3446 }
0x1864   :  { %v3450_v49 = vmul.f32 0.0078125, %v3447_v41 }
0x1865   :  { %v3449_v46 = vpop.xlane.xlu0 %3448 }
0x1866   :  { %v3452_v47 = vsub.f32 %v3444_v30, %v3450_v49  ;;  %v3451_v55 = vmul.f32 0.0078125, %v3449_v46  ;;  %v4763_v46 = vld [vmem:[#allocation2] sm:$0xff] }
0x1868   :  { %v3453_v56 = vsub.f32 %v3445_v57, %v3451_v55  ;;  %v3454_v58 = vmul.f32 %v3452_v47, %v3452_v47  ;;  %v4764_v55 = vld [vmem:[#allocation2 + $0x8] sm:$0xff] }
0x186a   :  { %3456 = vadd.xlane.f32.xlu1 %v3454_v58  ;;  %v3455_v60 = vmul.f32 %v3453_v56, %v3453_v56 }
0x186c   :  { %3458 = vadd.xlane.f32.xlu0 %v3455_v60 }
0x18f7   :  { %v3457_v2 = vpop.xlane.xlu1 %3456 }
0x18f8   :  { %v3460_v3 = vmul.f32 0.0078125, %v3457_v2 }
0x18f9   :  { %v3459_v42 = vpop.xlane.xlu0 %3458 }
0x18fa   :  { %v3462_v61 = vadd.f32 1e-12, %v3460_v3  ;;  %v3461_v35 = vmul.f32 0.0078125, %v3459_v42 }
0x18fc   :  { %4752 = vrsqrt.f32 %v3462_v61  ;;  %v3463_v26 = vadd.f32 1e-12, %v3461_v35 }
0x18fe   :  { %4754 = vrsqrt.f32 %v3463_v26 }
0x1906   :  { %v4753_v5 = vpop.eup %4752 }
0x1907   :  { %v3466_v8 = vmul.f32 %v4753_v5, %v3452_v47  ;;  %v3620_v47 = vrot.slane %v4763_v46, %v3470_v28 }
0x1908   :  { %v4755_v51 = vpop.eup %4754 }
0x1909   :  { %v3472_v9 = vmul.f32 %v3471_v4, %v3466_v8  ;;  %v3467_v48 = vmul.f32 %v4755_v51, %v3453_v56  ;;  %v3624_v56 = vrot.slane %v4764_v55, %v3470_v28 }
0x190b   :  { %v3473_v50 = vmul.f32 %v3471_v4, %v3467_v48  ;;  %v3478_v10 = vadd.f32 %v3477_v7, %v3472_v9 }
0x190d   :  { %v3479_v52 = vadd.f32 %v3477_v7, %v3473_v50  ;;  %v3480_v29 = vpack.c.bf16 %v3478_v10, %v3478_v10 }
0x190f   :  { %v3481_v39 = vpack.c.bf16 %v3479_v52, %v3479_v52  ;;  %v3504_v6 = vunpack.c.l.b16 %v3480_v29 }
0x1911   :  { %v3505_v11 = vunpack.c.l.b16 %v3481_v39 }
0x1913   :  { %v3506_v12 = vrot.slane %v3505_v11, 7 }
0x1915   :  { %v3508_v14 = vsel %vm3507_vm4, %v3506_v12, %v3504_v6 }
0x1916   :  { %v3509_v43 = vpack.c.b16 %v3508_v14, %v3508_v14 }
0x1918   :  { %4362 = vmatmul.mubr.bf16.vlgmr.msra.gmra.mrb[72].mxu1 %v3509_v43 }
0x19eb   :  { %v3593_v37 = vpop.f32.mrb[72].mxu1 }
0x19ec   :  { %v3594_v45 = vadd.f32 %v3593_v37, %v3501_v34  ;;  %v4363_v59 = vpop.f32.mrb[73].mxu1 }
0x19ed   :  { %v3596_v30 = vpop.f32.mrb[74].mxu1 }
0x19ee   :  { %4756 = vtanh.f32 %v3594_v45  ;;  %v4364_v57 = vpop.f32.mrb[75].mxu1 }
0x19f8   :  { %v4757_v41 = vpop.eup %4756 }
0x19f9   :  { %v3600_v49 = vpack.c.bf16 %v4757_v41, %v4757_v41 }
0x19fb   :  { %3738 = vmatmul.mubr.bf16.vlgmr.msra.gmra.mrb[48].mxu0 %v3600_v49 }
0x1ace   :  { %v3739_v58 = vpop.f32.mrb[48].mxu0 }
0x1acf   :  { %v3740_v60 = vadd.f32 %v3739_v58, %v3620_v47  ;;  %v3741_v62 = vpop.f32.mrb[49].mxu0 }
0x1ad0   :  { %v3742_v63 = vadd.f32 %v3741_v62, %v3624_v56  ;;  %v3743_v0 = vpop.f32.mrb[50].mxu0 }
0x1ad1   :  { %v3746_v53 = vmax.f32 %v3740_v60, 0.0  ;;  %v3744_v44 = vpop.f32.mrb[51].mxu0 }
0x1ad2   :  { %v3747_v20 = vmax.f32 %v3742_v63, 0.0 }
0x1ad4   :  { %v3750_v13 = vcombine.low %v3746_v53, %v3747_v20 }
0x1ad6   :  { %4003 = vst.sshfl [vmem:[%s5764_s13] sm:$0x33 pattern:$0x76325410] %v3750_v13 }
0x1ad7   :  { %3764 = vsyncpa [#allocation3], 1 }
0x1ad8   :  { %3765 = vsyncpa [#allocation5], 1 }
0x1ad9   :  { %3766 = vsyncpa [#allocation8], 1 }
0x1ada   :  { %3767 = vsyncpa [#allocation11], 1 }
0x1adb   :  { %3768 = vsyncpa [#allocation14], 1 }
0x1adc   :  { %3769 = vsyncpa [#allocation17], 1 }

</bundles_post_ra>
